<compile_context>
chip_gen: v7x
topology: tpu7x:2x2x1
jax: 0.10.0
libtpu: 0.0.40
codegen_flags: <defaults>
</compile_context>

<pallas_src>
import math

import jax
import jax.numpy as jnp
from jax.experimental import pallas as pl
from jax.experimental.pallas import tpu as pltpu

EPS = 1e-5


# ----------------------------------------------------------------------------
# Fused Pallas kernel (one grid step = B_blk images)
# ----------------------------------------------------------------------------
def _make_kernel(B, H, W, Cin, planes, cout, stride, has_conv_sc, emit_preact):
    HW = H * W
    Ho = (H + 2 - 3) // stride + 1
    Wo = (W + 2 - 3) // stride + 1
    HoWo = Ho * Wo
    P = planes
    Kcat = planes + (Cin if has_conv_sc else 0)

    def kernel(*refs):
        refs = list(refs)
        x_ref, w1_ref, b1_ref, w2_ref, b2_ref, w3_ref, b3_ref = refs[:7]
        pos = 7
        out_ref = refs[pos]; pos += 1
        pre_ref = None
        if emit_preact:
            pre_ref = refs[pos]; pos += 1
        pad_ref = refs[pos]; pos += 1
        col_ref = refs[pos]; pos += 1
        cat_ref = None
        if has_conv_sc:
            cat_ref = refs[pos]; pos += 1

        x = x_ref[...]                                     # (B, H, W, Cin) f32
        x2d = x.reshape(B * HW, Cin)                       # f32 (kept for identity add)
        x2d_b = x2d.astype(jnp.bfloat16)

        # ---- conv1 (1x1) + bn1 + relu ------------------------------------
        a1 = jnp.dot(x2d_b, w1_ref[...], preferred_element_type=jnp.float32)
        out1 = jnp.maximum(a1 + b1_ref[...], 0.0).astype(jnp.bfloat16)  # (BHW, P)

        # ---- pad scratch: zero only the halo ring, write the interior ----
        pad_ref[:, 0:1, :, :] = jnp.zeros((B, 1, W + 2, P), jnp.bfloat16)
        pad_ref[:, H + 1:H + 2, :, :] = jnp.zeros((B, 1, W + 2, P), jnp.bfloat16)
        pad_ref[:, :, 0:1, :] = jnp.zeros((B, H + 2, 1, P), jnp.bfloat16)
        pad_ref[:, :, W + 1:W + 2, :] = jnp.zeros((B, H + 2, 1, P), jnp.bfloat16)
        pad_ref[:, 1:H + 1, 1:W + 1, :] = out1.reshape(B, H, W, P)

        # ---- conv2 (3x3, pad=1) as a single im2col matmul (K = 9*planes) -
        for kh in range(3):
            for kw in range(3):
                t = 3 * kh + kw
                tap = pad_ref[:, kh:kh + H, kw:kw + W, :]          # (B,H,W,P) bf16
                col_ref[:, t * P:(t + 1) * P] = tap.reshape(B * HW, P)
        a2 = jnp.dot(col_ref[...], w2_ref[...], preferred_element_type=jnp.float32)
        out2 = jnp.maximum(a2 + b2_ref[...], 0.0)           # (BHW, P) f32, stride-1

        if has_conv_sc:
            # ---- build [out2_strided | x_strided] along K in VMEM ---------
            if stride == 1:
                cat_ref[:, :, :, 0:P] = out2.astype(jnp.bfloat16).reshape(B, H, W, P)
                cat_ref[:, :, :, P:Kcat] = x.astype(jnp.bfloat16)
            else:
                # row subsample: split the (leading) H dim and take slot 0
                r2 = out2.reshape(B, Ho, stride, W, P)[:, :, 0].astype(jnp.bfloat16)
                rx = x.reshape(B, Ho, stride, W, Cin)[:, :, 0].astype(jnp.bfloat16)
                # column subsample: tiny static copies into the cat scratch
                for wo in range(Wo):
                    c = wo * stride
                    cat_ref[:, :, wo:wo + 1, 0:P] = r2[:, :, c:c + 1, :]
                    cat_ref[:, :, wo:wo + 1, P:Kcat] = rx[:, :, c:c + 1, :]
            rhs = cat_ref[...].reshape(B * HoWo, Kcat)
            # ---- fused conv3+bn3 + shortcut-conv+bn (one matmul) ----------
            pre = jnp.dot(rhs, w3_ref[...],
                          preferred_element_type=jnp.float32) + b3_ref[...]
        else:
            # identity shortcut (stride==1, Cin==cout); add f32 input
            a3 = jnp.dot(out2.astype(jnp.bfloat16), w3_ref[...],
                         preferred_element_type=jnp.float32) + b3_ref[...]
            pre = a3 + x2d

        out_ref[...] = jnp.maximum(pre, 0.0).astype(out_ref.dtype)
        if emit_preact:
            pre_ref[...] = pre.astype(pre_ref.dtype)

    return kernel


# ----------------------------------------------------------------------------
# Wrapper: BN folding, layout conversion, pallas_call plumbing
# ----------------------------------------------------------------------------
def _fold_bn(bn):
    gamma, beta, mean, var = bn
    scale = gamma / jnp.sqrt(var + EPS)
    bias = beta - mean * scale
    return scale, bias


def _pick_batch_block(N, HW, target_rows=512):
    want = max(1, min(N, (target_rows + HW - 1) // HW))
    for b in range(want, 0, -1):
        if N % b == 0:
            return b
    return 1


def bottleneck_forward(x_nchw, params, stride, is_last=False):
    """Fused Pallas forward of Bottleneck (expansion=4), inference-mode BN."""
    x = jnp.transpose(x_nchw, (0, 2, 3, 1)).astype(jnp.float32)   # NCHW -> NHWC
    N, H, W, Cin = x.shape
    planes = params["conv1_w"].shape[0]
    cout = 4 * planes
    if stride != 1:
        assert H % stride == 0 and W % stride == 0, "spatial dims must divide stride"
    Ho = (H + 2 - 3) // stride + 1
    Wo = (W + 2 - 3) // stride + 1
    HW, HoWo = H * W, Ho * Wo
    has_conv_sc = (stride != 1) or (Cin != cout)

    # Fold BN scale into conv weights; keep per-channel bias (f32).
    s1, b1 = _fold_bn(params["bn1"])
    s2, b2 = _fold_bn(params["bn2"])
    s3, b3 = _fold_bn(params["bn3"])
    w1 = (params["conv1_w"].reshape(planes, Cin).T * s1[None, :]).astype(jnp.bfloat16)
    w2 = (jnp.transpose(params["conv2_w"], (2, 3, 1, 0)).reshape(9 * planes, planes)
          * s2[None, :]).astype(jnp.bfloat16)
    w3 = params["conv3_w"].reshape(cout, planes).T * s3[None, :]
    b3c = b3
    if has_conv_sc:
        ssc, bsc = _fold_bn(params["bn_sc"])
        ws = params["sc_w"].reshape(cout, Cin).T * ssc[None, :]
        w3 = jnp.concatenate([w3, ws], axis=0)             # (planes+Cin, cout)
        b3c = b3 + bsc
    w3 = w3.astype(jnp.bfloat16)
    b1 = b1.reshape(1, planes).astype(jnp.float32)
    b2 = b2.reshape(1, planes).astype(jnp.float32)
    b3c = b3c.reshape(1, cout).astype(jnp.float32)

    B_blk = _pick_batch_block(N, HW)
    grid = (N // B_blk,)
    Kcat = planes + (Cin if has_conv_sc else 0)

    inputs = [x, w1, b1, w2, b2, w3, b3c]
    in_specs = [
        pl.BlockSpec((B_blk, H, W, Cin), lambda n: (n, 0, 0, 0)),
        pl.BlockSpec((Cin, planes), lambda n: (0, 0)),
        pl.BlockSpec((1, planes), lambda n: (0, 0)),
        pl.BlockSpec((9 * planes, planes), lambda n: (0, 0)),
        pl.BlockSpec((1, planes), lambda n: (0, 0)),
        pl.BlockSpec((Kcat, cout), lambda n: (0, 0)),
        pl.BlockSpec((1, cout), lambda n: (0, 0)),
    ]

    out_shape = [jax.ShapeDtypeStruct((N * HoWo, cout), jnp.bfloat16)]
    out_specs = [pl.BlockSpec((B_blk * HoWo, cout), lambda n: (n, 0))]
    if is_last:
        out_shape.append(jax.ShapeDtypeStruct((N * HoWo, cout), jnp.float32))
        out_specs.append(pl.BlockSpec((B_blk * HoWo, cout), lambda n: (n, 0)))

    scratch_shapes = [
        pltpu.VMEM((B_blk, H + 2, W + 2, planes), jnp.bfloat16),   # padded out1
        pltpu.VMEM((B_blk * HW, 9 * planes), jnp.bfloat16),        # im2col slab
    ]
    if has_conv_sc:
        scratch_shapes.append(pltpu.VMEM((B_blk, Ho, Wo, Kcat), jnp.bfloat16))

    flops = 2 * N * (HW * Cin * planes + HW * 9 * planes * planes
                     + HoWo * Kcat * cout)
    bytes_in = sum(int(math.prod(a.shape)) * a.dtype.itemsize for a in inputs)
    bytes_out = sum(int(math.prod(o.shape)) * jnp.dtype(o.dtype).itemsize
                    for o in out_shape)

    kernel = _make_kernel(B_blk, H, W, Cin, planes, cout, stride,
                          has_conv_sc, is_last)

    result = pl.pallas_call(
        kernel,
        out_shape=tuple(out_shape),
        grid=grid,
        in_specs=in_specs,
        out_specs=tuple(out_specs),
        scratch_shapes=scratch_shapes,
        compiler_params=pltpu.CompilerParams(
            dimension_semantics=("parallel",)),
        cost_estimate=pl.CostEstimate(flops=int(flops), transcendentals=0,
                                      bytes_accessed=int(bytes_in + bytes_out)),
    )(*inputs)

    def to_nchw(a):
        return jnp.transpose(a.reshape(N, Ho, Wo, cout), (0, 3, 1, 2))

    out = to_nchw(result[0].astype(jnp.float32))
    if is_last:
        return out, to_nchw(result[1])
    return out


# ----------------------------------------------------------------------------
# Pure-JAX reference (NCHW, mirrors the PyTorch module) for verification
# ----------------------------------------------------------------------------
def reference_forward(x, params, stride):
    def conv(x, w, s=1, p=0):
        return jax.lax.conv_general_dilated(
            x, w, (s, s), [(p, p), (p, p)],
            dimension_numbers=("NCHW", "OIHW", "NCHW"))

    def bn(x, bnp):
        gamma, beta, mean, var = bnp
        scale = gamma / jnp.sqrt(var + EPS)
        bias = beta - mean * scale
        return x * scale[None, :, None, None] + bias[None, :, None, None]

    cout = params["conv3_w"].shape[0]
    out = jax.nn.relu(bn(conv(x, params["conv1_w"]), params["bn1"]))
    out = jax.nn.relu(bn(conv(out, params["conv2_w"], s=stride, p=1), params["bn2"]))
    out = bn(conv(out, params["conv3_w"]), params["bn3"])
    if stride != 1 or x.shape[1] != cout:
        sc = bn(conv(x, params["sc_w"], s=stride), params["bn_sc"])
    else:
        sc = x
    preact = out + sc
    return jax.nn.relu(preact), preact


# ----------------------------------------------------------------------------
# Deterministic parameter construction
# ----------------------------------------------------------------------------
def _conv_init(key, shape):  # OIHW (torch layout)
    fan_in = shape[1] * shape[2] * shape[3]
    return jax.random.normal(key, shape, jnp.float32) / jnp.sqrt(float(fan_in))


def _bn_init(key, c):
    k1, k2, k3, k4 = jax.random.split(key, 4)
    gamma = 1.0 + 0.1 * jax.random.normal(k1, (c,), jnp.float32)
    beta = 0.1 * jax.random.normal(k2, (c,), jnp.float32)
    mean = 0.1 * jax.random.normal(k3, (c,), jnp.float32)
    var = jax.random.uniform(k4, (c,), jnp.float32, 0.5, 1.5)
    return (gamma, beta, mean, var)


def make_params(key, in_planes, planes):
    cout = 4 * planes
    ks = jax.random.split(key, 8)
    return {
        "conv1_w": _conv_init(ks[0], (planes, in_planes, 1, 1)),
        "bn1": _bn_init(ks[1], planes),
        "conv2_w": _conv_init(ks[2], (planes, planes, 3, 3)),
        "bn2": _bn_init(ks[3], planes),
        "conv3_w": _conv_init(ks[4], (cout, planes, 1, 1)),
        "bn3": _bn_init(ks[5], cout),
        "sc_w": _conv_init(ks[6], (cout, in_planes, 1, 1)),
        "bn_sc": _bn_init(ks[7], cout),
    }


if __name__ == "__main__":
    key = jax.random.PRNGKey(0)
    k_x, k_p, k_x2, k_p2 = jax.random.split(key, 4)

    # Test 1: stride=2, conv shortcut, is_last=True (returns out + preact).
    N, in_planes, planes, H, W, stride = 2, 16, 8, 8, 8, 2
    x = jax.random.normal(k_x, (N, in_planes, H, W), jnp.float32)     # NCHW
    params = make_params(k_p, in_planes, planes)

    out, preact = bottleneck_forward(x, params, stride, is_last=True)
    out = jax.block_until_ready(out)
    preact = jax.block_until_ready(preact)

    ref_out, ref_preact = reference_forward(x, params, stride)
    assert out.shape == ref_out.shape == (N, 4 * planes, H // stride, W // stride)
    assert jnp.allclose(out, ref_out, rtol=5e-2, atol=5e-2), \
        float(jnp.max(jnp.abs(out - ref_out)))
    assert jnp.allclose(preact, ref_preact, rtol=5e-2, atol=5e-2), \
        float(jnp.max(jnp.abs(preact - ref_preact)))

    # Test 2: stride=1 identity shortcut, is_last=False (single output).
    in_planes2, planes2 = 32, 8                                        # Cin == 4*planes
    x2 = jax.random.normal(k_x2, (N, in_planes2, H, W), jnp.float32)
    params2 = make_params(k_p2, in_planes2, planes2)

    out2 = bottleneck_forward(x2, params2, 1, is_last=False)
    out2 = jax.block_until_ready(out2)
    ref_out2, _ = reference_forward(x2, params2, 1)
    assert out2.shape == ref_out2.shape == (N, 4 * planes2, H, W)
    assert jnp.allclose(out2, ref_out2, rtol=5e-2, atol=5e-2), \
        float(jnp.max(jnp.abs(out2 - ref_out2)))

    print("KERNEL_OK")
</pallas_src>

<mosaic_0001>
module attributes {stable_mosaic.version = 11 : i64} {
  func.func @kernel(%arg0: i32, %arg1: memref<2x8x8x16xf32, #tpu.memory_space<vmem>>, %arg2: memref<16x8xbf16, #tpu.memory_space<vmem>>, %arg3: memref<1x8xf32, #tpu.memory_space<vmem>>, %arg4: memref<72x8xbf16, #tpu.memory_space<vmem>>, %arg5: memref<1x8xf32, #tpu.memory_space<vmem>>, %arg6: memref<24x32xbf16, #tpu.memory_space<vmem>>, %arg7: memref<1x32xf32, #tpu.memory_space<vmem>>, %arg8: memref<32x32xbf16, #tpu.memory_space<vmem>>, %arg9: memref<32x32xf32, #tpu.memory_space<vmem>>, %arg10: memref<2x10x10x8xbf16, #tpu.memory_space<vmem>>, %arg11: memref<128x72xbf16, #tpu.memory_space<vmem>>, %arg12: memref<2x4x4x24xbf16, #tpu.memory_space<vmem>>) attributes {dimension_semantics = [#tpu.dimension_semantics<parallel>], iteration_bounds = array<i64: 1>, scalar_prefetch = 0 : i64, scratch_operands = 3 : i64, tpu.core_type = #tpu.core_type<tc>, window_params = [{transform_indices = @transform_0, window_bounds = array<i64: 2, 8, 8, 16>}, {pipeline_mode = #tpu.pipeline_mode<synchronous>, transform_indices = @transform_1, window_bounds = array<i64: 16, 8>}, {pipeline_mode = #tpu.pipeline_mode<synchronous>, transform_indices = @transform_2, window_bounds = array<i64: 1, 8>}, {pipeline_mode = #tpu.pipeline_mode<synchronous>, transform_indices = @transform_3, window_bounds = array<i64: 72, 8>}, {pipeline_mode = #tpu.pipeline_mode<synchronous>, transform_indices = @transform_4, window_bounds = array<i64: 1, 8>}, {pipeline_mode = #tpu.pipeline_mode<synchronous>, transform_indices = @transform_5, window_bounds = array<i64: 24, 32>}, {pipeline_mode = #tpu.pipeline_mode<synchronous>, transform_indices = @transform_6, window_bounds = array<i64: 1, 32>}, {transform_indices = @transform_7, window_bounds = array<i64: 32, 32>}, {transform_indices = @transform_8, window_bounds = array<i64: 32, 32>}]} {
    %c0 = arith.constant 0 : index
    %c0_0 = arith.constant 0 : index
    %c0_1 = arith.constant 0 : index
    %c0_2 = arith.constant 0 : index
    %0 = vector.load %arg1[%c0, %c0_0, %c0_1, %c0_2] : memref<2x8x8x16xf32, #tpu.memory_space<vmem>>, vector<2x8x8x16xf32>
    %1 = vector.shape_cast %0 : vector<2x8x8x16xf32> to vector<128x16xf32>
    %2 = arith.truncf %1 : vector<128x16xf32> to vector<128x16xbf16>
    %c0_3 = arith.constant 0 : index
    %c0_4 = arith.constant 0 : index
    %3 = vector.load %arg2[%c0_3, %c0_4] : memref<16x8xbf16, #tpu.memory_space<vmem>>, vector<16x8xbf16>
    %cst = arith.constant dense<0.000000e+00> : vector<128x8xf32>
    %4 = tpu.matmul %2, %3, %cst {dimension_numbers = #tpu.dot_dimension_numbers<[1], [0], [0], [1], [0, 0, 1, 1], [], []>} : vector<128x16xbf16>, vector<16x8xbf16>, vector<128x8xf32> -> vector<128x8xf32>
    %c0_5 = arith.constant 0 : index
    %c0_6 = arith.constant 0 : index
    %5 = vector.load %arg3[%c0_5, %c0_6] : memref<1x8xf32, #tpu.memory_space<vmem>>, vector<1x8xf32>
    %6 = vector.broadcast %5 : vector<1x8xf32> to vector<128x8xf32>
    %7 = arith.addf %4, %6 : vector<128x8xf32>
    %cst_7 = arith.constant 0.000000e+00 : f32
    %8 = vector.broadcast %cst_7 : f32 to vector<128x8xf32>
    %9 = arith.maximumf %7, %8 : vector<128x8xf32>
    %10 = arith.truncf %9 : vector<128x8xf32> to vector<128x8xbf16>
    %cst_8 = arith.constant 0.000000e+00 : bf16
    %11 = vector.broadcast %cst_8 : bf16 to vector<2x1x10x8xbf16>
    %c0_9 = arith.constant 0 : index
    %c0_10 = arith.constant 0 : index
    %c0_11 = arith.constant 0 : index
    %c0_12 = arith.constant 0 : index
    %12 = vector.load %arg10[%c0_9, %c0_10, %c0_11, %c0_12] : memref<2x10x10x8xbf16, #tpu.memory_space<vmem>>, vector<2x1x10x8xbf16>
    tpu.vector_store %arg10[%c0_9, %c0_10, %c0_11, %c0_12], %11 {strides = array<i32>} : memref<2x10x10x8xbf16, #tpu.memory_space<vmem>>, vector<2x1x10x8xbf16>,
    %cst_13 = arith.constant 0.000000e+00 : bf16
    %13 = vector.broadcast %cst_13 : bf16 to vector<2x1x10x8xbf16>
    %c0_14 = arith.constant 0 : index
    %c9 = arith.constant 9 : index
    %c0_15 = arith.constant 0 : index
    %c0_16 = arith.constant 0 : index
    %14 = vector.load %arg10[%c0_14, %c9, %c0_15, %c0_16] : memref<2x10x10x8xbf16, #tpu.memory_space<vmem>>, vector<2x1x10x8xbf16>
    tpu.vector_store %arg10[%c0_14, %c9, %c0_15, %c0_16], %13 {strides = array<i32>} : memref<2x10x10x8xbf16, #tpu.memory_space<vmem>>, vector<2x1x10x8xbf16>,
    %cst_17 = arith.constant 0.000000e+00 : bf16
    %15 = vector.broadcast %cst_17 : bf16 to vector<2x10x1x8xbf16>
    %c0_18 = arith.constant 0 : index
    %c0_19 = arith.constant 0 : index
    %c0_20 = arith.constant 0 : index
    %c0_21 = arith.constant 0 : index
    %16 = vector.load %arg10[%c0_18, %c0_19, %c0_20, %c0_21] : memref<2x10x10x8xbf16, #tpu.memory_space<vmem>>, vector<2x10x1x8xbf16>
    tpu.vector_store %arg10[%c0_18, %c0_19, %c0_20, %c0_21], %15 {strides = array<i32>} : memref<2x10x10x8xbf16, #tpu.memory_space<vmem>>, vector<2x10x1x8xbf16>,
    %cst_22 = arith.constant 0.000000e+00 : bf16
    %17 = vector.broadcast %cst_22 : bf16 to vector<2x10x1x8xbf16>
    %c0_23 = arith.constant 0 : index
    %c0_24 = arith.constant 0 : index
    %c9_25 = arith.constant 9 : index
    %c0_26 = arith.constant 0 : index
    %18 = vector.load %arg10[%c0_23, %c0_24, %c9_25, %c0_26] : memref<2x10x10x8xbf16, #tpu.memory_space<vmem>>, vector<2x10x1x8xbf16>
    tpu.vector_store %arg10[%c0_23, %c0_24, %c9_25, %c0_26], %17 {strides = array<i32>} : memref<2x10x10x8xbf16, #tpu.memory_space<vmem>>, vector<2x10x1x8xbf16>,
    %19 = vector.shape_cast %10 : vector<128x8xbf16> to vector<2x8x8x8xbf16>
    %c0_27 = arith.constant 0 : index
    %c1 = arith.constant 1 : index
    %c1_28 = arith.constant 1 : index
    %c0_29 = arith.constant 0 : index
    %20 = vector.load %arg10[%c0_27, %c1, %c1_28, %c0_29] : memref<2x10x10x8xbf16, #tpu.memory_space<vmem>>, vector<2x8x8x8xbf16>
    tpu.vector_store %arg10[%c0_27, %c1, %c1_28, %c0_29], %19 {strides = array<i32>} : memref<2x10x10x8xbf16, #tpu.memory_space<vmem>>, vector<2x8x8x8xbf16>,
    %c0_30 = arith.constant 0 : index
    %c0_31 = arith.constant 0 : index
    %c0_32 = arith.constant 0 : index
    %c0_33 = arith.constant 0 : index
    %21 = vector.load %arg10[%c0_30, %c0_31, %c0_32, %c0_33] : memref<2x10x10x8xbf16, #tpu.memory_space<vmem>>, vector<2x8x8x8xbf16>
    %22 = vector.shape_cast %21 : vector<2x8x8x8xbf16> to vector<128x8xbf16>
    %c0_34 = arith.constant 0 : index
    %c0_35 = arith.constant 0 : index
    %23 = vector.load %arg11[%c0_34, %c0_35] : memref<128x72xbf16, #tpu.memory_space<vmem>>, vector<128x8xbf16>
    tpu.vector_store %arg11[%c0_34, %c0_35], %22 {strides = array<i32>} : memref<128x72xbf16, #tpu.memory_space<vmem>>, vector<128x8xbf16>,
    %c0_36 = arith.constant 0 : index
    %c0_37 = arith.constant 0 : index
    %c1_38 = arith.constant 1 : index
    %c0_39 = arith.constant 0 : index
    %24 = vector.load %arg10[%c0_36, %c0_37, %c1_38, %c0_39] : memref<2x10x10x8xbf16, #tpu.memory_space<vmem>>, vector<2x8x8x8xbf16>
    %25 = vector.shape_cast %24 : vector<2x8x8x8xbf16> to vector<128x8xbf16>
    %c0_40 = arith.constant 0 : index
    %c8 = arith.constant 8 : index
    %26 = vector.load %arg11[%c0_40, %c8] : memref<128x72xbf16, #tpu.memory_space<vmem>>, vector<128x8xbf16>
    tpu.vector_store %arg11[%c0_40, %c8], %25 {strides = array<i32>} : memref<128x72xbf16, #tpu.memory_space<vmem>>, vector<128x8xbf16>,
    %c0_41 = arith.constant 0 : index
    %c0_42 = arith.constant 0 : index
    %c2 = arith.constant 2 : index
    %c0_43 = arith.constant 0 : index
    %27 = vector.load %arg10[%c0_41, %c0_42, %c2, %c0_43] : memref<2x10x10x8xbf16, #tpu.memory_space<vmem>>, vector<2x8x8x8xbf16>
    %28 = vector.shape_cast %27 : vector<2x8x8x8xbf16> to vector<128x8xbf16>
    %c0_44 = arith.constant 0 : index
    %c16 = arith.constant 16 : index
    %29 = vector.load %arg11[%c0_44, %c16] : memref<128x72xbf16, #tpu.memory_space<vmem>>, vector<128x8xbf16>
    tpu.vector_store %arg11[%c0_44, %c16], %28 {strides = array<i32>} : memref<128x72xbf16, #tpu.memory_space<vmem>>, vector<128x8xbf16>,
    %c0_45 = arith.constant 0 : index
    %c1_46 = arith.constant 1 : index
    %c0_47 = arith.constant 0 : index
    %c0_48 = arith.constant 0 : index
    %30 = vector.load %arg10[%c0_45, %c1_46, %c0_47, %c0_48] : memref<2x10x10x8xbf16, #tpu.memory_space<vmem>>, vector<2x8x8x8xbf16>
    %31 = vector.shape_cast %30 : vector<2x8x8x8xbf16> to vector<128x8xbf16>
    %c0_49 = arith.constant 0 : index
    %c24 = arith.constant 24 : index
    %32 = vector.load %arg11[%c0_49, %c24] : memref<128x72xbf16, #tpu.memory_space<vmem>>, vector<128x8xbf16>
    tpu.vector_store %arg11[%c0_49, %c24], %31 {strides = array<i32>} : memref<128x72xbf16, #tpu.memory_space<vmem>>, vector<128x8xbf16>,
    %c0_50 = arith.constant 0 : index
    %c1_51 = arith.constant 1 : index
    %c1_52 = arith.constant 1 : index
    %c0_53 = arith.constant 0 : index
    %33 = vector.load %arg10[%c0_50, %c1_51, %c1_52, %c0_53] : memref<2x10x10x8xbf16, #tpu.memory_space<vmem>>, vector<2x8x8x8xbf16>
    %34 = vector.shape_cast %33 : vector<2x8x8x8xbf16> to vector<128x8xbf16>
    %c0_54 = arith.constant 0 : index
    %c32 = arith.constant 32 : index
    %35 = vector.load %arg11[%c0_54, %c32] : memref<128x72xbf16, #tpu.memory_space<vmem>>, vector<128x8xbf16>
    tpu.vector_store %arg11[%c0_54, %c32], %34 {strides = array<i32>} : memref<128x72xbf16, #tpu.memory_space<vmem>>, vector<128x8xbf16>,
    %c0_55 = arith.constant 0 : index
    %c1_56 = arith.constant 1 : index
    %c2_57 = arith.constant 2 : index
    %c0_58 = arith.constant 0 : index
    %36 = vector.load %arg10[%c0_55, %c1_56, %c2_57, %c0_58] : memref<2x10x10x8xbf16, #tpu.memory_space<vmem>>, vector<2x8x8x8xbf16>
    %37 = vector.shape_cast %36 : vector<2x8x8x8xbf16> to vector<128x8xbf16>
    %c0_59 = arith.constant 0 : index
    %c40 = arith.constant 40 : index
    %38 = vector.load %arg11[%c0_59, %c40] : memref<128x72xbf16, #tpu.memory_space<vmem>>, vector<128x8xbf16>
    tpu.vector_store %arg11[%c0_59, %c40], %37 {strides = array<i32>} : memref<128x72xbf16, #tpu.memory_space<vmem>>, vector<128x8xbf16>,
    %c0_60 = arith.constant 0 : index
    %c2_61 = arith.constant 2 : index
    %c0_62 = arith.constant 0 : index
    %c0_63 = arith.constant 0 : index
    %39 = vector.load %arg10[%c0_60, %c2_61, %c0_62, %c0_63] : memref<2x10x10x8xbf16, #tpu.memory_space<vmem>>, vector<2x8x8x8xbf16>
    %40 = vector.shape_cast %39 : vector<2x8x8x8xbf16> to vector<128x8xbf16>
    %c0_64 = arith.constant 0 : index
    %c48 = arith.constant 48 : index
    %41 = vector.load %arg11[%c0_64, %c48] : memref<128x72xbf16, #tpu.memory_space<vmem>>, vector<128x8xbf16>
    tpu.vector_store %arg11[%c0_64, %c48], %40 {strides = array<i32>} : memref<128x72xbf16, #tpu.memory_space<vmem>>, vector<128x8xbf16>,
    %c0_65 = arith.constant 0 : index
    %c2_66 = arith.constant 2 : index
    %c1_67 = arith.constant 1 : index
    %c0_68 = arith.constant 0 : index
    %42 = vector.load %arg10[%c0_65, %c2_66, %c1_67, %c0_68] : memref<2x10x10x8xbf16, #tpu.memory_space<vmem>>, vector<2x8x8x8xbf16>
    %43 = vector.shape_cast %42 : vector<2x8x8x8xbf16> to vector<128x8xbf16>
    %c0_69 = arith.constant 0 : index
    %c56 = arith.constant 56 : index
    %44 = vector.load %arg11[%c0_69, %c56] : memref<128x72xbf16, #tpu.memory_space<vmem>>, vector<128x8xbf16>
    tpu.vector_store %arg11[%c0_69, %c56], %43 {strides = array<i32>} : memref<128x72xbf16, #tpu.memory_space<vmem>>, vector<128x8xbf16>,
    %c0_70 = arith.constant 0 : index
    %c2_71 = arith.constant 2 : index
    %c2_72 = arith.constant 2 : index
    %c0_73 = arith.constant 0 : index
    %45 = vector.load %arg10[%c0_70, %c2_71, %c2_72, %c0_73] : memref<2x10x10x8xbf16, #tpu.memory_space<vmem>>, vector<2x8x8x8xbf16>
    %46 = vector.shape_cast %45 : vector<2x8x8x8xbf16> to vector<128x8xbf16>
    %c0_74 = arith.constant 0 : index
    %c64 = arith.constant 64 : index
    %47 = vector.load %arg11[%c0_74, %c64] : memref<128x72xbf16, #tpu.memory_space<vmem>>, vector<128x8xbf16>
    tpu.vector_store %arg11[%c0_74, %c64], %46 {strides = array<i32>} : memref<128x72xbf16, #tpu.memory_space<vmem>>, vector<128x8xbf16>,
    %c0_75 = arith.constant 0 : index
    %c0_76 = arith.constant 0 : index
    %48 = vector.load %arg11[%c0_75, %c0_76] : memref<128x72xbf16, #tpu.memory_space<vmem>>, vector<128x72xbf16>
    %c0_77 = arith.constant 0 : index
    %c0_78 = arith.constant 0 : index
    %49 = vector.load %arg4[%c0_77, %c0_78] : memref<72x8xbf16, #tpu.memory_space<vmem>>, vector<72x8xbf16>
    %cst_79 = arith.constant dense<0.000000e+00> : vector<128x8xf32>
    %50 = tpu.matmul %48, %49, %cst_79 {dimension_numbers = #tpu.dot_dimension_numbers<[1], [0], [0], [1], [0, 0, 1, 1], [], []>} : vector<128x72xbf16>, vector<72x8xbf16>, vector<128x8xf32> -> vector<128x8xf32>
    %c0_80 = arith.constant 0 : index
    %c0_81 = arith.constant 0 : index
    %51 = vector.load %arg5[%c0_80, %c0_81] : memref<1x8xf32, #tpu.memory_space<vmem>>, vector<1x8xf32>
    %52 = vector.broadcast %51 : vector<1x8xf32> to vector<128x8xf32>
    %53 = arith.addf %50, %52 : vector<128x8xf32>
    %cst_82 = arith.constant 0.000000e+00 : f32
    %54 = vector.broadcast %cst_82 : f32 to vector<128x8xf32>
    %55 = arith.maximumf %53, %54 : vector<128x8xf32>
    %56 = vector.shape_cast %55 : vector<128x8xf32> to vector<2x4x2x8x8xf32>
    %57 = vector.extract_strided_slice %56 {offsets = [0, 0, 0, 0, 0], sizes = [2, 4, 1, 8, 8], strides = [1, 1, 1, 1, 1]} : vector<2x4x2x8x8xf32> to vector<2x4x1x8x8xf32>
    %58 = vector.shape_cast %57 : vector<2x4x1x8x8xf32> to vector<2x4x8x8xf32>
    %59 = arith.truncf %58 : vector<2x4x8x8xf32> to vector<2x4x8x8xbf16>
    %60 = vector.shape_cast %0 : vector<2x8x8x16xf32> to vector<2x4x2x8x16xf32>
    %61 = vector.extract_strided_slice %60 {offsets = [0, 0, 0, 0, 0], sizes = [2, 4, 1, 8, 16], strides = [1, 1, 1, 1, 1]} : vector<2x4x2x8x16xf32> to vector<2x4x1x8x16xf32>
    %62 = vector.shape_cast %61 : vector<2x4x1x8x16xf32> to vector<2x4x8x16xf32>
    %63 = arith.truncf %62 : vector<2x4x8x16xf32> to vector<2x4x8x16xbf16>
    %64 = vector.extract_strided_slice %59 {offsets = [0, 0, 0, 0], sizes = [2, 4, 1, 8], strides = [1, 1, 1, 1]} : vector<2x4x8x8xbf16> to vector<2x4x1x8xbf16>
    %c0_83 = arith.constant 0 : index
    %c0_84 = arith.constant 0 : index
    %c0_85 = arith.constant 0 : index
    %c0_86 = arith.constant 0 : index
    %65 = vector.load %arg12[%c0_83, %c0_84, %c0_85, %c0_86] : memref<2x4x4x24xbf16, #tpu.memory_space<vmem>>, vector<2x4x1x8xbf16>
    tpu.vector_store %arg12[%c0_83, %c0_84, %c0_85, %c0_86], %64 {strides = array<i32>} : memref<2x4x4x24xbf16, #tpu.memory_space<vmem>>, vector<2x4x1x8xbf16>,
    %66 = vector.extract_strided_slice %63 {offsets = [0, 0, 0, 0], sizes = [2, 4, 1, 16], strides = [1, 1, 1, 1]} : vector<2x4x8x16xbf16> to vector<2x4x1x16xbf16>
    %c0_87 = arith.constant 0 : index
    %c0_88 = arith.constant 0 : index
    %c0_89 = arith.constant 0 : index
    %c8_90 = arith.constant 8 : index
    %67 = vector.load %arg12[%c0_87, %c0_88, %c0_89, %c8_90] : memref<2x4x4x24xbf16, #tpu.memory_space<vmem>>, vector<2x4x1x16xbf16>
    tpu.vector_store %arg12[%c0_87, %c0_88, %c0_89, %c8_90], %66 {strides = array<i32>} : memref<2x4x4x24xbf16, #tpu.memory_space<vmem>>, vector<2x4x1x16xbf16>,
    %68 = vector.extract_strided_slice %59 {offsets = [0, 0, 2, 0], sizes = [2, 4, 1, 8], strides = [1, 1, 1, 1]} : vector<2x4x8x8xbf16> to vector<2x4x1x8xbf16>
    %c0_91 = arith.constant 0 : index
    %c0_92 = arith.constant 0 : index
    %c1_93 = arith.constant 1 : index
    %c0_94 = arith.constant 0 : index
    %69 = vector.load %arg12[%c0_91, %c0_92, %c1_93, %c0_94] : memref<2x4x4x24xbf16, #tpu.memory_space<vmem>>, vector<2x4x1x8xbf16>
    tpu.vector_store %arg12[%c0_91, %c0_92, %c1_93, %c0_94], %68 {strides = array<i32>} : memref<2x4x4x24xbf16, #tpu.memory_space<vmem>>, vector<2x4x1x8xbf16>,
    %70 = vector.extract_strided_slice %63 {offsets = [0, 0, 2, 0], sizes = [2, 4, 1, 16], strides = [1, 1, 1, 1]} : vector<2x4x8x16xbf16> to vector<2x4x1x16xbf16>
    %c0_95 = arith.constant 0 : index
    %c0_96 = arith.constant 0 : index
    %c1_97 = arith.constant 1 : index
    %c8_98 = arith.constant 8 : index
    %71 = vector.load %arg12[%c0_95, %c0_96, %c1_97, %c8_98] : memref<2x4x4x24xbf16, #tpu.memory_space<vmem>>, vector<2x4x1x16xbf16>
    tpu.vector_store %arg12[%c0_95, %c0_96, %c1_97, %c8_98], %70 {strides = array<i32>} : memref<2x4x4x24xbf16, #tpu.memory_space<vmem>>, vector<2x4x1x16xbf16>,
    %72 = vector.extract_strided_slice %59 {offsets = [0, 0, 4, 0], sizes = [2, 4, 1, 8], strides = [1, 1, 1, 1]} : vector<2x4x8x8xbf16> to vector<2x4x1x8xbf16>
    %c0_99 = arith.constant 0 : index
    %c0_100 = arith.constant 0 : index
    %c2_101 = arith.constant 2 : index
    %c0_102 = arith.constant 0 : index
    %73 = vector.load %arg12[%c0_99, %c0_100, %c2_101, %c0_102] : memref<2x4x4x24xbf16, #tpu.memory_space<vmem>>, vector<2x4x1x8xbf16>
    tpu.vector_store %arg12[%c0_99, %c0_100, %c2_101, %c0_102], %72 {strides = array<i32>} : memref<2x4x4x24xbf16, #tpu.memory_space<vmem>>, vector<2x4x1x8xbf16>,
    %74 = vector.extract_strided_slice %63 {offsets = [0, 0, 4, 0], sizes = [2, 4, 1, 16], strides = [1, 1, 1, 1]} : vector<2x4x8x16xbf16> to vector<2x4x1x16xbf16>
    %c0_103 = arith.constant 0 : index
    %c0_104 = arith.constant 0 : index
    %c2_105 = arith.constant 2 : index
    %c8_106 = arith.constant 8 : index
    %75 = vector.load %arg12[%c0_103, %c0_104, %c2_105, %c8_106] : memref<2x4x4x24xbf16, #tpu.memory_space<vmem>>, vector<2x4x1x16xbf16>
    tpu.vector_store %arg12[%c0_103, %c0_104, %c2_105, %c8_106], %74 {strides = array<i32>} : memref<2x4x4x24xbf16, #tpu.memory_space<vmem>>, vector<2x4x1x16xbf16>,
    %76 = vector.extract_strided_slice %59 {offsets = [0, 0, 6, 0], sizes = [2, 4, 1, 8], strides = [1, 1, 1, 1]} : vector<2x4x8x8xbf16> to vector<2x4x1x8xbf16>
    %c0_107 = arith.constant 0 : index
    %c0_108 = arith.constant 0 : index
    %c3 = arith.constant 3 : index
    %c0_109 = arith.constant 0 : index
    %77 = vector.load %arg12[%c0_107, %c0_108, %c3, %c0_109] : memref<2x4x4x24xbf16, #tpu.memory_space<vmem>>, vector<2x4x1x8xbf16>
    tpu.vector_store %arg12[%c0_107, %c0_108, %c3, %c0_109], %76 {strides = array<i32>} : memref<2x4x4x24xbf16, #tpu.memory_space<vmem>>, vector<2x4x1x8xbf16>,
    %78 = vector.extract_strided_slice %63 {offsets = [0, 0, 6, 0], sizes = [2, 4, 1, 16], strides = [1, 1, 1, 1]} : vector<2x4x8x16xbf16> to vector<2x4x1x16xbf16>
    %c0_110 = arith.constant 0 : index
    %c0_111 = arith.constant 0 : index
    %c3_112 = arith.constant 3 : index
    %c8_113 = arith.constant 8 : index
    %79 = vector.load %arg12[%c0_110, %c0_111, %c3_112, %c8_113] : memref<2x4x4x24xbf16, #tpu.memory_space<vmem>>, vector<2x4x1x16xbf16>
    tpu.vector_store %arg12[%c0_110, %c0_111, %c3_112, %c8_113], %78 {strides = array<i32>} : memref<2x4x4x24xbf16, #tpu.memory_space<vmem>>, vector<2x4x1x16xbf16>,
    %c0_114 = arith.constant 0 : index
    %c0_115 = arith.constant 0 : index
    %c0_116 = arith.constant 0 : index
    %c0_117 = arith.constant 0 : index
    %80 = vector.load %arg12[%c0_114, %c0_115, %c0_116, %c0_117] : memref<2x4x4x24xbf16, #tpu.memory_space<vmem>>, vector<2x4x4x24xbf16>
    %81 = vector.shape_cast %80 : vector<2x4x4x24xbf16> to vector<32x24xbf16>
    %c0_118 = arith.constant 0 : index
    %c0_119 = arith.constant 0 : index
    %82 = vector.load %arg6[%c0_118, %c0_119] : memref<24x32xbf16, #tpu.memory_space<vmem>>, vector<24x32xbf16>
    %cst_120 = arith.constant dense<0.000000e+00> : vector<32x32xf32>
    %83 = tpu.matmul %81, %82, %cst_120 {dimension_numbers = #tpu.dot_dimension_numbers<[1], [0], [0], [1], [0, 0, 1, 1], [], []>} : vector<32x24xbf16>, vector<24x32xbf16>, vector<32x32xf32> -> vector<32x32xf32>
    %c0_121 = arith.constant 0 : index
    %c0_122 = arith.constant 0 : index
    %84 = vector.load %arg7[%c0_121, %c0_122] : memref<1x32xf32, #tpu.memory_space<vmem>>, vector<1x32xf32>
    %85 = vector.broadcast %84 : vector<1x32xf32> to vector<32x32xf32>
    %86 = arith.addf %83, %85 : vector<32x32xf32>
    %cst_123 = arith.constant 0.000000e+00 : f32
    %87 = vector.broadcast %cst_123 : f32 to vector<32x32xf32>
    %88 = arith.maximumf %86, %87 : vector<32x32xf32>
    %89 = arith.truncf %88 : vector<32x32xf32> to vector<32x32xbf16>
    %c0_124 = arith.constant 0 : index
    %c0_125 = arith.constant 0 : index
    %90 = vector.load %arg8[%c0_124, %c0_125] : memref<32x32xbf16, #tpu.memory_space<vmem>>, vector<32x32xbf16>
    tpu.vector_store %arg8[%c0_124, %c0_125], %89 {strides = array<i32>} : memref<32x32xbf16, #tpu.memory_space<vmem>>, vector<32x32xbf16>,
    %c0_126 = arith.constant 0 : index
    %c0_127 = arith.constant 0 : index
    %91 = vector.load %arg9[%c0_126, %c0_127] : memref<32x32xf32, #tpu.memory_space<vmem>>, vector<32x32xf32>
    tpu.vector_store %arg9[%c0_126, %c0_127], %86 {strides = array<i32>} : memref<32x32xf32, #tpu.memory_space<vmem>>, vector<32x32xf32>,
    return
  }
  func.func @transform_0(%arg0: i32) -> (i32, i32, i32, i32) {
    %c0_i32 = arith.constant 0 : i32
    %c0_i32_0 = arith.constant 0 : i32
    %c0_i32_1 = arith.constant 0 : i32
    %c0_i32_2 = arith.constant 0 : i32
    return %arg0, %c0_i32, %c0_i32_0, %c0_i32_1 : i32, i32, i32, i32
  }
  func.func @transform_1(%arg0: i32) -> (i32, i32) {
    %c0_i32 = arith.constant 0 : i32
    %c0_i32_0 = arith.constant 0 : i32
    %c0_i32_1 = arith.constant 0 : i32
    return %c0_i32, %c0_i32_0 : i32, i32
  }
  func.func @transform_2(%arg0: i32) -> (i32, i32) {
    %c0_i32 = arith.constant 0 : i32
    %c0_i32_0 = arith.constant 0 : i32
    %c0_i32_1 = arith.constant 0 : i32
    return %c0_i32, %c0_i32_0 : i32, i32
  }
  func.func @transform_3(%arg0: i32) -> (i32, i32) {
    %c0_i32 = arith.constant 0 : i32
    %c0_i32_0 = arith.constant 0 : i32
    %c0_i32_1 = arith.constant 0 : i32
    return %c0_i32, %c0_i32_0 : i32, i32
  }
  func.func @transform_4(%arg0: i32) -> (i32, i32) {
    %c0_i32 = arith.constant 0 : i32
    %c0_i32_0 = arith.constant 0 : i32
    %c0_i32_1 = arith.constant 0 : i32
    return %c0_i32, %c0_i32_0 : i32, i32
  }
  func.func @transform_5(%arg0: i32) -> (i32, i32) {
    %c0_i32 = arith.constant 0 : i32
    %c0_i32_0 = arith.constant 0 : i32
    %c0_i32_1 = arith.constant 0 : i32
    return %c0_i32, %c0_i32_0 : i32, i32
  }
  func.func @transform_6(%arg0: i32) -> (i32, i32) {
    %c0_i32 = arith.constant 0 : i32
    %c0_i32_0 = arith.constant 0 : i32
    %c0_i32_1 = arith.constant 0 : i32
    return %c0_i32, %c0_i32_0 : i32, i32
  }
  func.func @transform_7(%arg0: i32) -> (i32, i32) {
    %c0_i32 = arith.constant 0 : i32
    %c0_i32_0 = arith.constant 0 : i32
    return %arg0, %c0_i32 : i32, i32
  }
  func.func @transform_8(%arg0: i32) -> (i32, i32) {
    %c0_i32 = arith.constant 0 : i32
    %c0_i32_0 = arith.constant 0 : i32
    return %arg0, %c0_i32 : i32, i32
  }
}

</mosaic_0001>

<bundles_post_ra>
// kernel: tpu_custom_call.1
= control target key start
LH: loop header
LB: loop body
LE: loop exit
PB: predicated region body
PF: predicated region fallthrough
CT: control target
= control target key end

     0   :  { %14 = vsyncpa [#allocation6], 0  ;;  %s5045_s0 = inlined_call_operand.hbm [shape: f32[2,8,8,16], index: 0, kind: input, shape index: {}]   ;;  %s5046_s1 = inlined_call_operand.vmem [shape: bf16[16,8], index: 1, kind: input, shape index: {}]   ;;  %s5047_s2 = inlined_call_operand.vmem [shape: f32[1,8], index: 2, kind: input, shape index: {}]   ;;  %s5048_s3 = inlined_call_operand.vmem [shape: bf16[72,8], index: 3, kind: input, shape index: {}]   ;;  %s5049_s4 = inlined_call_operand.vmem [shape: f32[1,8], index: 4, kind: input, shape index: {}]   ;;  %s5050_s5 = inlined_call_operand.vmem [shape: bf16[24,32], index: 5, kind: input, shape index: {}]   ;;  %s5051_s6 = inlined_call_operand.vmem [shape: f32[1,32], index: 6, kind: input, shape index: {}]   ;;  %s5052_s7 = inlined_call_operand.hbm [shape: bf16[32,32], index: 7, kind: output, shape index: {0}]   ;;  %s5053_s8 = inlined_call_operand.hbm [shape: f32[32,32], index: 8, kind: output, shape index: {1}]  }
   0x1   :  { %15 = vsyncpa [#allocation7], 0 }
   0x2   :  { %16 = vsyncpa [#allocation10], 0  ;;  %s3864_s27 = smov [#allocation5]   ;;  %s3792_s9 = scalar_lea.hbm %s5045_s0, 2048 }
   0x3   :  { %s22_s28 = sshll.u32 %s3864_s27, 4  ;;  %p3793_p0 = scmp.ne.s32.totalorder %s5045_s0, %s3792_s9  ;;  %s23_s28 = int_to_ptr.vmem [resolvable:$true] %s22_s28 }
   0x4   :  { %p3796_p1 = scmp.lt.u32.totalorder %s3792_s9, %s5045_s0 }
   0x6   :  { %p3798_p2 = pnand %p3796_p1, %p3793_p0 }
   0x8   :  { %3801 = shalt.err (!%p3798_p2)
}
   0x9   :  { %s3802_s14 = scalar_lea.vmem %s23_s28, 2048  ;;  %p3807_p4 = scmp.lt.s32.totalorder %s23_s28, %s23_s28 }
   0xa   :  { %p3803_p3 = scmp.ne.s32.totalorder %s23_s28, %s3802_s14  ;;  %p3808_p5 = scmp.lt.s32.totalorder %s3802_s14, %s3802_s14 }
   0xc   :  { %p3809_p6 = por %p3808_p5, %p3807_p4 }
   0xe   :  { %p3810_p7 = pnand %p3809_p6, %p3803_p3 }
  0x10   :  { %3813 = shalt.err (!%p3810_p7)
}
  0x11   :  { %s3865_s15 = smov 128   ;;  %s3866_s16 = smov 8  }
  0x12   :  { %28 = dma.hbm_to_vmem [thread:$0]  %s5045_s0, 2048, %s23_s28, [#allocation6], %s3865_s15, %s3865_s15, %s3866_s16  }
  0x13   :  { %3858 = dma.done.wait [#allocation6], 2048  }
  0x14   :  { %3859 = vsyncadd [#allocation6], 4294965248  ;;  %v3752_v0 = vld [vmem:[%s5046_s1] sm:$0xff]   ;;  %v45_v1 = vld [vmem:[#allocation5] sm:$0xff]  ;;  %vm84_vm0 = vcmask 130048   ;;  %vm232_vm1 = vcmask 57344  }
  0x15   :  { %v46_v2 = vld [vmem:[#allocation5 + $0x8] sm:$0xff]  ;;  %v47_v3 = vld [vmem:[#allocation5 + $0x10] sm:$0xff]  ;;  %3643 = vmatprep.subr.bf16.mxu0 %v3752_v0  ;;  %v48_v5 = vld [vmem:[#allocation5 + $0x18] sm:$0xff]  ;;  %vm242_vm2 = vsmask.f32 256  ;;  %vm230_vm5 = vcmask 60416  }
  0x16   :  { %v61_v4 = vpack.c.bf16 %v46_v2, %v45_v1  ;;  %v49_v6 = vld [vmem:[#allocation5 + $0x20] sm:$0xff]  ;;  %v50_v7 = vld [vmem:[#allocation5 + $0x28] sm:$0xff]  ;;  %3644 = vmatpush3.bf16.msra.mxu0 %v3752_v0  ;;  %v62_v8 = vpack.c.bf16 %v48_v5, %v47_v3  ;;  %v51_v10 = vld [vmem:[#allocation5 + $0x30] sm:$0xff]  ;;  %vm304_vm3 = vsmask.f32 7938  ;;  %v3867_v42 = vmov 0  }
  0x17   :  { %v63_v9 = vpack.c.bf16 %v50_v7, %v49_v6  ;;  %v52_v11 = vld [vmem:[#allocation5 + $0x38] sm:$0xff]  ;;  %v53_v12 = vld [vmem:[#allocation5 + $0x40] sm:$0xff]  ;;  %v54_v13 = vld [vmem:[#allocation5 + $0x48] sm:$0xff]  ;;  %231 = vst.msk [vmem:[#allocation2] sm:$0xf] %vm230_vm5, %v3867_v42  ;;  %vm1118_vm7 = vcmask 1042432  }
  0x18   :  { %3645 = vmatprep.mubr.msk.bf16.mxu0 %vm84_vm0, %v61_v4  ;;  %v64_v14 = vpack.c.bf16 %v52_v11, %v51_v10  ;;  %v65_v15 = vpack.c.bf16 %v54_v13, %v53_v12  ;;  %v55_v16 = vld [vmem:[#allocation5 + $0x50] sm:$0xff]  ;;  %v56_v17 = vld [vmem:[#allocation5 + $0x58] sm:$0xff]  ;;  %v57_v18 = vld [vmem:[#allocation5 + $0x60] sm:$0xff]  ;;  %233 = vst.msk [vmem:[#allocation2 + $0x4] sm:$0x1] %vm232_vm1, %v3867_v42  ;;  %vm1119_vm8 = vcmask 1046532  }
  0x19   :  { %3646 = vmatmul.mubr.msk.bf16.vlgmr.msra.gmra.mrb[0].mxu0 %vm84_vm0, %v62_v8  ;;  %v58_v19 = vld [vmem:[#allocation5 + $0x68] sm:$0xff]  ;;  %v66_v20 = vpack.c.bf16 %v56_v17, %v55_v16  ;;  %v59_v22 = vld [vmem:[#allocation5 + $0x70] sm:$0xff]  ;;  %v60_v23 = vld [vmem:[#allocation5 + $0x78] sm:$0xff]  ;;  %234 = vst.msk [vmem:[#allocation2 + $0x50] sm:$0xf] %vm230_vm5, %v3867_v42  ;;  %s3869_s21 = smov 48  }
  0x1a   :  { %3649 = vmatprep.mubr.msk.bf16.mxu0 %vm84_vm0, %v63_v9  ;;  %v67_v21 = vpack.c.bf16 %v58_v19, %v57_v18  ;;  %v68_v24 = vpack.c.bf16 %v60_v23, %v59_v22  ;;  %vm3952_vm4 = vmand %vm232_vm1, %vm242_vm2  ;;  %v253_v26 = vld [vmem:[#allocation2 + $0x18] sm:$0x1]  ;;  %v315_v27 = vld [vmem:[#allocation2 + $0x1c] sm:$0x1]  ;;  %235 = vst.msk [vmem:[#allocation2 + $0x54] sm:$0x1] %vm232_vm1, %v3867_v42 }
  0x1b   :  { %v254_v28 = vsel %vm3952_vm4, 0, %v253_v26  ;;  %vm3960_vm6 = vmand %vm232_vm1, %vm304_vm3  ;;  %v247_v30 = vld [vmem:[#allocation2 + $0x8] sm:$0x1]  ;;  %v309_v31 = vld [vmem:[#allocation2 + $0xc] sm:$0x1]  ;;  %s3870_s22 = smov 16  }
  0x1c   :  { %255 = vst [vmem:[#allocation2 + $0x18] sm:$0x1] %v254_v28  ;;  %v316_v32 = vsel %vm3960_vm6, 0, %v315_v27  ;;  %v248_v33 = vsel %vm3952_vm4, 0, %v247_v30  ;;  %v310_v34 = vsel %vm3960_vm6, 0, %v309_v31  ;;  %vm4051_vm11 = vmor %vm1118_vm7, %vm1119_vm8  ;;  %s3871_s23 = smov 40  }
  0x1d   :  { %v256_v35 = vld [vmem:[#allocation2 + $0x20] sm:$0x1]  ;;  %317 = vst [vmem:[#allocation2 + $0x1c] sm:$0x1] %v316_v32  ;;  %249 = vst [vmem:[#allocation2 + $0x8] sm:$0x1] %v248_v33 }
  0x1e   :  { %311 = vst [vmem:[#allocation2 + $0xc] sm:$0x1] %v310_v34  ;;  %v257_v36 = vsel %vm3952_vm4, 0, %v256_v35  ;;  %v318_v37 = vld [vmem:[#allocation2 + $0x24] sm:$0x1]  ;;  %vm4091_vm13 = vmand %vm230_vm5, %vm304_vm3  ;;  %s3872_s24 = smov 64  }
  0x1f   :  { %v250_v38 = vld [vmem:[#allocation2 + $0x10] sm:$0x1]  ;;  %258 = vst [vmem:[#allocation2 + $0x20] sm:$0x1] %v257_v36  ;;  %v319_v39 = vsel %vm3960_vm6, 0, %v318_v37  ;;  %s3873_s25 = smov 32  }
  0x20   :  { %v251_v40 = vsel %vm3952_vm4, 0, %v250_v38  ;;  %v312_v41 = vld [vmem:[#allocation2 + $0x14] sm:$0x1]  ;;  %237 = vst.msk [vmem:[#allocation2 + $0x48] sm:$0xf] %vm230_vm5, %v3867_v42  ;;  %s3874_s30 = smov 56  }
  0x21   :  { %3650 = vmatmul.mubr.msk.bf16.gmra.mrb[4].mxu0 %vm84_vm0, %v64_v14  ;;  %238 = vst.msk [vmem:[#allocation2 + $0x4c] sm:$0x1] %vm232_vm1, %v3867_v42  ;;  %240 = vst.msk [vmem:[#allocation2 + $0x9c] sm:$0x1] %vm232_vm1, %v3867_v42  ;;  %v313_v43 = vsel %vm3960_vm6, 0, %v312_v41  ;;  %vm729_vm14 = vcmask 64512  }
  0x22   :  { %3653 = vmatprep.mubr.msk.bf16.mxu0 %vm84_vm0, %v65_v15  ;;  %239 = vst.msk [vmem:[#allocation2 + $0x98] sm:$0xf] %vm230_vm5, %v3867_v42  ;;  %320 = vst [vmem:[#allocation2 + $0x24] sm:$0x1] %v319_v39  ;;  %v259_v44 = vld [vmem:[#allocation2 + $0x28] sm:$0x1] }
  0x23   :  { %252 = vst [vmem:[#allocation2 + $0x10] sm:$0x1] %v251_v40  ;;  %314 = vst [vmem:[#allocation2 + $0x14] sm:$0x1] %v313_v43  ;;  %v321_v45 = vld [vmem:[#allocation2 + $0x2c] sm:$0x1] }
  0x24   :  { %v260_v46 = vsel %vm3952_vm4, 0, %v259_v44  ;;  %v322_v47 = vsel %vm3960_vm6, 0, %v321_v45  ;;  %v306_v48 = vld [vmem:[#allocation2 + $0x4] sm:$0x1]  ;;  %v265_v50 = vld [vmem:[#allocation2 + $0x38] sm:$0x1] }
  0x25   :  { %261 = vst [vmem:[#allocation2 + $0x28] sm:$0x1] %v260_v46  ;;  %323 = vst [vmem:[#allocation2 + $0x2c] sm:$0x1] %v322_v47  ;;  %v307_v49 = vsel %vm3960_vm6, 0, %v306_v48  ;;  %v266_v52 = vsel %vm3952_vm4, 0, %v265_v50 }
  0x26   :  { %308 = vst [vmem:[#allocation2 + $0x4] sm:$0x1] %v307_v49  ;;  %v327_v51 = vld [vmem:[#allocation2 + $0x3c] sm:$0x1]  ;;  %267 = vst [vmem:[#allocation2 + $0x38] sm:$0x1] %v266_v52 }
  0x27   :  { %v328_v53 = vsel %vm3960_vm6, 0, %v327_v51  ;;  %v268_v54 = vld [vmem:[#allocation2 + $0x40] sm:$0x1]  ;;  %v262_v55 = vld [vmem:[#allocation2 + $0x30] sm:$0x1]  ;;  %vm1045_vm15 = vcmask 130112  }
  0x28   :  { %329 = vst [vmem:[#allocation2 + $0x3c] sm:$0x1] %v328_v53  ;;  %v269_v56 = vsel %vm3952_vm4, 0, %v268_v54  ;;  %v263_v57 = vsel %vm3952_vm4, 0, %v262_v55  ;;  %v330_v58 = vld [vmem:[#allocation2 + $0x44] sm:$0x1] }
  0x29   :  { %3654 = vmatmul.mubr.msk.bf16.gmra.mrb[8].mxu0 %vm84_vm0, %v66_v20  ;;  %270 = vst [vmem:[#allocation2 + $0x40] sm:$0x1] %v269_v56  ;;  %264 = vst [vmem:[#allocation2 + $0x30] sm:$0x1] %v263_v57  ;;  %v324_v59 = vld [vmem:[#allocation2 + $0x34] sm:$0x1] }
  0x2a   :  { %3657 = vmatprep.mubr.msk.bf16.mxu0 %vm84_vm0, %v67_v21  ;;  %v331_v60 = vsel %vm3960_vm6, 0, %v330_v58  ;;  %v325_v61 = vsel %vm3960_vm6, 0, %v324_v59  ;;  %v244_v62 = vld [vmem:[#allocation2] sm:$0x1]  ;;  %v283_v0 = vld [vmem:[#allocation2 + $0x68] sm:$0x1] }
  0x2b   :  { %332 = vst [vmem:[#allocation2 + $0x44] sm:$0x1] %v331_v60  ;;  %326 = vst [vmem:[#allocation2 + $0x34] sm:$0x1] %v325_v61  ;;  %v245_v63 = vsel %vm3952_vm4, 0, %v244_v62  ;;  %v284_v2 = vsel %vm3952_vm4, 0, %v283_v0 }
  0x2c   :  { %246 = vst [vmem:[#allocation2] sm:$0x1] %v245_v63  ;;  %v345_v1 = vld [vmem:[#allocation2 + $0x6c] sm:$0x1]  ;;  %v277_v4 = vld [vmem:[#allocation2 + $0x58] sm:$0x1] }
  0x2d   :  { %v346_v3 = vsel %vm3960_vm6, 0, %v345_v1  ;;  %v339_v5 = vld [vmem:[#allocation2 + $0x5c] sm:$0x1]  ;;  %285 = vst [vmem:[#allocation2 + $0x68] sm:$0x1] %v284_v2  ;;  %v278_v6 = vsel %vm3952_vm4, 0, %v277_v4 }
  0x2e   :  { %347 = vst [vmem:[#allocation2 + $0x6c] sm:$0x1] %v346_v3  ;;  %v340_v7 = vsel %vm3960_vm6, 0, %v339_v5  ;;  %279 = vst [vmem:[#allocation2 + $0x58] sm:$0x1] %v278_v6  ;;  %vm1322_vm1 = vcmask 261312  }
  0x2f   :  { %341 = vst [vmem:[#allocation2 + $0x5c] sm:$0x1] %v340_v7  ;;  %v286_v8 = vld [vmem:[#allocation2 + $0x70] sm:$0x1]  ;;  %v348_v9 = vld [vmem:[#allocation2 + $0x74] sm:$0x1] }
  0x30   :  { %v287_v10 = vsel %vm3952_vm4, 0, %v286_v8  ;;  %v349_v11 = vsel %vm3960_vm6, 0, %v348_v9  ;;  %v271_v12 = vld [vmem:[#allocation2 + $0x48] sm:$0x1]  ;;  %v280_v14 = vld [vmem:[#allocation2 + $0x60] sm:$0x1] }
  0x31   :  { %3658 = vmatmul.mubr.msk.bf16.gmra.mrb[12].mxu0 %vm84_vm0, %v68_v24  ;;  %288 = vst [vmem:[#allocation2 + $0x70] sm:$0x1] %v287_v10  ;;  %350 = vst [vmem:[#allocation2 + $0x74] sm:$0x1] %v349_v11  ;;  %v272_v13 = vsel %vm3952_vm4, 0, %v271_v12  ;;  %v281_v15 = vsel %vm3952_vm4, 0, %v280_v14 }
  0x32   :  { %273 = vst [vmem:[#allocation2 + $0x48] sm:$0x1] %v272_v13  ;;  %v342_v16 = vld [vmem:[#allocation2 + $0x64] sm:$0x1]  ;;  %282 = vst [vmem:[#allocation2 + $0x60] sm:$0x1] %v281_v15 }
  0x33   :  { %v343_v17 = vsel %vm3960_vm6, 0, %v342_v16  ;;  %v295_v18 = vld [vmem:[#allocation2 + $0x88] sm:$0x1]  ;;  %v357_v20 = vld [vmem:[#allocation2 + $0x8c] sm:$0x1]  ;;  %vm1233_vm0 = vcmask 195712  }
  0x34   :  { %344 = vst [vmem:[#allocation2 + $0x64] sm:$0x1] %v343_v17  ;;  %v296_v19 = vsel %vm3952_vm4, 0, %v295_v18  ;;  %v289_v21 = vld [vmem:[#allocation2 + $0x78] sm:$0x1]  ;;  %v358_v22 = vsel %vm3960_vm6, 0, %v357_v20 }
  0x35   :  { %297 = vst [vmem:[#allocation2 + $0x88] sm:$0x1] %v296_v19  ;;  %v290_v23 = vsel %vm3952_vm4, 0, %v289_v21  ;;  %v351_v24 = vld [vmem:[#allocation2 + $0x7c] sm:$0x1]  ;;  %vm1635_vm5 = vcmask 326912  }
  0x36   :  { %359 = vst [vmem:[#allocation2 + $0x8c] sm:$0x1] %v358_v22  ;;  %291 = vst [vmem:[#allocation2 + $0x78] sm:$0x1] %v290_v23  ;;  %v352_v26 = vsel %vm3960_vm6, 0, %v351_v24  ;;  %vm1820_vm7 = vcmask 392512  }
  0x37   :  { %353 = vst [vmem:[#allocation2 + $0x7c] sm:$0x1] %v352_v26  ;;  %v298_v27 = vld [vmem:[#allocation2 + $0x90] sm:$0x1]  ;;  %v360_v28 = vld [vmem:[#allocation2 + $0x94] sm:$0x1] }
  0x38   :  { %v299_v30 = vsel %vm3952_vm4, 0, %v298_v27  ;;  %v361_v31 = vsel %vm3960_vm6, 0, %v360_v28  ;;  %v333_v32 = vld [vmem:[#allocation2 + $0x4c] sm:$0x1]  ;;  %v292_v34 = vld [vmem:[#allocation2 + $0x80] sm:$0x1] }
  0x39   :  { %300 = vst [vmem:[#allocation2 + $0x90] sm:$0x1] %v299_v30  ;;  %362 = vst [vmem:[#allocation2 + $0x94] sm:$0x1] %v361_v31  ;;  %v334_v33 = vsel %vm3960_vm6, 0, %v333_v32  ;;  %v293_v35 = vsel %vm3952_vm4, 0, %v292_v34 }
  0x3a   :  { %335 = vst [vmem:[#allocation2 + $0x4c] sm:$0x1] %v334_v33  ;;  %v354_v36 = vld [vmem:[#allocation2 + $0x84] sm:$0x1]  ;;  %294 = vst [vmem:[#allocation2 + $0x80] sm:$0x1] %v293_v35 }
  0x3b   :  { %v355_v37 = vsel %vm3960_vm6, 0, %v354_v36  ;;  %v738_v38 = vld [vmem:[#allocation2] sm:$0xf]  ;;  %v1933_v41 = vld [vmem:[#allocation2 + $0x48] sm:$0xf]  ;;  %vm1910_vm8 = vcmask 458112  }
  0x3c   :  { %356 = vst [vmem:[#allocation2 + $0x84] sm:$0x1] %v355_v37  ;;  %v774_v39 = vshrl.u32 %v738_v38, 16  ;;  %v777_v40 = vshll.u32 %v738_v38, 16  ;;  %v739_v42 = vld [vmem:[#allocation2 + $0x4] sm:$0x1] }
  0x3d   :  { %v1054_v45 = vld [vmem:[#allocation2] sm:$0xe]  ;;  %v1055_v46 = vld [vmem:[#allocation2 + $0x4] sm:$0x1]  ;;  %v2050_v47 = vshrl.u32 %v1933_v41, 16  ;;  %v2053_v48 = vshll.u32 %v1933_v41, 16 }
  0x3e   :  { %v776_v43 = vrot.slane %v774_v39, 4  ;;  %v779_v44 = vrot.slane %v777_v40, 5  ;;  %v783_v49 = vshll.u32 %v739_v42, 16  ;;  %v4045_v50 = vld [vmem:[%s5047_s2] ss:$0 sm:$0xff]  ;;  %v3454_v52 = vrot.slane %v1054_v45, 9 }
  0x3f   :  { %v1123_v53 = vrot.slane %v1055_v46, 5  ;;  %vm770_vm9 = vsmask.f32 3328  ;;  %vm771_vm10 = vsmask.f32 7440  ;;  %v2052_v55 = vrot.slane %v2050_v47, 4 }
  0x40   :  { %v780_v51 = vor.u32 %v779_v44, %v776_v43  ;;  %v2055_v56 = vrot.slane %v2053_v48, 5  ;;  %v4047_v58 = vrot.slane %v783_v49, 5  ;;  %v274_v59 = vld [vmem:[#allocation2 + $0x50] sm:$0x1]  ;;  %v336_v60 = vld [vmem:[#allocation2 + $0x54] sm:$0x1]  ;;  %vm4064_vm12 = vmor %vm770_vm9, %vm771_vm10 }
  0x41   :  { %v1934_v54 = vld [vmem:[#allocation2 + $0x4c] sm:$0x1]  ;;  %v275_v1 = vsel %vm3952_vm4, 0, %v274_v59  ;;  %v337_v2 = vsel %vm3960_vm6, 0, %v336_v60  ;;  %v4068_v6 = vld [vmem:[#allocation2 + $0x48] sm:$0xe]  ;;  %v4076_v17 = vsel %vm4051_vm11, %v3454_v52, %v1123_v53 }
  0x42   :  { %v4055_v0 = vrot.slane %v780_v51, 4  ;;  %276 = vst [vmem:[#allocation2 + $0x50] sm:$0x1] %v275_v1  ;;  %338 = vst [vmem:[#allocation2 + $0x54] sm:$0x1] %v337_v2  ;;  %v2056_v11 = vor.u32 %v2055_v56, %v2052_v55  ;;  %v2059_v12 = vshll.u32 %v1934_v54, 16 }
  0x43   :  { %v4071_v10 = vld [vmem:[#allocation2 + $0x4c] sm:$0x1]  ;;  %v3541_v21 = vrot.slane %v4068_v6, 9  ;;  %v581_v30 = vld [vmem:[#allocation2 + $0x18] sm:$0xf]  ;;  %s3868_s2 = smov 24  }
  0x44   :  { %v786_v18 = vsel %vm4064_vm12, %v4055_v0, %v4047_v58  ;;  %v2326_v22 = vrot.slane %v4071_v10, 5  ;;  %v4084_v26 = vrot.slane %v2056_v11, 4  ;;  %v4086_v27 = vrot.slane %v2059_v12, 5  ;;  %v584_v31 = vld [vmem:[#allocation2 + $0x1c] sm:$0x1]  ;;  %s3876_s1 = smov [#allocation9]  }
  0x45   :  { %v569_v37 = vld [vmem:[#allocation2 + $0x8] sm:$0xf]  ;;  %v572_v38 = vld [vmem:[#allocation2 + $0xc] sm:$0x1]  ;;  %v587_v45 = vld [vmem:[#allocation2 + $0x20] sm:$0xf] }
  0x46   :  { %v590_v54 = vld [vmem:[#allocation2 + $0x24] sm:$0x1]  ;;  %vm2493_vm9 = vcmask 1043456   ;;  %vm2223_vm10 = vcmask 523712  }
  0xec   :  { %v3647_v57 = vpop.f32.mrb[0].mxu0 }
  0xed   :  { %v152_v61 = vadd.f32 %v3647_v57, %v4045_v50  ;;  %v143_v62 = vpop.f32.mrb[1].mxu0 }
  0xee   :  { %v144_v3 = vadd.f32 %v4045_v50, %v143_v62  ;;  %v3648_v4 = vpop.f32.mrb[2].mxu0 }
  0xef   :  { %v208_v7 = vmax.f32 %v152_v61, 0.0  ;;  %v155_v8 = vadd.f32 %v3648_v4, %v4045_v50  ;;  %v146_v9 = vpop.f32.mrb[3].mxu0  ;;  %v575_v4 = vld [vmem:[#allocation2 + $0x10] sm:$0xf] }
  0xf0   :  { %v206_v13 = vmax.f32 %v144_v3, 0.0  ;;  %v147_v14 = vadd.f32 %v4045_v50, %v146_v9 }
  0xf1   :  { %v3599_v15 = vpack.c.bf16 %v208_v7, %v208_v7  ;;  %v209_v16 = vmax.f32 %v155_v8, 0.0  ;;  %v578_v7 = vld [vmem:[#allocation2 + $0x14] sm:$0x1] }
  0xf2   :  { %v3597_v19 = vpack.c.bf16 %v206_v13, %v206_v13  ;;  %v207_v20 = vmax.f32 %v147_v14, 0.0 }
  0xf3   :  { %v423_v23 = vshrl.u32 %v3599_v15, 16  ;;  %v3600_v24 = vpack.c.bf16 %v209_v16, %v209_v16  ;;  %v426_v28 = vshll.u32 %v3599_v15, 16 }
  0xf4   :  { %v407_v32 = vshrl.u32 %v3597_v19, 16  ;;  %v410_v33 = vshll.u32 %v3597_v19, 16  ;;  %v3598_v34 = vpack.c.bf16 %v207_v20, %v207_v20  ;;  %v3651_v35 = vpop.f32.mrb[4].mxu0 }
  0xf5   :  { %v425_v36 = vrot.slane %v423_v23, 7  ;;  %v431_v39 = vshrl.u32 %v3600_v24, 16  ;;  %v434_v40 = vshll.u32 %v3600_v24, 16  ;;  %v168_v41 = vadd.f32 %v3651_v35, %v4045_v50  ;;  %v159_v42 = vpop.f32.mrb[5].mxu0 }
  0xf6   :  { %v409_v44 = vrot.slane %v407_v32, 7  ;;  %v415_v46 = vshrl.u32 %v3598_v34, 16  ;;  %v418_v47 = vshll.u32 %v3598_v34, 16  ;;  %v160_v48 = vadd.f32 %v4045_v50, %v159_v42  ;;  %v3652_v49 = vpop.f32.mrb[6].mxu0 }
  0xf7   :  { %v428_v51 = vor.u32 %v426_v28, %v425_v36  ;;  %v429_v52 = vrot.slane %v425_v36, 4  ;;  %v433_v53 = vrot.slane %v431_v39, 7  ;;  %v212_v55 = vmax.f32 %v168_v41, 0.0  ;;  %v162_v56 = vpop.f32.mrb[7].mxu0  ;;  %v605_v36 = vld [vmem:[#allocation2 + $0x38] sm:$0xf] }
  0xf8   :  { %v412_v57 = vor.u32 %v410_v33, %v409_v44  ;;  %v413_v59 = vrot.slane %v409_v44, 4  ;;  %v417_v60 = vrot.slane %v415_v46, 7  ;;  %v210_v61 = vmax.f32 %v160_v48, 0.0 }
  0xf9   :  { %v582_v62 = vsel %vm4091_vm13, %v428_v51, %v581_v30  ;;  %v585_v1 = vsel %vm3952_vm4, %v429_v52, %v584_v31  ;;  %v436_v2 = vor.u32 %v434_v40, %v433_v53  ;;  %v437_v3 = vrot.slane %v433_v53, 4  ;;  %v4114_v30 = vld [vmem:[#allocation2 + $0x50] sm:$0xe]  ;;  %v608_v51 = vld [vmem:[#allocation2 + $0x3c] sm:$0x1] }
  0xfa   :  { %583 = vst [vmem:[#allocation2 + $0x18] sm:$0xf] %v582_v62  ;;  %586 = vst [vmem:[#allocation2 + $0x1c] sm:$0x1] %v585_v1  ;;  %v570_v8 = vsel %vm4091_vm13, %v412_v57, %v569_v37  ;;  %v573_v9 = vsel %vm3952_vm4, %v413_v59, %v572_v38  ;;  %v420_v11 = vor.u32 %v418_v47, %v417_v60  ;;  %v421_v12 = vrot.slane %v417_v60, 4 }
  0xfb   :  { %571 = vst [vmem:[#allocation2 + $0x8] sm:$0xf] %v570_v8  ;;  %574 = vst [vmem:[#allocation2 + $0xc] sm:$0x1] %v573_v9  ;;  %v588_v13 = vsel %vm4091_vm13, %v436_v2, %v587_v45  ;;  %v591_v14 = vsel %vm3952_vm4, %v437_v3, %v590_v54  ;;  %v3603_v15 = vpack.c.bf16 %v212_v55, %v212_v55  ;;  %v593_v37 = vld [vmem:[#allocation2 + $0x28] sm:$0xf] }
  0xfc   :  { %v3601_v16 = vpack.c.bf16 %v210_v61, %v210_v61  ;;  %589 = vst [vmem:[#allocation2 + $0x20] sm:$0xf] %v588_v13  ;;  %592 = vst [vmem:[#allocation2 + $0x24] sm:$0x1] %v591_v14  ;;  %v576_v19 = vsel %vm4091_vm13, %v420_v11, %v575_v4  ;;  %v579_v20 = vsel %vm3952_vm4, %v421_v12, %v578_v7  ;;  %v3655_v28 = vpop.f32.mrb[8].mxu0 }
  0xfd   :  { %v171_v23 = vadd.f32 %v3652_v49, %v4045_v50  ;;  %v163_v24 = vadd.f32 %v4045_v50, %v162_v56  ;;  %577 = vst [vmem:[#allocation2 + $0x10] sm:$0xf] %v576_v19  ;;  %580 = vst [vmem:[#allocation2 + $0x14] sm:$0x1] %v579_v20  ;;  %v455_v31 = vshrl.u32 %v3603_v15, 16  ;;  %v458_v32 = vshll.u32 %v3603_v15, 16 }
  0xfe   :  { %v439_v33 = vshrl.u32 %v3601_v16, 16  ;;  %v442_v34 = vshll.u32 %v3601_v16, 16  ;;  %v175_v35 = vpop.f32.mrb[9].mxu0  ;;  %v596_v38 = vld [vmem:[#allocation2 + $0x2c] sm:$0x1]  ;;  %v184_v41 = vadd.f32 %v3655_v28, %v4045_v50  ;;  %v3462_v49 = vrot.slane %v4114_v30, 9 }
  0xff   :  { %v213_v39 = vmax.f32 %v171_v23, 0.0  ;;  %v211_v40 = vmax.f32 %v163_v24, 0.0  ;;  %v176_v42 = vadd.f32 %v4045_v50, %v175_v35  ;;  %v3656_v44 = vpop.f32.mrb[10].mxu0  ;;  %v457_v45 = vrot.slane %v455_v31, 7  ;;  %v611_v9 = vld [vmem:[#allocation2 + $0x40] sm:$0xf] }
 0x100   :  { %v441_v46 = vrot.slane %v439_v33, 7  ;;  %v187_v47 = vadd.f32 %v3656_v44, %v4045_v50  ;;  %v178_v48 = vpop.f32.mrb[11].mxu0  ;;  %v216_v54 = vmax.f32 %v184_v41, 0.0  ;;  %v614_v11 = vld [vmem:[#allocation2 + $0x44] sm:$0x1]  ;;  %v4134_v23 = vsel %vm4051_vm11, %v3541_v21, %v2326_v22 }
 0x101   :  { %v3604_v52 = vpack.c.bf16 %v213_v39, %v213_v39  ;;  %v3602_v53 = vpack.c.bf16 %v211_v40, %v211_v40  ;;  %v214_v55 = vmax.f32 %v176_v42, 0.0  ;;  %v460_v56 = vor.u32 %v458_v32, %v457_v45  ;;  %v599_v12 = vld [vmem:[#allocation2 + $0x30] sm:$0xf]  ;;  %v602_v13 = vld [vmem:[#allocation2 + $0x34] sm:$0x1] }
 0x102   :  { %v461_v57 = vrot.slane %v457_v45, 4  ;;  %v444_v59 = vor.u32 %v442_v34, %v441_v46  ;;  %v445_v60 = vrot.slane %v441_v46, 4  ;;  %v1056_v15 = vld [vmem:[#allocation2 + $0x8] sm:$0xe]  ;;  %v2062_v24 = vsel %vm4064_vm12, %v4084_v26, %v4086_v27  ;;  %v1057_v28 = vld [vmem:[#allocation2 + $0xc] sm:$0x1] }
 0x103   :  { %v463_v61 = vshrl.u32 %v3604_v52, 16  ;;  %v466_v62 = vshll.u32 %v3604_v52, 16  ;;  %v447_v1 = vshrl.u32 %v3602_v53, 16  ;;  %v450_v2 = vshll.u32 %v3602_v53, 16  ;;  %v3753_v14 = vld [vmem:[#allocation2 + $0x18] ss:$8 sps:$4 sm:$0xff]  }
 0x104   :  { %v606_v3 = vsel %vm4091_vm13, %v460_v56, %v605_v36  ;;  %v609_v4 = vsel %vm3952_vm4, %v461_v57, %v608_v51  ;;  %v594_v7 = vsel %vm4091_vm13, %v444_v59, %v593_v37  ;;  %v597_v8 = vsel %vm3952_vm4, %v445_v60, %v596_v38  ;;  %v3754_v20 = vld [vmem:[#allocation2 + $0x8] ss:$8 sps:$4 sm:$0xff]   ;;  %1300 = vrot.lane.b32.xlu1 %v3753_v14, %s3868_s2  ;;  %v1648_v36 = vld [vmem:[#allocation2 + $0x18] sm:$0xe]  ;;  %v1649_v38 = vld [vmem:[#allocation2 + $0x1c] sm:$0x1] }
 0x105   :  { %607 = vst [vmem:[#allocation2 + $0x38] sm:$0xf] %v606_v3  ;;  %610 = vst [vmem:[#allocation2 + $0x3c] sm:$0x1] %v609_v4  ;;  %v465_v16 = vrot.slane %v463_v61, 7  ;;  %v449_v19 = vrot.slane %v447_v1, 7  ;;  %v4141_v32 = vpack.c.bf16 %v216_v54, %v216_v54  ;;  %v4143_v33 = vpack.c.bf16 %v214_v55, %v214_v55  ;;  %1298 = vrot.lane.b32.xlu0 %v3754_v20, %s3868_s2 }
 0x106   :  { %595 = vst [vmem:[#allocation2 + $0x28] sm:$0xf] %v594_v7  ;;  %598 = vst [vmem:[#allocation2 + $0x2c] sm:$0x1] %v597_v8  ;;  %v3455_v31 = vrot.slane %v1056_v15, 9  ;;  %v217_v10 = vmax.f32 %v187_v47, 0.0  ;;  %v4149_v42 = vadd.f32 %v4045_v50, %v178_v48 }
 0x107   :  { %v468_v6 = vor.u32 %v466_v62, %v465_v16  ;;  %v469_v34 = vrot.slane %v465_v16, 4  ;;  %v452_v35 = vor.u32 %v450_v2, %v449_v19  ;;  %v453_v21 = vrot.slane %v449_v19, 4  ;;  %v3755_v22 = vld [vmem:[#allocation2 + $0x10] ss:$8 sps:$4 sm:$0xff]   ;;  %v1650_v39 = vld [vmem:[#allocation2 + $0x20] sm:$0xe] }
 0x108   :  { %v1127_v37 = vrot.slane %v1057_v28, 5  ;;  %v3496_v40 = vrot.slane %v1648_v36, 9  ;;  %v4146_v41 = vpack.c.bf16 %v217_v10, %v217_v10  ;;  %v1651_v51 = vld [vmem:[#allocation2 + $0x24] sm:$0x1]  ;;  %v1644_v52 = vld [vmem:[#allocation2 + $0x8] sm:$0xe] }
 0x109   :  { %v612_v44 = vsel %vm4091_vm13, %v468_v6, %v611_v9  ;;  %v615_v45 = vsel %vm3952_vm4, %v469_v34, %v614_v11  ;;  %v600_v46 = vsel %vm4091_vm13, %v452_v35, %v599_v12  ;;  %v603_v47 = vsel %vm3952_vm4, %v453_v21, %v602_v13  ;;  %v1645_v53 = vld [vmem:[#allocation2 + $0xc] sm:$0x1]  ;;  %v1646_v57 = vld [vmem:[#allocation2 + $0x10] sm:$0xe]  ;;  %v3659_v59 = vpop.f32.mrb[12].mxu0  ;;  %1886 = vrot.lane.b32.xlu0 %v3755_v22, %s3869_s21 }
 0x10a   :  { %613 = vst [vmem:[#allocation2 + $0x40] sm:$0xf] %v612_v44  ;;  %616 = vst [vmem:[#allocation2 + $0x44] sm:$0x1] %v615_v45  ;;  %v1128_v48 = vsel %vm4051_vm11, %v3455_v31, %v1127_v37  ;;  %v1718_v54 = vrot.slane %v1649_v38, 5  ;;  %v3497_v55 = vrot.slane %v1650_v39, 9  ;;  %v4176_v34 = vadd.f32 %v3659_v59, %v4045_v50 }
 0x10b   :  { %601 = vst [vmem:[#allocation2 + $0x30] sm:$0xf] %v600_v46  ;;  %604 = vst [vmem:[#allocation2 + $0x34] sm:$0x1] %v603_v47  ;;  %v1722_v56 = vrot.slane %v1651_v51, 5  ;;  %v3470_v60 = vcombine.low %v4076_v17, %v1128_v48  ;;  %v3494_v62 = vrot.slane %v1644_v52, 9 }
 0x10c   :  { %v1647_v61 = vld [vmem:[#allocation2 + $0x14] sm:$0x1]  ;;  %v1710_v1 = vrot.slane %v1645_v53, 5  ;;  %v3495_v2 = vrot.slane %v1646_v57, 9  ;;  %v4163_v3 = vpop.f32.mrb[13].mxu0  ;;  %v1719_v4 = vsel %vm4051_vm11, %v3496_v40, %v1718_v54  ;;  %v487_v17 = vshrl.u32 %v4141_v32, 16 }
 0x10d   :  { %v1723_v7 = vsel %vm4051_vm11, %v3497_v55, %v1722_v56  ;;  %v1714_v8 = vrot.slane %v1647_v61, 5  ;;  %v1058_v9 = vld [vmem:[#allocation2 + $0x10] sm:$0xe]  ;;  %v1059_v11 = vld [vmem:[#allocation2 + $0x14] sm:$0x1]  ;;  %1209 = vrot.lane.b32.xlu1 %v3470_v60, %s3870_s22  ;;  %v3660_v47 = vpop.f32.mrb[14].mxu0 }
 0x10e   :  { %v3511_v12 = vcombine.low %v1719_v4, %v1723_v7  ;;  %v1711_v13 = vsel %vm4051_vm11, %v3494_v62, %v1710_v1  ;;  %v1060_v14 = vld [vmem:[#allocation2 + $0x18] sm:$0xe]  ;;  %v1061_v15 = vld [vmem:[#allocation2 + $0x1c] sm:$0x1]  ;;  %v3456_v16 = vrot.slane %v1058_v9, 9  ;;  %v1131_v19 = vrot.slane %v1059_v11, 5 }
 0x10f   :  { %v1715_v20 = vsel %vm4051_vm11, %v3495_v2, %v1714_v8  ;;  %v3457_v28 = vrot.slane %v1060_v14, 9  ;;  %v1135_v31 = vrot.slane %v1061_v15, 5  ;;  %v2232_v10 = vld [vmem:[#allocation2 + $0x10] sm:$0xe]  ;;  %v2233_v6 = vld [vmem:[#allocation2 + $0x14] sm:$0x1] }
 0x110   :  { %v3510_v35 = vcombine.low %v1711_v13, %v1715_v20  ;;  %v1132_v21 = vsel %vm4051_vm11, %v3456_v16, %v1131_v19  ;;  %v2234_v22 = vld [vmem:[#allocation2 + $0x18] sm:$0xe]  ;;  %v2235_v36 = vld [vmem:[#allocation2 + $0x1c] sm:$0x1]  ;;  %v3534_v37 = vrot.slane %v2232_v10, 9  ;;  %v2298_v38 = vrot.slane %v2233_v6, 5 }
 0x111   :  { %v1136_v39 = vsel %vm4051_vm11, %v3457_v28, %v1135_v31  ;;  %v3535_v40 = vrot.slane %v2234_v22, 9  ;;  %v2302_v44 = vrot.slane %v2235_v36, 5  ;;  %v489_v45 = vrot.slane %v487_v17, 7  ;;  %v629_v46 = vld [vmem:[#allocation2 + $0x68] sm:$0xf]  ;;  %1798 = vrot.lane.b32.xlu1 %v3511_v12, %s3871_s23  ;;  %v194_v1 = vpop.f32.mrb[15].mxu0 }
 0x112   :  { %1796 = vrot.lane.b32.xlu0 %v3510_v35, %s3871_s23  ;;  %v3471_v51 = vcombine.low %v1132_v21, %v1136_v39  ;;  %v2299_v52 = vsel %vm4051_vm11, %v3534_v37, %v2298_v38  ;;  %v490_v53 = vshll.u32 %v4141_v32, 16  ;;  %v632_v48 = vld [vmem:[#allocation2 + $0x6c] sm:$0x1]  ;;  %v471_v54 = vshrl.u32 %v4143_v33, 16  ;;  %v617_v59 = vld [vmem:[#allocation2 + $0x58] sm:$0xf] }
 0x113   :  { %v2303_v55 = vsel %vm4051_vm11, %v3535_v40, %v2302_v44  ;;  %v493_v56 = vrot.slane %v489_v45, 4  ;;  %v474_v57 = vshll.u32 %v4143_v33, 16  ;;  %v620_v60 = vld [vmem:[#allocation2 + $0x5c] sm:$0x1]  ;;  %v495_v61 = vshrl.u32 %v4146_v41, 16 }
 0x114   :  { %v740_v62 = vld [vmem:[#allocation2 + $0x8] sm:$0xf]  ;;  %v4192_v2 = vld [vmem:[#allocation2 + $0x50] sm:$0xf]  ;;  %v3550_v4 = vcombine.low %v2299_v52, %v2303_v55  ;;  %v492_v7 = vor.u32 %v490_v53, %v489_v45  ;;  %v473_v32 = vrot.slane %v471_v54, 7  ;;  %v498_v8 = vshll.u32 %v4146_v41, 16 }
 0x115   :  { %v635_v9 = vld [vmem:[#allocation2 + $0x70] sm:$0xf]  ;;  %v741_v11 = vld [vmem:[#allocation2 + $0xc] sm:$0x1]  ;;  %v633_v17 = vsel %vm3952_vm4, %v493_v56, %v632_v48  ;;  %v497_v12 = vrot.slane %v495_v61, 7  ;;  %v788_v33 = vshrl.u32 %v740_v62, 16  ;;  %1211 = vrot.lane.b32.xlu1 %v3471_v51, %s3870_s22  ;;  %v4216_v51 = vadd.f32 %v3660_v47, %v4045_v50 }
 0x116   :  { %v791_v13 = vshll.u32 %v740_v62, 16  ;;  %2384 = vrot.lane.b32.xlu0 %v3550_v4, %s3872_s24  ;;  %v630_v14 = vsel %vm4091_vm13, %v492_v7, %v629_v46  ;;  %634 = vst [vmem:[#allocation2 + $0x6c] sm:$0x1] %v633_v17  ;;  %v476_v15 = vor.u32 %v474_v57, %v473_v32  ;;  %v477_v16 = vrot.slane %v473_v32, 4  ;;  %v638_v41 = vld [vmem:[#allocation2 + $0x74] sm:$0x1] }
 0x117   :  { %v797_v19 = vshll.u32 %v741_v11, 16  ;;  %631 = vst [vmem:[#allocation2 + $0x68] sm:$0xf] %v630_v14  ;;  %v500_v20 = vor.u32 %v498_v8, %v497_v12  ;;  %v501_v28 = vrot.slane %v497_v12, 4  ;;  %v790_v31 = vrot.slane %v788_v33, 4 }
 0x118   :  { %v793_v10 = vrot.slane %v791_v13, 5  ;;  %v618_v6 = vsel %vm4091_vm13, %v476_v15, %v617_v59  ;;  %v621_v35 = vsel %vm3952_vm4, %v477_v16, %v620_v60  ;;  %v3756_v21 = vld [vmem:[#allocation2 + $0x20] ss:$8 sps:$4 sm:$0xff]   ;;  %v215_v22 = vmax.f32 %v4149_v42, 0.0  ;;  %v1335_v46 = vld [vmem:[#allocation2 + $0x18] sm:$0xf] }
 0x119   :  { %v886_v36 = vshrl.u32 %v4192_v2, 16  ;;  %619 = vst [vmem:[#allocation2 + $0x58] sm:$0xf] %v618_v6  ;;  %622 = vst [vmem:[#allocation2 + $0x5c] sm:$0x1] %v621_v35  ;;  %v636_v37 = vsel %vm4091_vm13, %v500_v20, %v635_v9  ;;  %v639_v38 = vsel %vm3952_vm4, %v501_v28, %v638_v41  ;;  %v220_v40 = vmax.f32 %v4176_v34, 0.0  ;;  %1888 = vrot.lane.b32.xlu1 %v3756_v21, %s3869_s21 }
 0x11a   :  { %v794_v39 = vor.u32 %v793_v10, %v790_v31  ;;  %637 = vst [vmem:[#allocation2 + $0x70] sm:$0xf] %v636_v37  ;;  %640 = vst [vmem:[#allocation2 + $0x74] sm:$0x1] %v639_v38  ;;  %v3606_v44 = vpack.c.bf16 %v215_v22, %v215_v22  ;;  %v192_v42 = vadd.f32 %v4045_v50, %v4163_v3  ;;  %v3757_v45 = vld [vmem:[#allocation2 + $0x38] ss:$8 sps:$4 sm:$0xff]  }
 0x11b   :  { %v4219_v52 = vadd.f32 %v4045_v50, %v194_v1  ;;  %v799_v48 = vrot.slane %v797_v19, 5  ;;  %v3611_v54 = vpack.c.bf16 %v220_v40, %v220_v40  ;;  %v1336_v34 = vld [vmem:[#allocation2 + $0x1c] sm:$0x1]  ;;  %v1392_v55 = vshrl.u32 %v1335_v46, 16  ;;  %v1337_v60 = vld [vmem:[#allocation2 + $0x20] sm:$0xf] }
 0x11c   :  { %v795_v53 = vrot.slane %v794_v39, 4  ;;  %v479_v56 = vshrl.u32 %v3606_v44, 16  ;;  %v482_v57 = vshll.u32 %v3606_v44, 16  ;;  %v218_v59 = vmax.f32 %v192_v42, 0.0  ;;  %v623_v62 = vld [vmem:[#allocation2 + $0x60] sm:$0xf] }
 0x11d   :  { %v1395_v61 = vshll.u32 %v1335_v46, 16  ;;  %v519_v4 = vshrl.u32 %v3611_v54, 16  ;;  %v522_v47 = vshll.u32 %v3611_v54, 16  ;;  %v1394_v7 = vrot.slane %v1392_v55, 4  ;;  %v626_v32 = vld [vmem:[#allocation2 + $0x64] sm:$0x1]  ;;  %1304 = vrot.lane.b32.xlu1 %v3757_v45, %s3868_s2 }
 0x11e   :  { %v800_v3 = vsel %vm4064_vm12, %v795_v53, %v799_v48  ;;  %v481_v1 = vrot.slane %v479_v56, 7  ;;  %v653_v8 = vld [vmem:[#allocation2 + $0x88] sm:$0xf]  ;;  %v3609_v9 = vpack.c.bf16 %v218_v59, %v218_v59  ;;  %v656_v12 = vld [vmem:[#allocation2 + $0x8c] sm:$0x1]  ;;  %v1401_v33 = vshll.u32 %v1336_v34, 16 }
 0x11f   :  { %v3446_v50 = vcombine.low %v786_v18, %v800_v3  ;;  %v1397_v11 = vrot.slane %v1395_v61, 5  ;;  %v521_v17 = vrot.slane %v519_v4, 7  ;;  %v1406_v13 = vshrl.u32 %v1337_v60, 16  ;;  %v3759_v58 = vld [vmem:[#allocation2 + $0x40] ss:$8 sps:$4 sm:$0xff]  }
 0x120   :  { %v1409_v14 = vshll.u32 %v1337_v60, 16  ;;  %v484_v15 = vor.u32 %v482_v57, %v481_v1  ;;  %v485_v16 = vrot.slane %v481_v1, 4  ;;  %v503_v41 = vshrl.u32 %v3609_v9, 16  ;;  %v641_v20 = vld [vmem:[#allocation2 + $0x78] sm:$0xf] }
 0x121   :  { %1021 = vrot.lane.b32.xlu0 %v3446_v50, %s3866_s16  ;;  %v506_v19 = vshll.u32 %v3609_v9, 16  ;;  %v524_v0 = vor.u32 %v522_v47, %v521_v17  ;;  %v525_v18 = vrot.slane %v521_v17, 4  ;;  %v1338_v28 = vld [vmem:[#allocation2 + $0x24] sm:$0x1]  ;;  %v1398_v31 = vor.u32 %v1397_v11, %v1394_v7  ;;  %v742_v6 = vld [vmem:[#allocation2 + $0x10] sm:$0xf]  ;;  %1892 = vrot.lane.b32.xlu1 %v3759_v58, %s3869_s21 }
 0x122   :  { %v1403_v10 = vrot.slane %v1401_v33, 5  ;;  %v624_v35 = vsel %vm4091_vm13, %v484_v15, %v623_v62  ;;  %v627_v21 = vsel %vm3952_vm4, %v485_v16, %v626_v32  ;;  %v505_v22 = vrot.slane %v503_v41, 7  ;;  %v3758_v37 = vld [vmem:[#allocation2 + $0x28] ss:$8 sps:$4 sm:$0xff]   ;;  %v743_v39 = vld [vmem:[#allocation2 + $0x14] sm:$0x1] }
 0x123   :  { %v1408_v38 = vrot.slane %v1406_v13, 4  ;;  %625 = vst [vmem:[#allocation2 + $0x60] sm:$0xf] %v624_v35  ;;  %628 = vst [vmem:[#allocation2 + $0x64] sm:$0x1] %v627_v21  ;;  %v654_v40 = vsel %vm4091_vm13, %v524_v0, %v653_v8  ;;  %v657_v44 = vsel %vm3952_vm4, %v525_v18, %v656_v12  ;;  %v1399_v45 = vrot.slane %v1398_v31, 4 }
 0x124   :  { %v644_v42 = vld [vmem:[#allocation2 + $0x7c] sm:$0x1]  ;;  %v1411_v46 = vrot.slane %v1409_v14, 5  ;;  %v744_v53 = vld [vmem:[#allocation2 + $0x18] sm:$0xf]  ;;  %v508_v48 = vor.u32 %v506_v19, %v505_v22  ;;  %v509_v54 = vrot.slane %v505_v22, 4 }
 0x125   :  { %655 = vst [vmem:[#allocation2 + $0x88] sm:$0xf] %v654_v40  ;;  %658 = vst [vmem:[#allocation2 + $0x8c] sm:$0x1] %v657_v44  ;;  %1302 = vrot.lane.b32.xlu0 %v3758_v37, %s3868_s2  ;;  %v1415_v34 = vshll.u32 %v1338_v28, 16  ;;  %v802_v56 = vshrl.u32 %v742_v6, 16  ;;  %v1404_v57 = vsel %vm4064_vm12, %v1399_v45, %v1403_v10 }
 0x126   :  { %v745_v55 = vld [vmem:[#allocation2 + $0x1c] sm:$0x1]  ;;  %v1412_v59 = vor.u32 %v1411_v46, %v1408_v38  ;;  %v805_v60 = vshll.u32 %v742_v6, 16  ;;  %v811_v61 = vshll.u32 %v743_v39, 16  ;;  %v1656_v3 = vld [vmem:[#allocation2 + $0x38] sm:$0xe]  ;;  %v642_v4 = vsel %vm4091_vm13, %v508_v48, %v641_v20 }
 0x127   :  { %v1657_v62 = vld [vmem:[#allocation2 + $0x3c] sm:$0x1]  ;;  %v645_v47 = vsel %vm3952_vm4, %v509_v54, %v644_v42  ;;  %v3760_v7 = vld [vmem:[#allocation2 + $0x30] ss:$8 sps:$4 sm:$0xff]   ;;  %v1417_v50 = vrot.slane %v1415_v34, 5  ;;  %v804_v1 = vrot.slane %v802_v56, 4 }
 0x128   :  { %v1658_v32 = vld [vmem:[#allocation2 + $0x40] sm:$0xe]  ;;  %643 = vst [vmem:[#allocation2 + $0x78] sm:$0xf] %v642_v4  ;;  %646 = vst [vmem:[#allocation2 + $0x7c] sm:$0x1] %v645_v47 }
 0x129   :  { %v1413_v8 = vrot.slane %v1412_v59, 4  ;;  %v807_v9 = vrot.slane %v805_v60, 5  ;;  %v813_v11 = vrot.slane %v811_v61, 5  ;;  %v816_v17 = vshrl.u32 %v744_v53, 16  ;;  %v1659_v12 = vld [vmem:[#allocation2 + $0x44] sm:$0x1]  ;;  %1890 = vrot.lane.b32.xlu0 %v3760_v7, %s3869_s21 }
 0x12a   :  { %v819_v33 = vshll.u32 %v744_v53, 16  ;;  %v825_v13 = vshll.u32 %v745_v55, 16  ;;  %v3500_v14 = vrot.slane %v1656_v3, 9  ;;  %v1734_v15 = vrot.slane %v1657_v62, 5  ;;  %v1331_v16 = vld [vmem:[#allocation2 + $0x8] sm:$0xf] }
 0x12b   :  { %v1418_v41 = vsel %vm4064_vm12, %v1413_v8, %v1417_v50  ;;  %v808_v19 = vor.u32 %v807_v9, %v804_v1  ;;  %v818_v58 = vrot.slane %v816_v17, 4  ;;  %v3501_v0 = vrot.slane %v1658_v32, 9  ;;  %v1332_v18 = vld [vmem:[#allocation2 + $0xc] sm:$0x1]  ;;  %v1333_v20 = vld [vmem:[#allocation2 + $0x10] sm:$0xf] }
 0x12c   :  { %v3487_v28 = vcombine.low %v1404_v57, %v1418_v41  ;;  %v821_v31 = vrot.slane %v819_v33, 5  ;;  %v827_v10 = vrot.slane %v825_v13, 5  ;;  %v1735_v6 = vsel %vm4051_vm11, %v3500_v14, %v1734_v15  ;;  %v1334_v35 = vld [vmem:[#allocation2 + $0x14] sm:$0x1]  ;;  %v1066_v39 = vld [vmem:[#allocation2 + $0x30] sm:$0xe] }
 0x12d   :  { %v809_v21 = vrot.slane %v808_v19, 4  ;;  %v1738_v22 = vrot.slane %v1659_v12, 5  ;;  %v1364_v37 = vshrl.u32 %v1331_v16, 16  ;;  %v1367_v38 = vshll.u32 %v1331_v16, 16  ;;  %v1067_v46 = vld [vmem:[#allocation2 + $0x34] sm:$0x1] }
 0x12e   :  { %1613 = vrot.lane.b32.xlu1 %v3487_v28, %s3873_s25  ;;  %v822_v40 = vor.u32 %v821_v31, %v818_v58  ;;  %v1373_v44 = vshll.u32 %v1332_v18, 16  ;;  %v1378_v42 = vshrl.u32 %v1333_v20, 16  ;;  %v1381_v45 = vshll.u32 %v1333_v20, 16  ;;  %v1068_v55 = vld [vmem:[#allocation2 + $0x38] sm:$0xe] }
 0x12f   :  { %v814_v53 = vsel %vm4064_vm12, %v809_v21, %v813_v11  ;;  %v1739_v48 = vsel %vm4051_vm11, %v3501_v0, %v1738_v22  ;;  %v1366_v54 = vrot.slane %v1364_v37, 4  ;;  %v1369_v34 = vrot.slane %v1367_v38, 5  ;;  %v1069_v56 = vld [vmem:[#allocation2 + $0x3c] sm:$0x1]  ;;  %v1919_v7 = vld [vmem:[#allocation2 + $0x10] sm:$0xf] }
 0x130   :  { %v823_v57 = vrot.slane %v822_v40, 4  ;;  %v3513_v59 = vcombine.low %v1735_v6, %v1739_v48  ;;  %v1375_v60 = vrot.slane %v1373_v44, 5  ;;  %v1380_v61 = vrot.slane %v1378_v42, 4  ;;  %v1920_v9 = vld [vmem:[#allocation2 + $0x14] sm:$0x1] }
 0x131   :  { %v1370_v3 = vor.u32 %v1369_v34, %v1366_v54  ;;  %v1383_v62 = vrot.slane %v1381_v45, 5  ;;  %v1387_v4 = vshll.u32 %v1334_v35, 16  ;;  %v3460_v47 = vrot.slane %v1066_v39, 9  ;;  %v1921_v13 = vld [vmem:[#allocation2 + $0x18] sm:$0xf] }
 0x132   :  { %v828_v50 = vsel %vm4064_vm12, %v823_v57, %v827_v10  ;;  %1802 = vrot.lane.b32.xlu1 %v3513_v59, %s3871_s23  ;;  %v1147_v1 = vrot.slane %v1067_v46, 5  ;;  %v3461_v32 = vrot.slane %v1068_v55, 9  ;;  %v1151_v8 = vrot.slane %v1069_v56, 5  ;;  %v1922_v16 = vld [vmem:[#allocation2 + $0x1c] sm:$0x1] }
 0x133   :  { %v3447_v11 = vcombine.low %v814_v53, %v828_v50  ;;  %v1371_v17 = vrot.slane %v1370_v3, 4  ;;  %v1384_v12 = vor.u32 %v1383_v62, %v1380_v61  ;;  %v1389_v33 = vrot.slane %v1387_v4, 5  ;;  %v1923_v58 = vld [vmem:[#allocation2 + $0x20] sm:$0xf]  ;;  %v1924_v31 = vld [vmem:[#allocation2 + $0x24] sm:$0x1] }
 0x134   :  { %v1148_v14 = vsel %vm4051_vm11, %v3460_v47, %v1147_v1  ;;  %v1152_v15 = vsel %vm4051_vm11, %v3461_v32, %v1151_v8  ;;  %v1952_v41 = vshrl.u32 %v1919_v7, 16  ;;  %v1955_v19 = vshll.u32 %v1919_v7, 16  ;;  %v1925_v10 = vld [vmem:[#allocation2 + $0x28] sm:$0xf]  ;;  %v1926_v37 = vld [vmem:[#allocation2 + $0x2c] sm:$0x1] }
 0x135   :  { %1023 = vrot.lane.b32.xlu0 %v3447_v11, %s3866_s16  ;;  %v1376_v0 = vsel %vm4064_vm12, %v1371_v17, %v1375_v60  ;;  %v1385_v18 = vrot.slane %v1384_v12, 4  ;;  %v3473_v20 = vcombine.low %v1148_v14, %v1152_v15  ;;  %v1961_v28 = vshll.u32 %v1920_v9, 16  ;;  %v2236_v48 = vld [vmem:[#allocation2 + $0x20] sm:$0xe]  ;;  %v2237_v57 = vld [vmem:[#allocation2 + $0x24] sm:$0x1] }
 0x136   :  { %v1954_v6 = vrot.slane %v1952_v41, 4  ;;  %v1957_v35 = vrot.slane %v1955_v19, 5  ;;  %v1966_v21 = vshrl.u32 %v1921_v13, 16  ;;  %v1969_v22 = vshll.u32 %v1921_v13, 16  ;;  %v2238_v62 = vld [vmem:[#allocation2 + $0x28] sm:$0xe] }
 0x137   :  { %v1390_v38 = vsel %vm4064_vm12, %v1385_v18, %v1389_v33  ;;  %1215 = vrot.lane.b32.xlu1 %v3473_v20, %s3870_s22  ;;  %v1963_v39 = vrot.slane %v1961_v28, 5  ;;  %v1975_v40 = vshll.u32 %v1922_v16, 16  ;;  %v1980_v44 = vshrl.u32 %v1923_v58, 16  ;;  %v2239_v50 = vld [vmem:[#allocation2 + $0x2c] sm:$0x1]  ;;  %v3771_v12 = vld [vmem:[%s5048_s3] sm:$0xff]  }
 0x138   :  { %v3486_v42 = vcombine.low %v1376_v0, %v1390_v38  ;;  %v1958_v45 = vor.u32 %v1957_v35, %v1954_v6  ;;  %v1968_v46 = vrot.slane %v1966_v21, 4  ;;  %v1971_v53 = vrot.slane %v1969_v22, 5  ;;  %v746_v17 = vld [vmem:[#allocation2 + $0x20] sm:$0xf]  ;;  %v3772_v16 = vld [vmem:[%s5048_s3 + $0x8] sm:$0xff]   ;;  %3661 = vmatprep.subr.bf16.mxu1 %v3771_v12 }
 0x139   :  { %v1977_v54 = vrot.slane %v1975_v40, 5  ;;  %v1982_v34 = vrot.slane %v1980_v44, 4  ;;  %v1983_v55 = vshll.u32 %v1923_v58, 16  ;;  %v1989_v56 = vshll.u32 %v1924_v31, 16  ;;  %v747_v18 = vld [vmem:[#allocation2 + $0x24] sm:$0x1]  ;;  %3662 = vmatpush3.bf16.msra.mxu1 %v3771_v12 }
 0x13a   :  { %1611 = vrot.lane.b32.xlu0 %v3486_v42, %s3873_s25  ;;  %v1959_v59 = vrot.slane %v1958_v45, 4  ;;  %v1972_v60 = vor.u32 %v1971_v53, %v1968_v46  ;;  %v1994_v61 = vshrl.u32 %v1925_v10, 16  ;;  %v1997_v3 = vshll.u32 %v1925_v10, 16  ;;  %v748_v22 = vld [vmem:[#allocation2 + $0x28] sm:$0xf]  ;;  %3663 = vmatprep.subr.bf16.mxu1 %v3772_v16 }
 0x13b   :  { %v1985_v4 = vrot.slane %v1983_v55, 5  ;;  %v1991_v47 = vrot.slane %v1989_v56, 5  ;;  %v2003_v7 = vshll.u32 %v1926_v37, 16  ;;  %v3536_v1 = vrot.slane %v2236_v48, 9  ;;  %v1062_v42 = vld [vmem:[#allocation2 + $0x20] sm:$0xe] }
 0x13c   :  { %v1964_v32 = vsel %vm4064_vm12, %v1959_v59, %v1963_v39  ;;  %v1973_v8 = vrot.slane %v1972_v60, 4  ;;  %v1996_v9 = vrot.slane %v1994_v61, 4  ;;  %v1999_v11 = vrot.slane %v1997_v3, 5  ;;  %v749_v39 = vld [vmem:[#allocation2 + $0x2c] sm:$0x1] }
 0x13d   :  { %v1986_v33 = vor.u32 %v1985_v4, %v1982_v34  ;;  %v2005_v13 = vrot.slane %v2003_v7, 5  ;;  %v2306_v14 = vrot.slane %v2237_v57, 5  ;;  %v3537_v15 = vrot.slane %v2238_v62, 9  ;;  %v3773_v34 = vld [vmem:[%s5048_s3 + $0x10] sm:$0xff]   ;;  %v1064_v3 = vld [vmem:[#allocation2 + $0x28] sm:$0xe]  ;;  %3664 = vmatpush3.bf16.msra.mxu1 %v3772_v16 }
 0x13e   :  { %v1978_v41 = vsel %vm4064_vm12, %v1973_v8, %v1977_v54  ;;  %v2000_v19 = vor.u32 %v1999_v11, %v1996_v9  ;;  %v2310_v58 = vrot.slane %v2239_v50, 5  ;;  %v221_v0 = vmax.f32 %v4216_v51, 0.0  ;;  %v1063_v54 = vld [vmem:[#allocation2 + $0x24] sm:$0x1]  ;;  %v659_v56 = vld [vmem:[#allocation2 + $0x90] sm:$0xf]  ;;  %3665 = vmatprep.subr.bf16.mxu1 %v3773_v34 }
 0x13f   :  { %v3526_v20 = vcombine.low %v1964_v32, %v1978_v41  ;;  %v1987_v28 = vrot.slane %v1986_v33, 4  ;;  %v2307_v31 = vsel %vm4051_vm11, %v3536_v1, %v2306_v14  ;;  %v830_v10 = vshrl.u32 %v746_v17, 16  ;;  %v662_v57 = vld [vmem:[#allocation2 + $0x94] sm:$0x1]  ;;  %v1065_v50 = vld [vmem:[#allocation2 + $0x2c] sm:$0x1] }
 0x140   :  { %v2001_v6 = vrot.slane %v2000_v19, 4  ;;  %v2311_v35 = vsel %vm4051_vm11, %v3537_v15, %v2310_v58  ;;  %v3612_v21 = vpack.c.bf16 %v221_v0, %v221_v0  ;;  %v833_v37 = vshll.u32 %v746_v17, 16  ;;  %v3774_v1 = vld [vmem:[%s5048_s3 + $0x18] sm:$0xff]   ;;  %v2244_v17 = vld [vmem:[#allocation2 + $0x40] sm:$0xe] }
 0x141   :  { %2199 = vrot.lane.b32.xlu0 %v3526_v20, %s3874_s30  ;;  %v1992_v51 = vsel %vm4064_vm12, %v1987_v28, %v1991_v47  ;;  %v3551_v38 = vcombine.low %v2307_v31, %v2311_v35  ;;  %v832_v40 = vrot.slane %v830_v10, 4  ;;  %v839_v44 = vshll.u32 %v747_v18, 16  ;;  %v1343_v58 = vld [vmem:[#allocation2 + $0x38] sm:$0xf]  ;;  %v1344_v0 = vld [vmem:[#allocation2 + $0x3c] sm:$0x1]  ;;  %3666 = vmatpush3.bf16.msra.mxu1 %v3773_v34 }
 0x142   :  { %v2006_v45 = vsel %vm4064_vm12, %v2001_v6, %v2005_v13  ;;  %v527_v46 = vshrl.u32 %v3612_v21, 16  ;;  %v530_v53 = vshll.u32 %v3612_v21, 16  ;;  %v835_v48 = vrot.slane %v833_v37, 5  ;;  %3667 = vmatprep.subr.bf16.mxu1 %v3774_v1  ;;  %v647_v37 = vld [vmem:[#allocation2 + $0x80] sm:$0xf] }
 0x143   :  { %v3527_v55 = vcombine.low %v1992_v51, %v2006_v45  ;;  %v841_v59 = vrot.slane %v839_v44, 5  ;;  %v844_v60 = vshrl.u32 %v748_v22, 16  ;;  %v847_v61 = vshll.u32 %v748_v22, 16  ;;  %v1345_v22 = vld [vmem:[#allocation2 + $0x40] sm:$0xf] }
 0x144   :  { %v529_v62 = vrot.slane %v527_v46, 7  ;;  %v836_v4 = vor.u32 %v835_v48, %v832_v40  ;;  %v853_v47 = vshll.u32 %v749_v39, 16  ;;  %v219_v7 = vmax.f32 %v4219_v52, 0.0  ;;  %v2245_v52 = vld [vmem:[#allocation2 + $0x44] sm:$0x1] }
 0x145   :  { %2201 = vrot.lane.b32.xlu1 %v3527_v55, %s3874_s30  ;;  %2386 = vrot.lane.b32.xlu0 %v3551_v38, %s3872_s24  ;;  %v846_v32 = vrot.slane %v844_v60, 4  ;;  %v849_v8 = vrot.slane %v847_v61, 5  ;;  %v3458_v9 = vrot.slane %v1062_v42, 9  ;;  %v1139_v11 = vrot.slane %v1063_v54, 5  ;;  %v650_v51 = vld [vmem:[#allocation2 + $0x84] sm:$0x1] }
 0x146   :  { %v532_v12 = vor.u32 %v530_v53, %v529_v62  ;;  %v533_v33 = vrot.slane %v529_v62, 4  ;;  %v837_v13 = vrot.slane %v836_v4, 4  ;;  %v855_v14 = vrot.slane %v853_v47, 5  ;;  %v1346_v40 = vld [vmem:[#allocation2 + $0x44] sm:$0x1]  ;;  %3668 = vmatpush3.bf16.msra.mxu1 %v3774_v1 }
 0x147   :  { %v850_v15 = vor.u32 %v849_v8, %v846_v32  ;;  %v3610_v16 = vpack.c.bf16 %v219_v7, %v219_v7  ;;  %v1140_v41 = vsel %vm4051_vm11, %v3458_v9, %v1139_v11  ;;  %v3459_v19 = vrot.slane %v1064_v3, 9  ;;  %v1652_v54 = vld [vmem:[#allocation2 + $0x28] sm:$0xe]  ;;  %v1653_v34 = vld [vmem:[#allocation2 + $0x2c] sm:$0x1] }
 0x148   :  { %v660_v18 = vsel %vm4091_vm13, %v532_v12, %v659_v56  ;;  %v663_v20 = vsel %vm3952_vm4, %v533_v33, %v662_v57  ;;  %v842_v28 = vsel %vm4064_vm12, %v837_v13, %v841_v59  ;;  %v1143_v31 = vrot.slane %v1065_v50, 5  ;;  %v1654_v60 = vld [vmem:[#allocation2 + $0x30] sm:$0xe]  ;;  %v1655_v61 = vld [vmem:[#allocation2 + $0x34] sm:$0x1] }
 0x149   :  { %661 = vst [vmem:[#allocation2 + $0x90] sm:$0xf] %v660_v18  ;;  %664 = vst [vmem:[#allocation2 + $0x94] sm:$0x1] %v663_v20  ;;  %v851_v10 = vrot.slane %v850_v15, 4  ;;  %v511_v6 = vshrl.u32 %v3610_v16, 16 }
 0x14a   :  { %v514_v35 = vshll.u32 %v3610_v16, 16  ;;  %v3540_v21 = vrot.slane %v2244_v17, 9  ;;  %v1144_v38 = vsel %vm4051_vm11, %v3459_v19, %v1143_v31  ;;  %v2322_v39 = vrot.slane %v2245_v52, 5  ;;  %v1931_v7 = vld [vmem:[#allocation2 + $0x40] sm:$0xf] }
 0x14b   :  { %v1448_v44 = vshrl.u32 %v1343_v58, 16  ;;  %v1451_v42 = vshll.u32 %v1343_v58, 16  ;;  %v856_v45 = vsel %vm4064_vm12, %v851_v10, %v855_v14  ;;  %v513_v46 = vrot.slane %v511_v6, 7  ;;  %v3761_v50 = vld [vmem:[#allocation2 + $0x68] ss:$8 sps:$4 sm:$0xff]  }
 0x14c   :  { %v3472_v53 = vcombine.low %v1140_v41, %v1144_v38  ;;  %v1457_v48 = vshll.u32 %v1344_v0, 16  ;;  %v3448_v55 = vcombine.low %v842_v28, %v856_v45  ;;  %v2323_v56 = vsel %vm4051_vm11, %v3540_v21, %v2322_v39  ;;  %v1932_v11 = vld [vmem:[#allocation2 + $0x44] sm:$0x1]  ;;  %v2240_v14 = vld [vmem:[#allocation2 + $0x30] sm:$0xe] }
 0x14d   :  { %v1450_v57 = vrot.slane %v1448_v44, 4  ;;  %v1453_v59 = vrot.slane %v1451_v42, 5  ;;  %v516_v3 = vor.u32 %v514_v35, %v513_v46  ;;  %v517_v62 = vrot.slane %v513_v46, 4  ;;  %v2242_v19 = vld [vmem:[#allocation2 + $0x38] sm:$0xe] }
 0x14e   :  { %1213 = vrot.lane.b32.xlu0 %v3472_v53, %s3870_s22  ;;  %v3553_v4 = vcombine.low %v2323_v56, %v4134_v23  ;;  %v1459_v47 = vrot.slane %v1457_v48, 5  ;;  %1025 = vrot.lane.b32.xlu1 %v3448_v55, %s3866_s16  ;;  %v1462_v32 = vshrl.u32 %v1345_v22, 16  ;;  %v1465_v8 = vshll.u32 %v1345_v22, 16  ;;  %v2241_v23 = vld [vmem:[#allocation2 + $0x34] sm:$0x1] }
 0x14f   :  { %v1454_v1 = vor.u32 %v1453_v59, %v1450_v57  ;;  %v1471_v9 = vshll.u32 %v1346_v40, 16  ;;  %v648_v17 = vsel %vm4091_vm13, %v516_v3, %v647_v37  ;;  %v651_v12 = vsel %vm3952_vm4, %v517_v62, %v650_v51  ;;  %v2243_v20 = vld [vmem:[#allocation2 + $0x3c] sm:$0x1]  ;;  %v750_v35 = vld [vmem:[#allocation2 + $0x30] sm:$0xf] }
 0x150   :  { %v3498_v33 = vrot.slane %v1652_v54, 9  ;;  %v1726_v13 = vrot.slane %v1653_v34, 5  ;;  %649 = vst [vmem:[#allocation2 + $0x80] sm:$0xf] %v648_v17  ;;  %652 = vst [vmem:[#allocation2 + $0x84] sm:$0x1] %v651_v12 }
 0x151   :  { %v1455_v52 = vrot.slane %v1454_v1, 4  ;;  %v1464_v15 = vrot.slane %v1462_v32, 4  ;;  %v1467_v16 = vrot.slane %v1465_v8, 5  ;;  %v1473_v41 = vrot.slane %v1471_v9, 5  ;;  %v751_v21 = vld [vmem:[#allocation2 + $0x34] sm:$0x1] }
 0x152   :  { %2390 = vrot.lane.b32.xlu0 %v3553_v4, %s3872_s24  ;;  %v1727_v43 = vsel %vm4051_vm11, %v3498_v33, %v1726_v13  ;;  %v3499_v58 = vrot.slane %v1654_v60, 9  ;;  %v1730_v0 = vrot.slane %v1655_v61, 5  ;;  %v2036_v18 = vshrl.u32 %v1931_v7, 16  ;;  %1308 = vrot.lane.b32.xlu1 %v3761_v50, %s3868_s2  ;;  %v752_v39 = vld [vmem:[#allocation2 + $0x38] sm:$0xf] }
 0x153   :  { %v1460_v28 = vsel %vm4064_vm12, %v1455_v52, %v1459_v47  ;;  %v1468_v31 = vor.u32 %v1467_v16, %v1464_v15  ;;  %v2039_v10 = vshll.u32 %v1931_v7, 16  ;;  %v2045_v6 = vshll.u32 %v1932_v11, 16  ;;  %v753_v46 = vld [vmem:[#allocation2 + $0x3c] sm:$0x1]  ;;  %v1664_v53 = vld [vmem:[#allocation2 + $0x68] sm:$0xe] }
 0x154   :  { %v1731_v22 = vsel %vm4051_vm11, %v3499_v58, %v1730_v0  ;;  %v2038_v37 = vrot.slane %v2036_v18, 4  ;;  %v3538_v51 = vrot.slane %v2240_v14, 9  ;;  %v2314_v38 = vrot.slane %v2241_v23, 5  ;;  %v1665_v61 = vld [vmem:[#allocation2 + $0x6c] sm:$0x1] }
 0x155   :  { %v1469_v40 = vrot.slane %v1468_v31, 4  ;;  %v3512_v44 = vcombine.low %v1727_v43, %v1731_v22  ;;  %v2041_v42 = vrot.slane %v2039_v10, 5  ;;  %v2047_v45 = vrot.slane %v2045_v6, 5  ;;  %v1666_v3 = vld [vmem:[#allocation2 + $0x70] sm:$0xe] }
 0x156   :  { %v2315_v48 = vsel %vm4051_vm11, %v3538_v51, %v2314_v38  ;;  %v3539_v54 = vrot.slane %v2242_v19, 9  ;;  %v2318_v34 = vrot.slane %v2243_v20, 5  ;;  %v858_v55 = vshrl.u32 %v750_v35, 16  ;;  %v1667_v50 = vld [vmem:[#allocation2 + $0x74] sm:$0x1] }
 0x157   :  { %v1474_v56 = vsel %vm4064_vm12, %v1469_v40, %v1473_v41  ;;  %1800 = vrot.lane.b32.xlu0 %v3512_v44, %s3871_s23  ;;  %v2042_v57 = vor.u32 %v2041_v42, %v2038_v37  ;;  %v861_v59 = vshll.u32 %v750_v35, 16  ;;  %v867_v60 = vshll.u32 %v751_v21, 16  ;;  %v1074_v1 = vld [vmem:[#allocation2 + $0x60] sm:$0xe]  ;;  %v1075_v17 = vld [vmem:[#allocation2 + $0x64] sm:$0x1] }
 0x158   :  { %v3489_v62 = vcombine.low %v1460_v28, %v1474_v56  ;;  %v2319_v4 = vsel %vm4051_vm11, %v3539_v54, %v2318_v34  ;;  %v860_v47 = vrot.slane %v858_v55, 4  ;;  %v872_v7 = vshrl.u32 %v752_v39, 16  ;;  %v1076_v23 = vld [vmem:[#allocation2 + $0x68] sm:$0xe]  ;;  %v3762_v16 = vld [vmem:[#allocation2 + $0x58] ss:$8 sps:$4 sm:$0xff]  }
 0x159   :  { %v2043_v32 = vrot.slane %v2042_v57, 4  ;;  %v3552_v8 = vcombine.low %v2315_v48, %v2319_v4  ;;  %v863_v9 = vrot.slane %v861_v59, 5  ;;  %v869_v11 = vrot.slane %v867_v60, 5  ;;  %v1077_v43 = vld [vmem:[#allocation2 + $0x6c] sm:$0x1] }
 0x15a   :  { %1617 = vrot.lane.b32.xlu1 %v3489_v62, %s3873_s25  ;;  %v874_v12 = vrot.slane %v872_v7, 4  ;;  %v875_v33 = vshll.u32 %v752_v39, 16  ;;  %v881_v13 = vshll.u32 %v753_v46, 16  ;;  %v3504_v14 = vrot.slane %v1664_v53, 9  ;;  %v1339_v58 = vld [vmem:[#allocation2 + $0x28] sm:$0xf] }
 0x15b   :  { %v2048_v52 = vsel %vm4064_vm12, %v2043_v32, %v2047_v45  ;;  %2388 = vrot.lane.b32.xlu0 %v3552_v8, %s3872_s24  ;;  %v864_v15 = vor.u32 %v863_v9, %v860_v47  ;;  %v1750_v41 = vrot.slane %v1665_v61, 5  ;;  %v3505_v19 = vrot.slane %v1666_v3, 9  ;;  %v1340_v31 = vld [vmem:[#allocation2 + $0x2c] sm:$0x1]  ;;  %v1341_v27 = vld [vmem:[#allocation2 + $0x30] sm:$0xf] }
 0x15c   :  { %v3529_v0 = vcombine.low %v2048_v52, %v2062_v24  ;;  %v877_v18 = vrot.slane %v875_v33, 5  ;;  %v883_v20 = vrot.slane %v881_v13, 5  ;;  %v1754_v28 = vrot.slane %v1667_v50, 5  ;;  %v3763_v39 = vld [vmem:[#allocation2 + $0x60] ss:$8 sps:$4 sm:$0xff]  }
 0x15d   :  { %v865_v10 = vrot.slane %v864_v15, 4  ;;  %v4346_v6 = vsel %vm4051_vm11, %v3504_v14, %v1750_v41  ;;  %v3464_v35 = vrot.slane %v1074_v1, 9  ;;  %v1163_v21 = vrot.slane %v1075_v17, 5  ;;  %v1342_v44 = vld [vmem:[#allocation2 + $0x34] sm:$0x1] }
 0x15e   :  { %2205 = vrot.lane.b32.xlu1 %v3529_v0, %s3874_s30  ;;  %v878_v22 = vor.u32 %v877_v18, %v874_v12  ;;  %v1755_v37 = vsel %vm4051_vm11, %v3505_v19, %v1754_v28  ;;  %v3465_v51 = vrot.slane %v1076_v23, 9  ;;  %v1167_v26 = vrot.slane %v1077_v43, 5  ;;  %v1927_v45 = vld [vmem:[#allocation2 + $0x30] sm:$0xf]  ;;  %v1928_v34 = vld [vmem:[#allocation2 + $0x34] sm:$0x1] }
 0x15f   :  { %v870_v24 = vsel %vm4064_vm12, %v865_v10, %v869_v11  ;;  %1306 = vrot.lane.b32.xlu0 %v3762_v16, %s3868_s2  ;;  %v3515_v38 = vcombine.low %v4346_v6, %v1755_v37  ;;  %v4357_v40 = vsel %vm4051_vm11, %v3464_v35, %v1163_v21  ;;  %v1420_v42 = vshrl.u32 %v1339_v58, 16  ;;  %v1929_v60 = vld [vmem:[#allocation2 + $0x38] sm:$0xf]  ;;  %v1930_v1 = vld [vmem:[#allocation2 + $0x3c] sm:$0x1] }
 0x160   :  { %v879_v46 = vrot.slane %v878_v22, 4  ;;  %v4361_v53 = vsel %vm4051_vm11, %v3465_v51, %v1167_v26  ;;  %v1423_v48 = vshll.u32 %v1339_v58, 16  ;;  %v1429_v54 = vshll.u32 %v1340_v31, 16  ;;  %v755_v23 = vld [vmem:[#allocation2 + $0x54] sm:$0x1] }
 0x161   :  { %v3475_v55 = vcombine.low %v4357_v40, %v4361_v53  ;;  %v1422_v56 = vrot.slane %v1420_v42, 4  ;;  %v1434_v57 = vshrl.u32 %v1341_v27, 16  ;;  %v1437_v59 = vshll.u32 %v1341_v27, 16  ;;  %v756_v19 = vld [vmem:[#allocation2 + $0x58] sm:$0xf] }
 0x162   :  { %v884_v61 = vsel %vm4064_vm12, %v879_v46, %v883_v20  ;;  %v1425_v3 = vrot.slane %v1423_v48, 5  ;;  %v1431_v62 = vrot.slane %v1429_v54, 5  ;;  %v1443_v4 = vshll.u32 %v1342_v44, 16  ;;  %v1071_v20 = vld [vmem:[#allocation2 + $0x54] sm:$0x1] }
 0x163   :  { %v3449_v47 = vcombine.low %v870_v24, %v884_v61  ;;  %1894 = vrot.lane.b32.xlu0 %v3763_v39, %s3869_s21  ;;  %v1436_v7 = vrot.slane %v1434_v57, 4  ;;  %v1439_v50 = vrot.slane %v1437_v59, 5  ;;  %v2008_v32 = vshrl.u32 %v1927_v45, 16  ;;  %v757_v6 = vld [vmem:[#allocation2 + $0x5c] sm:$0x1] }
 0x164   :  { %v1426_v8 = vor.u32 %v1425_v3, %v1422_v56  ;;  %v1445_v9 = vrot.slane %v1443_v4, 5  ;;  %v2011_v11 = vshll.u32 %v1927_v45, 16  ;;  %v2017_v17 = vshll.u32 %v1928_v34, 16  ;;  %v1072_v21 = vld [vmem:[#allocation2 + $0x58] sm:$0xe] }
 0x165   :  { %1027 = vrot.lane.b32.xlu1 %v3449_v47, %s3866_s16  ;;  %v1440_v12 = vor.u32 %v1439_v50, %v1436_v7  ;;  %v2010_v33 = vrot.slane %v2008_v32, 4  ;;  %v2022_v13 = vshrl.u32 %v1929_v60, 16  ;;  %v2025_v14 = vshll.u32 %v1929_v60, 16  ;;  %v1073_v27 = vld [vmem:[#allocation2 + $0x5c] sm:$0x1] }
 0x166   :  { %v1427_v52 = vrot.slane %v1426_v8, 4  ;;  %v2013_v15 = vrot.slane %v2011_v11, 5  ;;  %v2019_v16 = vrot.slane %v2017_v17, 5  ;;  %v2031_v41 = vshll.u32 %v1930_v1, 16  ;;  %v1660_v42 = vld [vmem:[#allocation2 + $0x58] sm:$0xe] }
 0x167   :  { %v1441_v43 = vrot.slane %v1440_v12, 4  ;;  %v2024_v58 = vrot.slane %v2022_v13, 4  ;;  %v2027_v0 = vrot.slane %v2025_v14, 5  ;;  %v888_v18 = vrot.slane %v886_v36, 4  ;;  %v1661_v45 = vld [vmem:[#allocation2 + $0x5c] sm:$0x1] }
 0x168   :  { %v1432_v28 = vsel %vm4064_vm12, %v1427_v52, %v1431_v62  ;;  %v2014_v31 = vor.u32 %v2013_v15, %v2010_v33  ;;  %v2033_v10 = vrot.slane %v2031_v41, 5  ;;  %v889_v35 = vshll.u32 %v4192_v2, 16  ;;  %v1662_v46 = vld [vmem:[#allocation2 + $0x60] sm:$0xe]  ;;  %v1663_v56 = vld [vmem:[#allocation2 + $0x64] sm:$0x1] }
 0x169   :  { %1806 = vrot.lane.b32.xlu1 %v3515_v38, %s3871_s23  ;;  %v1446_v22 = vsel %vm4064_vm12, %v1441_v43, %v1445_v9  ;;  %v2028_v37 = vor.u32 %v2027_v0, %v2024_v58  ;;  %v895_v51 = vshll.u32 %v755_v23, 16  ;;  %v900_v26 = vshrl.u32 %v756_v19, 16  ;;  %v301_v61 = vld [vmem:[#allocation2 + $0x98] sm:$0x1]  ;;  %v2248_v3 = vld [vmem:[#allocation2 + $0x60] sm:$0xe] }
 0x16a   :  { %v3488_v36 = vcombine.low %v1432_v28, %v1446_v22  ;;  %v2015_v24 = vrot.slane %v2014_v31, 4  ;;  %v891_v39 = vrot.slane %v889_v35, 5  ;;  %v903_v44 = vshll.u32 %v756_v19, 16  ;;  %v2249_v62 = vld [vmem:[#allocation2 + $0x64] sm:$0x1] }
 0x16b   :  { %v2029_v48 = vrot.slane %v2028_v37, 4  ;;  %v897_v54 = vrot.slane %v895_v51, 5  ;;  %v902_v2 = vrot.slane %v900_v26, 4  ;;  %v909_v34 = vshll.u32 %v757_v6, 16  ;;  %v3764_v4 = vld [vmem:[#allocation2 + $0x70] ss:$8 sps:$4 sm:$0xff]  }
 0x16c   :  { %1615 = vrot.lane.b32.xlu0 %v3488_v36, %s3873_s25  ;;  %v2020_v38 = vsel %vm4064_vm12, %v2015_v24, %v2019_v16  ;;  %v892_v57 = vor.u32 %v891_v39, %v888_v18  ;;  %v905_v59 = vrot.slane %v903_v44, 5  ;;  %v1155_v60 = vrot.slane %v1071_v20, 5  ;;  %v2250_v32 = vld [vmem:[#allocation2 + $0x68] sm:$0xe]  ;;  %v2251_v12 = vld [vmem:[#allocation2 + $0x6c] sm:$0x1] }
 0x16d   :  { %1219 = vrot.lane.b32.xlu1 %v3475_v55, %s3870_s22  ;;  %v2034_v47 = vsel %vm4064_vm12, %v2029_v48, %v2033_v10  ;;  %v911_v7 = vrot.slane %v909_v34, 5  ;;  %v3463_v50 = vrot.slane %v1072_v21, 9  ;;  %v1159_v1 = vrot.slane %v1073_v27, 5  ;;  %v1351_v15 = vld [vmem:[#allocation2 + $0x68] sm:$0xf] }
 0x16e   :  { %v3528_v8 = vcombine.low %v2020_v38, %v2034_v47  ;;  %v893_v9 = vrot.slane %v892_v57, 4  ;;  %v906_v11 = vor.u32 %v905_v59, %v902_v2  ;;  %v1156_v17 = vsel %vm4051_vm11, %v3462_v49, %v1155_v60  ;;  %v1352_v30 = vld [vmem:[#allocation2 + $0x6c] sm:$0x1]  ;;  %v1353_v43 = vld [vmem:[#allocation2 + $0x70] sm:$0xf] }
 0x16f   :  { %v1160_v40 = vsel %vm4051_vm11, %v3463_v50, %v1159_v1  ;;  %v3502_v53 = vrot.slane %v1660_v42, 9  ;;  %v1742_v55 = vrot.slane %v1661_v45, 5  ;;  %v3503_v33 = vrot.slane %v1662_v46, 9  ;;  %v1354_v28 = vld [vmem:[#allocation2 + $0x74] sm:$0x1] }
 0x170   :  { %2203 = vrot.lane.b32.xlu0 %v3528_v8, %s3874_s30  ;;  %v898_v13 = vsel %vm4064_vm12, %v893_v9, %v897_v54  ;;  %v907_v14 = vrot.slane %v906_v11, 4  ;;  %v3474_v23 = vcombine.low %v1156_v17, %v1160_v40  ;;  %v1746_v52 = vrot.slane %v1663_v56, 5  ;;  %v758_v35 = vld [vmem:[#allocation2 + $0x60] sm:$0xf]  ;;  %v759_v21 = vld [vmem:[#allocation2 + $0x64] sm:$0x1] }
 0x171   :  { %1896 = vrot.lane.b32.xlu1 %v3764_v4, %s3869_s21  ;;  %v1743_v49 = vsel %vm4051_vm11, %v3502_v53, %v1742_v55  ;;  %v302_v16 = vsel %vm3952_vm4, 0, %v301_v61  ;;  %v3542_v41 = vrot.slane %v2248_v3, 9  ;;  %v2330_v19 = vrot.slane %v2249_v62, 5  ;;  %v760_v27 = vld [vmem:[#allocation2 + $0x68] sm:$0xf] }
 0x172   :  { %v912_v58 = vsel %vm4064_vm12, %v907_v14, %v911_v7  ;;  %v1747_v0 = vsel %vm4051_vm11, %v3503_v33, %v1746_v52  ;;  %303 = vst [vmem:[#allocation2 + $0x98] sm:$0x1] %v302_v16  ;;  %v3543_v18 = vrot.slane %v2250_v32, 9  ;;  %v2334_v20 = vrot.slane %v2251_v12, 5  ;;  %v3765_v36 = vld [vmem:[#allocation2 + $0x88] ss:$8 sps:$4 sm:$0xff]  }
 0x173   :  { %v3450_v31 = vcombine.low %v898_v13, %v912_v58  ;;  %v2331_v10 = vsel %vm4051_vm11, %v3542_v41, %v2330_v19  ;;  %v1504_v6 = vshrl.u32 %v1351_v15, 16  ;;  %v1507_v37 = vshll.u32 %v1351_v15, 16  ;;  %v761_v45 = vld [vmem:[#allocation2 + $0x6c] sm:$0x1]  ;;  %v1672_v34 = vld [vmem:[#allocation2 + $0x88] sm:$0xe] }
 0x174   :  { %1217 = vrot.lane.b32.xlu0 %v3474_v23, %s3870_s22  ;;  %v2335_v22 = vsel %vm4051_vm11, %v3543_v18, %v2334_v20  ;;  %v1513_v51 = vshll.u32 %v1352_v30, 16  ;;  %v1518_v26 = vshrl.u32 %v1353_v43, 16  ;;  %v3514_v24 = vcombine.low %v1743_v49, %v1747_v0  ;;  %v1673_v56 = vld [vmem:[#allocation2 + $0x8c] sm:$0x1]  ;;  %v1674_v61 = vld [vmem:[#allocation2 + $0x90] sm:$0xe] }
 0x175   :  { %1029 = vrot.lane.b32.xlu1 %v3450_v31, %s3866_s16  ;;  %v1506_v39 = vrot.slane %v1504_v6, 4  ;;  %v1521_v44 = vshll.u32 %v1353_v43, 16  ;;  %v1527_v42 = vshll.u32 %v1354_v28, 16  ;;  %v3554_v46 = vcombine.low %v2331_v10, %v2335_v22  ;;  %v1675_v7 = vld [vmem:[#allocation2 + $0x94] sm:$0x1] }
 0x176   :  { %v1509_v48 = vrot.slane %v1507_v37, 5  ;;  %v1520_v54 = vrot.slane %v1518_v26, 4  ;;  %v914_v2 = vshrl.u32 %v758_v35, 16  ;;  %v1515_v38 = vrot.slane %v1513_v51, 5  ;;  %v1347_v40 = vld [vmem:[#allocation2 + $0x58] sm:$0xf]  ;;  %v4422_v20 = vpop.permute.xlu1 %1300 }
 0x177   :  { %v1523_v57 = vrot.slane %v1521_v44, 5  ;;  %v917_v59 = vshll.u32 %v758_v35, 16  ;;  %v923_v60 = vshll.u32 %v759_v21, 16  ;;  %v928_v4 = vshrl.u32 %v760_v27, 16  ;;  %v1348_v49 = vld [vmem:[#allocation2 + $0x5c] sm:$0x1]  ;;  %v4424_v21 = vpop.permute.xlu0 %1298 }
 0x178   :  { %1804 = vrot.lane.b32.xlu0 %v3514_v24, %s3871_s23  ;;  %v1510_v3 = vor.u32 %v1509_v48, %v1506_v39  ;;  %v916_v62 = vrot.slane %v914_v2, 4  ;;  %v931_v47 = vshll.u32 %v760_v27, 16  ;;  %v1529_v1 = vrot.slane %v1527_v42, 5  ;;  %v1349_v16 = vld [vmem:[#allocation2 + $0x60] sm:$0xf] }
 0x179   :  { %1312 = vrot.lane.b32.xlu1 %v3765_v36, %s3868_s2  ;;  %v1524_v50 = vor.u32 %v1523_v57, %v1520_v54  ;;  %v919_v32 = vrot.slane %v917_v59, 5  ;;  %v925_v8 = vrot.slane %v923_v60, 5  ;;  %v930_v11 = vrot.slane %v928_v4, 4  ;;  %v3766_v53 = vld [vmem:[#allocation2 + $0x90] ss:$8 sps:$4 sm:$0xff]  }
 0x17a   :  { %v1511_v9 = vrot.slane %v1510_v3, 4  ;;  %v933_v17 = vrot.slane %v931_v47, 5  ;;  %v937_v12 = vshll.u32 %v761_v45, 16  ;;  %v3508_v13 = vrot.slane %v1672_v34, 9  ;;  %v3767_v19 = vld [vmem:[#allocation2 + $0x78] ss:$8 sps:$4 sm:$0xff]  }
 0x17b   :  { %v1525_v55 = vrot.slane %v1524_v50, 4  ;;  %v920_v33 = vor.u32 %v919_v32, %v916_v62  ;;  %v1766_v14 = vrot.slane %v1673_v56, 5  ;;  %v3509_v30 = vrot.slane %v1674_v61, 9  ;;  %v1350_v18 = vld [vmem:[#allocation2 + $0x64] sm:$0x1] }
 0x17c   :  { %2392 = vrot.lane.b32.xlu0 %v3554_v46, %s3872_s24  ;;  %v1516_v23 = vsel %vm4064_vm12, %v1511_v9, %v1515_v38  ;;  %v934_v52 = vor.u32 %v933_v17, %v930_v11  ;;  %v939_v15 = vrot.slane %v937_v12, 5  ;;  %v1770_v0 = vrot.slane %v1675_v7, 5  ;;  %v1082_v35 = vld [vmem:[#allocation2 + $0x80] sm:$0xe]  ;;  %v1083_v27 = vld [vmem:[#allocation2 + $0x84] sm:$0x1]  ;;  %v4440_v17 = vpop.permute.xlu0 %1886 }
 0x17d   :  { %1900 = vrot.lane.b32.xlu1 %v3766_v53, %s3869_s21  ;;  %v1530_v41 = vsel %vm4064_vm12, %v1525_v55, %v1529_v1  ;;  %v921_v43 = vrot.slane %v920_v33, 4  ;;  %v4420_v58 = vsel %vm4051_vm11, %v3508_v13, %v1766_v14  ;;  %v1476_v10 = vshrl.u32 %v1347_v40, 16  ;;  %v1084_v36 = vld [vmem:[#allocation2 + $0x88] sm:$0xe]  ;;  %v1085_v45 = vld [vmem:[#allocation2 + $0x8c] sm:$0x1] }
 0x17e   :  { %v3491_v28 = vcombine.low %v1516_v23, %v1530_v41  ;;  %v935_v31 = vrot.slane %v934_v52, 4  ;;  %v1479_v6 = vshll.u32 %v1347_v40, 16  ;;  %v1771_v37 = vsel %vm4051_vm11, %v3509_v30, %v1770_v0  ;;  %v1935_v46 = vld [vmem:[#allocation2 + $0x60] sm:$0xf]  ;;  %v1936_v61 = vld [vmem:[#allocation2 + $0x64] sm:$0x1] }
 0x17f   :  { %v926_v22 = vsel %vm4064_vm12, %v921_v43, %v925_v8  ;;  %v1485_v51 = vshll.u32 %v1348_v49, 16  ;;  %v1490_v26 = vshrl.u32 %v1349_v16, 16  ;;  %v3517_v39 = vcombine.low %v4420_v58, %v1771_v37  ;;  %v3768_v54 = vld [vmem:[#allocation2 + $0x80] ss:$8 sps:$4 sm:$0xff]   ;;  %v4435_v50 = vpop.permute.xlu1 %1209  ;;  %v1938_v9 = vld [vmem:[#allocation2 + $0x6c] sm:$0x1] }
 0x180   :  { %1310 = vrot.lane.b32.xlu0 %v3767_v19, %s3868_s2  ;;  %v940_v24 = vsel %vm4064_vm12, %v935_v31, %v939_v15  ;;  %v1478_v44 = vrot.slane %v1476_v10, 4  ;;  %v1481_v42 = vrot.slane %v1479_v6, 5  ;;  %v1493_v56 = vshll.u32 %v1349_v16, 16  ;;  %v1937_v47 = vld [vmem:[#allocation2 + $0x68] sm:$0xf]  ;;  %s3396_s2 = sshll.u32 %s3876_s1, 4  ;;  %s3397_s2 = int_to_ptr.vmem [resolvable:$true] %s3396_s2 }
 0x181   :  { %1621 = vrot.lane.b32.xlu1 %v3491_v28, %s3873_s25  ;;  %v3451_v48 = vcombine.low %v926_v22, %v940_v24  ;;  %v1487_v2 = vrot.slane %v1485_v51, 5  ;;  %v1492_v34 = vrot.slane %v1490_v26, 4  ;;  %v1499_v57 = vshll.u32 %v1350_v18, 16  ;;  %v1939_v33 = vld [vmem:[#allocation2 + $0x70] sm:$0xf]  ;;  %p3819_p9 = scmp.lt.s32.totalorder %s3397_s2, %s3397_s2 }
 0x182   :  { %v1482_v38 = vor.u32 %v1481_v42, %v1478_v44  ;;  %v3468_v59 = vrot.slane %v1082_v35, 9  ;;  %v1179_v60 = vrot.slane %v1083_v27, 5  ;;  %v1495_v3 = vrot.slane %v1493_v56, 5  ;;  %v1940_v15 = vld [vmem:[#allocation2 + $0x74] sm:$0x1] }
 0x183   :  { %v3469_v62 = vrot.slane %v1084_v36, 9  ;;  %v1183_v4 = vrot.slane %v1085_v45, 5  ;;  %v2064_v7 = vshrl.u32 %v1935_v46, 16  ;;  %v1501_v32 = vrot.slane %v1499_v57, 5  ;;  %v1941_v30 = vld [vmem:[#allocation2 + $0x78] sm:$0xf]  ;;  %v4447_v10 = vpop.permute.xlu1 %1798 }
 0x184   :  { %1898 = vrot.lane.b32.xlu0 %v3768_v54, %s3869_s21  ;;  %v1483_v1 = vrot.slane %v1482_v38, 4  ;;  %v1180_v8 = vsel %vm4051_vm11, %v3468_v59, %v1179_v60  ;;  %v2067_v11 = vshll.u32 %v1935_v46, 16  ;;  %v1496_v12 = vor.u32 %v1495_v3, %v1492_v34  ;;  %v1942_v43 = vld [vmem:[#allocation2 + $0x7c] sm:$0x1]  ;;  %v2252_v31 = vld [vmem:[#allocation2 + $0x70] sm:$0xe]  ;;  %v4452_v42 = vpop.permute.xlu0 %1796 }
 0x185   :  { %1031 = vrot.lane.b32.xlu1 %v3451_v48, %s3866_s16  ;;  %v1184_v40 = vsel %vm4051_vm11, %v3469_v62, %v1183_v4  ;;  %v2066_v53 = vrot.slane %v2064_v7, 4  ;;  %v2073_v55 = vshll.u32 %v1936_v61, 16  ;;  %v2078_v52 = vshrl.u32 %v1937_v47, 16  ;;  %v2253_v51 = vld [vmem:[#allocation2 + $0x74] sm:$0x1] }
 0x186   :  { %v1488_v13 = vsel %vm4064_vm12, %v1483_v1, %v1487_v2  ;;  %v3477_v14 = vcombine.low %v1180_v8, %v1184_v40  ;;  %v2069_v23 = vrot.slane %v2067_v11, 5  ;;  %v1497_v49 = vrot.slane %v1496_v12, 4  ;;  %v2254_v44 = vld [vmem:[#allocation2 + $0x78] sm:$0xe]  ;;  %v2255_v2 = vld [vmem:[#allocation2 + $0x7c] sm:$0x1] }
 0x187   :  { %v2075_v16 = vrot.slane %v2073_v55, 5  ;;  %v2081_v41 = vshll.u32 %v1937_v47, 16  ;;  %v2087_v19 = vshll.u32 %v1938_v9, 16  ;;  %v2080_v0 = vrot.slane %v2078_v52, 4  ;;  %v762_v57 = vld [vmem:[#allocation2 + $0x70] sm:$0xf] }
 0x188   :  { %v2070_v58 = vor.u32 %v2069_v23, %v2066_v53  ;;  %v2092_v18 = vshrl.u32 %v1939_v33, 16  ;;  %v2095_v28 = vshll.u32 %v1939_v33, 16  ;;  %v1502_v6 = vsel %vm4064_vm12, %v1497_v49, %v1501_v32  ;;  %v763_v1 = vld [vmem:[#allocation2 + $0x74] sm:$0x1]  ;;  %v4458_v32 = vpop.permute.xlu1 %1211  ;;  %v764_v12 = vld [vmem:[#allocation2 + $0x78] sm:$0xf] }
 0x189   :  { %1810 = vrot.lane.b32.xlu1 %v3517_v39, %s3871_s23  ;;  %v2083_v35 = vrot.slane %v2081_v41, 5  ;;  %v2089_v22 = vrot.slane %v2087_v19, 5  ;;  %v2101_v37 = vshll.u32 %v1940_v15, 16  ;;  %v3490_v26 = vcombine.low %v1488_v13, %v1502_v6  ;;  %v765_v40 = vld [vmem:[#allocation2 + $0x7c] sm:$0x1]  ;;  %v4468_v15 = vpop.permute.xlu0 %2384 }
 0x18a   :  { %v2071_v27 = vrot.slane %v2070_v58, 4  ;;  %v2094_v36 = vrot.slane %v2092_v18, 4  ;;  %v2097_v24 = vrot.slane %v2095_v28, 5  ;;  %v2106_v48 = vshrl.u32 %v1941_v30, 16  ;;  %v1078_v23 = vld [vmem:[#allocation2 + $0x70] sm:$0xe] }
 0x18b   :  { %v2084_v45 = vor.u32 %v2083_v35, %v2080_v0  ;;  %v2103_v46 = vrot.slane %v2101_v37, 5  ;;  %v2109_v54 = vshll.u32 %v1941_v30, 16  ;;  %1619 = vrot.lane.b32.xlu0 %v3490_v26, %s3873_s25  ;;  %v2115_v56 = vshll.u32 %v1942_v43, 16  ;;  %v1079_v52 = vld [vmem:[#allocation2 + $0x74] sm:$0x1] }
 0x18c   :  { %v2076_v39 = vsel %vm4064_vm12, %v2071_v27, %v2075_v16  ;;  %v2098_v34 = vor.u32 %v2097_v24, %v2094_v36  ;;  %v3544_v38 = vrot.slane %v2252_v31, 9  ;;  %v2108_v60 = vrot.slane %v2106_v48, 4  ;;  %v1080_v19 = vld [vmem:[#allocation2 + $0x78] sm:$0xe]  ;;  %v1081_v28 = vld [vmem:[#allocation2 + $0x7c] sm:$0x1] }
 0x18d   :  { %1223 = vrot.lane.b32.xlu1 %v3477_v14, %s3870_s22  ;;  %v2085_v59 = vrot.slane %v2084_v45, 4  ;;  %v2111_v61 = vrot.slane %v2109_v54, 5  ;;  %v2338_v3 = vrot.slane %v2253_v51, 5  ;;  %v2117_v4 = vrot.slane %v2115_v56, 5  ;;  %v1359_v37 = vld [vmem:[#allocation2 + $0x88] sm:$0xf]  ;;  %v4473_v45 = vpop.permute.xlu1 %1888 }
 0x18e   :  { %v2099_v62 = vrot.slane %v2098_v34, 4  ;;  %v3545_v47 = vrot.slane %v2254_v44, 9  ;;  %v2342_v7 = vrot.slane %v2255_v2, 5  ;;  %v942_v53 = vshrl.u32 %v762_v57, 16  ;;  %v1360_v24 = vld [vmem:[#allocation2 + $0x8c] sm:$0x1] }
 0x18f   :  { %v2090_v8 = vsel %vm4064_vm12, %v2085_v59, %v2089_v22  ;;  %v2112_v9 = vor.u32 %v2111_v61, %v2108_v60  ;;  %v2339_v11 = vsel %vm4051_vm11, %v3544_v38, %v2338_v3  ;;  %v945_v14 = vshll.u32 %v762_v57, 16  ;;  %v1361_v44 = vld [vmem:[#allocation2 + $0x90] sm:$0xf]  ;;  %v1668_v59 = vld [vmem:[#allocation2 + $0x78] sm:$0xe] }
 0x190   :  { %v3530_v55 = vcombine.low %v2076_v39, %v2090_v8  ;;  %v2104_v33 = vsel %vm4064_vm12, %v2099_v62, %v2103_v46  ;;  %v2343_v13 = vsel %vm4051_vm11, %v3545_v47, %v2342_v7  ;;  %v944_v16 = vrot.slane %v942_v53, 4  ;;  %v1362_v39 = vld [vmem:[#allocation2 + $0x94] sm:$0x1]  ;;  %v1669_v47 = vld [vmem:[#allocation2 + $0x7c] sm:$0x1] }
 0x191   :  { %v2113_v30 = vrot.slane %v2112_v9, 4  ;;  %v3555_v49 = vcombine.low %v2339_v11, %v2343_v13  ;;  %v951_v41 = vshll.u32 %v763_v1, 16  ;;  %v947_v43 = vrot.slane %v945_v14, 5  ;;  %v1670_v11 = vld [vmem:[#allocation2 + $0x80] sm:$0xe] }
 0x192   :  { %2207 = vrot.lane.b32.xlu0 %v3530_v55, %s3874_s30  ;;  %v956_v58 = vshrl.u32 %v764_v12, 16  ;;  %v959_v0 = vshll.u32 %v764_v12, 16  ;;  %v965_v18 = vshll.u32 %v765_v40, 16  ;;  %v3466_v35 = vrot.slane %v1078_v23, 9  ;;  %v1671_v12 = vld [vmem:[#allocation2 + $0x84] sm:$0x1] }
 0x193   :  { %v2118_v31 = vsel %vm4064_vm12, %v2113_v30, %v2117_v4  ;;  %v953_v6 = vrot.slane %v951_v41, 5  ;;  %v1171_v22 = vrot.slane %v1079_v52, 5  ;;  %v948_v26 = vor.u32 %v947_v43, %v944_v16  ;;  %v4479_v60 = vpop.permute.xlu0 %1021  ;;  %v766_v13 = vld [vmem:[#allocation2 + $0x80] sm:$0xf]  ;;  %v4488_v16 = vpop.permute.xlu1 %1304 }
 0x194   :  { %v3531_v51 = vcombine.low %v2104_v33, %v2118_v31  ;;  %v958_v27 = vrot.slane %v956_v58, 4  ;;  %v961_v36 = vrot.slane %v959_v0, 5  ;;  %v967_v46 = vrot.slane %v965_v18, 5  ;;  %v768_v0 = vld [vmem:[#allocation2 + $0x88] sm:$0xf] }
 0x195   :  { %v1172_v48 = vsel %vm4051_vm11, %v3466_v35, %v1171_v22  ;;  %v3467_v54 = vrot.slane %v1080_v19, 9  ;;  %v1175_v2 = vrot.slane %v1081_v28, 5  ;;  %v949_v34 = vrot.slane %v948_v26, 4 }
 0x196   :  { %2209 = vrot.lane.b32.xlu1 %v3531_v51, %s3874_s30  ;;  %2394 = vrot.lane.b32.xlu0 %v3555_v49, %s3872_s24  ;;  %v962_v56 = vor.u32 %v961_v36, %v958_v27  ;;  %v1560_v38 = vshrl.u32 %v1359_v37, 16  ;;  %v1563_v57 = vshll.u32 %v1359_v37, 16  ;;  %v1569_v3 = vshll.u32 %v1360_v24, 16  ;;  %v767_v49 = vld [vmem:[#allocation2 + $0x84] sm:$0x1] }
 0x197   :  { %v1176_v61 = vsel %vm4051_vm11, %v3467_v54, %v1175_v2  ;;  %v1574_v62 = vshrl.u32 %v1361_v44, 16  ;;  %v1577_v4 = vshll.u32 %v1361_v44, 16  ;;  %v954_v7 = vsel %vm4064_vm12, %v949_v34, %v953_v6  ;;  %v4492_v35 = vpop.permute.xlu0 %1302  ;;  %v769_v51 = vld [vmem:[#allocation2 + $0x8c] sm:$0x1] }
 0x198   :  { %v963_v1 = vrot.slane %v962_v56, 4  ;;  %v3476_v8 = vcombine.low %v1172_v48, %v1176_v61  ;;  %v1562_v9 = vrot.slane %v1560_v38, 4  ;;  %v1565_v40 = vrot.slane %v1563_v57, 5  ;;  %v1355_v48 = vld [vmem:[#allocation2 + $0x78] sm:$0xf] }
 0x199   :  { %v1571_v53 = vrot.slane %v1569_v3, 5  ;;  %v1576_v55 = vrot.slane %v1574_v62, 4  ;;  %v1579_v33 = vrot.slane %v1577_v4, 5  ;;  %v1583_v23 = vshll.u32 %v1362_v39, 16  ;;  %v1356_v56 = vld [vmem:[#allocation2 + $0x7c] sm:$0x1] }
 0x19a   :  { %v968_v14 = vsel %vm4064_vm12, %v963_v1, %v967_v46  ;;  %1221 = vrot.lane.b32.xlu0 %v3476_v8, %s3870_s22  ;;  %v3506_v52 = vrot.slane %v1668_v59, 9  ;;  %v1758_v30 = vrot.slane %v1669_v47, 5  ;;  %v1566_v19 = vor.u32 %v1565_v40, %v1562_v9  ;;  %v1357_v38 = vld [vmem:[#allocation2 + $0x80] sm:$0xf]  ;;  %v1358_v62 = vld [vmem:[#allocation2 + $0x84] sm:$0x1]  ;;  %v4501_v47 = vpop.permute.xlu1 %1892 }
 0x19b   :  { %v3452_v41 = vcombine.low %v954_v7, %v968_v14  ;;  %v1580_v43 = vor.u32 %v1579_v33, %v1576_v55  ;;  %v3507_v58 = vrot.slane %v1670_v11, 9  ;;  %v1585_v18 = vrot.slane %v1583_v23, 5  ;;  %v363_v4 = vld [vmem:[#allocation2 + $0x9c] sm:$0x1]  ;;  %v1947_v11 = vld [vmem:[#allocation2 + $0x90] sm:$0xf]  ;;  %v4505_v14 = vpop.permute.xlu0 %1890 }
 0x19c   :  { %v1759_v28 = vsel %vm4051_vm11, %v3506_v52, %v1758_v30  ;;  %v1762_v31 = vrot.slane %v1671_v12, 5  ;;  %v970_v6 = vshrl.u32 %v766_v13, 16  ;;  %v1567_v22 = vrot.slane %v1566_v19, 4  ;;  %v1948_v33 = vld [vmem:[#allocation2 + $0x94] sm:$0x1]  ;;  %s3814_s22 = scalar_lea.vmem %s3397_s2, 512 }
 0x19d   :  { %1033 = vrot.lane.b32.xlu1 %v3452_v41, %s3866_s16  ;;  %v1581_v37 = vrot.slane %v1580_v43, 4  ;;  %v973_v26 = vshll.u32 %v766_v13, 16  ;;  %v979_v27 = vshll.u32 %v767_v49, 16  ;;  %v984_v44 = vshrl.u32 %v768_v0, 16  ;;  %v3769_v13 = vld [vmem:[#allocation2] ss:$8 sps:$4 sm:$0xff]   ;;  %p3815_p8 = scmp.ne.s32.totalorder %s3397_s2, %s3814_s22  ;;  %p3820_p10 = scmp.lt.s32.totalorder %s3814_s22, %s3814_s22 }
 0x19e   :  { %v1763_v36 = vsel %vm4051_vm11, %v3507_v58, %v1762_v31  ;;  %v972_v24 = vrot.slane %v970_v6, 4  ;;  %v987_v46 = vshll.u32 %v768_v0, 16  ;;  %v1572_v54 = vsel %vm4064_vm12, %v1567_v22, %v1571_v53  ;;  %v1949_v41 = vld [vmem:[#allocation2 + $0x98] sm:$0xf]  ;;  %730 = vst.msk [vmem:[#allocation3] sm:$0xff] %vm729_vm14, %v3769_v13 }
 0x19f   :  { %v1586_v2 = vsel %vm4064_vm12, %v1581_v37, %v1585_v18  ;;  %v3516_v39 = vcombine.low %v1759_v28, %v1763_v36  ;;  %v975_v34 = vrot.slane %v973_v26, 5  ;;  %v981_v59 = vrot.slane %v979_v27, 5  ;;  %v1943_v18 = vld [vmem:[#allocation2 + $0x80] sm:$0xf]  ;;  %v3770_v37 = vld [vmem:[#allocation2 + $0x10] ss:$8 sps:$4 sm:$0xff]   ;;  %p3821_p11 = por %p3820_p10, %p3819_p9 }
 0x1a0   :  { %v3493_v57 = vcombine.low %v1572_v54, %v1586_v2  ;;  %v986_v61 = vrot.slane %v984_v44, 4  ;;  %v989_v3 = vrot.slane %v987_v46, 5  ;;  %v993_v1 = vshll.u32 %v769_v51, 16  ;;  %v4514_v44 = vpop.permute.xlu1 %1613  ;;  %v3775_v46 = vld [vmem:[#allocation2 + $0x20] ss:$8 sps:$4 sm:$0xff]   ;;  %731 = vst.msk [vmem:[#allocation3 + $0x8] sm:$0xff] %vm729_vm14, %v3770_v37 }
 0x1a1   :  { %1808 = vrot.lane.b32.xlu0 %v3516_v39, %s3871_s23  ;;  %v976_v7 = vor.u32 %v975_v34, %v972_v24  ;;  %v1532_v8 = vshrl.u32 %v1355_v48, 16  ;;  %v1535_v9 = vshll.u32 %v1355_v48, 16  ;;  %v1541_v40 = vshll.u32 %v1356_v56, 16  ;;  %v1944_v24 = vld [vmem:[#allocation2 + $0x84] sm:$0x1]  ;;  %732 = vst.msk [vmem:[#allocation3 + $0x10] sm:$0xff] %vm729_vm14, %v3775_v46  ;;  %p3822_p12 = pnand %p3821_p11, %p3815_p8 }
 0x1a2   :  { %1625 = vrot.lane.b32.xlu1 %v3493_v57, %s3873_s25  ;;  %v990_v12 = vor.u32 %v989_v3, %v986_v61  ;;  %v1546_v53 = vshrl.u32 %v1357_v38, 16  ;;  %v1549_v55 = vshll.u32 %v1357_v38, 16  ;;  %v995_v52 = vrot.slane %v993_v1, 5  ;;  %v1945_v34 = vld [vmem:[#allocation2 + $0x88] sm:$0xf]  ;;  %1046 = vst.msk [vmem:[#allocation3] sm:$0xff] %vm1045_vm15, %v4479_v60 }
 0x1a3   :  { %v977_v23 = vrot.slane %v976_v7, 4  ;;  %v1534_v30 = vrot.slane %v1532_v8, 4  ;;  %v1537_v49 = vrot.slane %v1535_v9, 5  ;;  %v1543_v43 = vrot.slane %v1541_v40, 5  ;;  %v1946_v61 = vld [vmem:[#allocation2 + $0x8c] sm:$0x1] }
 0x1a4   :  { %v991_v19 = vrot.slane %v990_v12, 4  ;;  %v1548_v58 = vrot.slane %v1546_v53, 4  ;;  %v1551_v0 = vrot.slane %v1549_v55, 5  ;;  %v1555_v6 = vshll.u32 %v1358_v62, 16  ;;  %v2260_v40 = vld [vmem:[#allocation2 + $0x90] sm:$0xe] }
 0x1a5   :  { %v982_v28 = vsel %vm4064_vm12, %v977_v23, %v981_v59  ;;  %v1538_v31 = vor.u32 %v1537_v49, %v1534_v30  ;;  %v364_v22 = vsel %vm3960_vm6, 0, %v363_v4  ;;  %v2148_v27 = vshrl.u32 %v1947_v11, 16  ;;  %v3777_v53 = vld [vmem:[#allocation2 + $0x30] ss:$8 sps:$4 sm:$0xff]   ;;  %v2256_v37 = vld [vmem:[#allocation2 + $0x80] sm:$0xe] }
 0x1a6   :  { %v996_v51 = vsel %vm4064_vm12, %v991_v19, %v995_v52  ;;  %v1552_v26 = vor.u32 %v1551_v0, %v1548_v58  ;;  %365 = vst [vmem:[#allocation2 + $0x9c] sm:$0x1] %v364_v22  ;;  %v2151_v36 = vshll.u32 %v1947_v11, 16  ;;  %v1557_v2 = vrot.slane %v1555_v6, 5  ;;  %v2261_v52 = vld [vmem:[#allocation2 + $0x94] sm:$0x1]  ;;  %v4525_v0 = vpop.permute.xlu1 %1802 }
 0x1a7   :  { %v3453_v48 = vcombine.low %v982_v28, %v996_v51  ;;  %v1539_v54 = vrot.slane %v1538_v31, 4  ;;  %v2157_v39 = vshll.u32 %v1948_v33, 16  ;;  %v2150_v38 = vrot.slane %v2148_v27, 4  ;;  %v4517_v3 = vpop.permute.xlu0 %1023  ;;  %v2262_v30 = vld [vmem:[#allocation2 + $0x98] sm:$0xe]  ;;  %733 = vst.msk [vmem:[#allocation3 + $0x18] sm:$0xff] %vm729_vm14, %v3777_v53 }
 0x1a8   :  { %v1553_v56 = vrot.slane %v1552_v26, 4  ;;  %v2153_v57 = vrot.slane %v2151_v36, 5  ;;  %v2162_v59 = vshrl.u32 %v1949_v41, 16  ;;  %v2165_v7 = vshll.u32 %v1949_v41, 16  ;;  %v3778_v49 = vld [vmem:[#allocation2 + $0x50] ss:$8 sps:$4 sm:$0xff]  }
 0x1a9   :  { %1035 = vrot.lane.b32.xlu1 %v3453_v48, %s3866_s16  ;;  %v1544_v62 = vsel %vm4064_vm12, %v1539_v54, %v1543_v43  ;;  %v2159_v4 = vrot.slane %v2157_v39, 5  ;;  %v2120_v1 = vshrl.u32 %v1943_v18, 16  ;;  %v2123_v12 = vshll.u32 %v1943_v18, 16  ;;  %v2257_v51 = vld [vmem:[#allocation2 + $0x84] sm:$0x1]  ;;  %734 = vst.msk [vmem:[#allocation3 + $0x20] sm:$0xff] %vm729_vm14, %v3778_v49 }
 0x1aa   :  { %v1558_v8 = vsel %vm4064_vm12, %v1553_v56, %v1557_v2  ;;  %v2154_v9 = vor.u32 %v2153_v57, %v2150_v38  ;;  %v2164_v11 = vrot.slane %v2162_v59, 4  ;;  %v2167_v33 = vrot.slane %v2165_v7, 5  ;;  %v3779_v48 = vld [vmem:[#allocation2 + $0x60] ss:$8 sps:$4 sm:$0xff]   ;;  %1047 = vst.msk [vmem:[#allocation3 + $0x8] sm:$0xff] %vm1045_vm15, %v4517_v3 }
 0x1ab   :  { %v3492_v55 = vcombine.low %v1544_v62, %v1558_v8  ;;  %v2122_v13 = vrot.slane %v2120_v1, 4  ;;  %v2129_v23 = vshll.u32 %v1944_v24, 16  ;;  %v2125_v43 = vrot.slane %v2123_v12, 5  ;;  %v2258_v24 = vld [vmem:[#allocation2 + $0x88] sm:$0xe]  ;;  %735 = vst.msk [vmem:[#allocation3 + $0x28] sm:$0xff] %vm729_vm14, %v3779_v48 }
 0x1ac   :  { %v2155_v19 = vrot.slane %v2154_v9, 4  ;;  %v2134_v58 = vshrl.u32 %v1945_v34, 16  ;;  %v2137_v41 = vshll.u32 %v1945_v34, 16  ;;  %v2168_v28 = vor.u32 %v2167_v33, %v2164_v11  ;;  %v1612_v46 = vpop.permute.xlu0 %1611  ;;  %v2259_v1 = vld [vmem:[#allocation2 + $0x8c] sm:$0x1]  ;;  %1234 = vst.msk [vmem:[#allocation3] sm:$0xff] %vm1233_vm0, %v4435_v50 }
 0x1ad   :  { %1623 = vrot.lane.b32.xlu0 %v3492_v55, %s3873_s25  ;;  %v1950_v18 = vld [vmem:[#allocation2 + $0x9c] sm:$0x1]  ;;  %v2131_v31 = vrot.slane %v2129_v23, 5  ;;  %v2143_v6 = vshll.u32 %v1946_v61, 16  ;;  %v2126_v27 = vor.u32 %v2125_v43, %v2122_v13  ;;  %v3548_v34 = vrot.slane %v2260_v40, 9  ;;  %v4537_v40 = vpop.permute.xlu1 %1215  ;;  %1235 = vst.msk [vmem:[#allocation3 + $0x8] sm:$0xff] %vm1233_vm0, %v4458_v32 }
 0x1ae   :  { %v2263_v22 = vld [vmem:[#allocation2 + $0x9c] sm:$0x1]  ;;  %v2171_v26 = vshll.u32 %v1950_v18, 16  ;;  %v2136_v36 = vrot.slane %v2134_v58, 4  ;;  %v2160_v54 = vsel %vm4064_vm12, %v2155_v19, %v2159_v4  ;;  %v2169_v2 = vrot.slane %v2168_v28, 4  ;;  %1324 = vst.msk [vmem:[#allocation3 + $0x8] sm:$0xff] %vm1322_vm1, %v4422_v20 }
 0x1af   :  { %v2139_v39 = vrot.slane %v2137_v41, 5  ;;  %v2127_v38 = vrot.slane %v2126_v27, 4  ;;  %v2354_v57 = vrot.slane %v2261_v52, 5  ;;  %v3549_v59 = vrot.slane %v2262_v30, 9  ;;  %v3780_v8 = vld [vmem:[#allocation2 + $0x70] ss:$8 sps:$4 sm:$0xff]  }
 0x1b0   :  { %v2173_v56 = vrot.slane %v2171_v26, 5  ;;  %v2145_v62 = vrot.slane %v2143_v6, 5  ;;  %v2358_v7 = vrot.slane %v2263_v22, 5  ;;  %v3546_v11 = vrot.slane %v2256_v37, 9  ;;  %736 = vst.msk [vmem:[#allocation3 + $0x30] sm:$0xff] %vm729_vm14, %v3780_v8  ;;  %v3784_v28 = vld [vmem:[#allocation5] sm:$0xff] }
 0x1b1   :  { %v2140_v61 = vor.u32 %v2139_v39, %v2136_v36  ;;  %v2132_v4 = vsel %vm4064_vm12, %v2127_v38, %v2131_v31  ;;  %v2346_v12 = vrot.slane %v2257_v51, 5  ;;  %v2355_v33 = vsel %vm4051_vm11, %v3548_v34, %v2354_v57  ;;  %v3781_v23 = vld [vmem:[#allocation2 + $0x80] ss:$8 sps:$4 sm:$0xff]   ;;  %1323 = vst.msk [vmem:[#allocation3] sm:$0xff] %vm1322_vm1, %v4424_v21 }
 0x1b2   :  { %v2174_v9 = vsel %vm4064_vm12, %v2169_v2, %v2173_v56  ;;  %v3547_v13 = vrot.slane %v2258_v24, 9  ;;  %v2359_v52 = vsel %vm4051_vm11, %v3549_v59, %v2358_v7  ;;  %v2350_v30 = vrot.slane %v2259_v1, 5  ;;  %v3776_v19 = vld [vmem:[%s5048_s3 + $0x20] ss:$0 sps:$4 sm:$0xff]   ;;  %737 = vst.msk [vmem:[#allocation3 + $0x38] sm:$0xff] %vm729_vm14, %v3781_v23  ;;  %v3788_v7 = vld [vmem:[#allocation5 + $0x40] sm:$0xff] }
 0x1b3   :  { %v3533_v53 = vcombine.low %v2160_v54, %v2174_v9  ;;  %v2141_v55 = vrot.slane %v2140_v61, 4  ;;  %v2200_v49 = vpop.permute.xlu0 %2199  ;;  %v2347_v41 = vsel %vm4051_vm11, %v3546_v11, %v2346_v12  ;;  %v3557_v5 = vcombine.low %v2355_v33, %v2359_v52  ;;  %1636 = vst.msk [vmem:[#allocation3] sm:$0xff] %vm1635_vm5, %v1612_v46  ;;  %1637 = vst.msk [vmem:[#allocation3 + $0x8] sm:$0xff] %vm1635_vm5, %v4514_v44  ;;  %v3787_v37 = vld [vmem:[#allocation5 + $0x30] sm:$0xff] }
 0x1b4   :  { %v2351_v60 = vsel %vm4051_vm11, %v3547_v13, %v2350_v30  ;;  %3695 = vmatprep.subr.msk.bf16.mxu1 %vm2493_vm9, %v3776_v19  ;;  %v2495_v63 = vsel %vm2493_vm9, %v3776_v19, 0  ;;  %v2645_v32 = vlaneseq  ;;  %1821 = vst.msk [vmem:[#allocation3] sm:$0xff] %vm1820_vm7, %v4452_v42  ;;  %1822 = vst.msk [vmem:[#allocation3 + $0x8] sm:$0xff] %vm1820_vm7, %v4447_v10  ;;  %vm2408_vm11 = vcmask 589312   ;;  %v3785_v42 = vld [vmem:[#allocation5 + $0x10] sm:$0xff] }
 0x1b5   :  { %2213 = vrot.lane.b32.xlu1 %v3533_v53, %s3874_s30  ;;  %v2146_v43 = vsel %vm4064_vm12, %v2141_v55, %v2145_v62  ;;  %3670 = vmatpush3.bf16.msra.mxu1 %v2495_v63  ;;  %v3875_v21 = vmov 1983009808   ;;  %v3556_v3 = vcombine.low %v2347_v41, %v2351_v60  ;;  %1911 = vst.msk [vmem:[#allocation3] sm:$0xff] %vm1910_vm8, %v4440_v17  ;;  %1912 = vst.msk [vmem:[#allocation3 + $0x8] sm:$0xff] %vm1910_vm8, %v4473_v45  ;;  %v3786_v45 = vld [vmem:[#allocation5 + $0x20] sm:$0xff]  ;;  %vm2468_vm12 = vcmask 588800  }
 0x1b6   :  { %v3532_v58 = vcombine.low %v2132_v4, %v2146_v43  ;;  %v2643_v44 = vunpack.c.l.s4 %v3875_v21  ;;  %v2646_v18 = vshrl.u32 %v2645_v32, 7  ;;  %v2602_v31 = vpack.c.bf16 %v3784_v28, %v3784_v28  ;;  %2224 = vst.msk [vmem:[#allocation3] sm:$0xff] %vm2223_vm10, %v2200_v49  ;;  %v3789_v9 = vld [vmem:[#allocation5 + $0x50] sm:$0xff]  ;;  %v3790_v55 = vld [vmem:[#allocation5 + $0x60] sm:$0xff] }
 0x1b7   :  { %v2202_v50 = vpop.permute.xlu1 %2201  ;;  %v2387_v20 = vpop.permute.xlu0 %2386  ;;  %v2603_v6 = vpack.c.bf16 %v3785_v42, %v3785_v42  ;;  %2409 = vst.msk [vmem:[#allocation3] sm:$0xff] %vm2408_vm11, %v4468_v15  ;;  %v2604_v22 = vpack.c.bf16 %v3786_v45, %v3786_v45  ;;  %v2605_v51 = vpack.c.bf16 %v3787_v37, %v3787_v37  ;;  %v2606_v1 = vpack.c.bf16 %v3788_v7, %v3788_v7  ;;  %v3791_v23 = vld [vmem:[#allocation5 + $0x70] sm:$0xff] }
 0x1b8   :  { %2211 = vrot.lane.b32.xlu0 %v3532_v58, %s3874_s30  ;;  %2225 = vst.msk [vmem:[#allocation3 + $0x8] sm:$0xff] %vm2223_vm10, %v2202_v50  ;;  %v2644_v10 = vunpack.c.0.s8 %v2643_v44  ;;  %v2607_v4 = vpack.c.bf16 %v3789_v9, %v3789_v9  ;;  %v2608_v33 = vpack.c.bf16 %v3790_v55, %v3790_v55  ;;  %v2609_v52 = vpack.c.bf16 %v3791_v23, %v3791_v23 }
 0x1b9   :  { %2398 = vrot.lane.b32.xlu1 %v3557_v5, %s3872_s24  ;;  %2410 = vst.msk [vmem:[#allocation3 + $0x8] sm:$0xff] %vm2408_vm11, %v2387_v20  ;;  %vm2997_vm13 = vcmask 58369   ;;  %vm2998_vm14 = vsmask.f32 1280 }
 0x1ba   :  { %v4588_v17 = vsub.s32 %v2644_v10, %v2646_v18 }
 0x1bc   :  { %2396 = vrot.lane.b32.xlu0 %v3556_v3, %s3872_s24  ;;  %v4591_v26 = vrot.slane %v2602_v31, %v4588_v17  ;;  %v4594_v27 = vrot.slane %v2603_v6, %v4588_v17  ;;  %v4599_v15 = vrot.slane %v2604_v22, %v4588_v17  ;;  %v4609_v48 = vrot.slane %v2605_v51, %v4588_v17 }
 0x1bd   :  { %v2676_v53 = vrot.slane %v2606_v1, %v4588_v17  ;;  %v2683_v13 = vrot.slane %v2607_v4, %v4588_v17  ;;  %v4652_v49 = vrot.slane %v2608_v33, %v4588_v17  ;;  %v4660_v58 = vrot.slane %v2609_v52, %v4588_v17 }
 0x1be   :  { %v4603_v46 = vcombine.high %v4591_v26, %v4591_v26  ;;  %2700 = vrot.lane.b32.xlu1 %v4594_v27, %s3866_s16  ;;  %v4613_v54 = vcombine.high %v4594_v27, %v4594_v27  ;;  %v2417_v2 = vld [vmem:[#allocation3] sm:$0xff]  ;;  %v4627_v38 = vcombine.high %v4599_v15, %v4599_v15  ;;  %v4636_v59 = vcombine.high %v4609_v48, %v4609_v48 }
 0x1bf   :  { %3671 = vmatprep.mubr.msk.bf16.mxu1 %vm2468_vm12, %v2417_v2  ;;  %v4654_v19 = vcombine.high %v2676_v53, %v2676_v53  ;;  %v4662_v41 = vcombine.high %v2683_v13, %v2683_v13  ;;  %v4669_v60 = vcombine.high %v4652_v49, %v4652_v49  ;;  %v2885_v50 = vshll.u32 %v4591_v26, 16 }
 0x1c0   :  { %v1214_v36 = vpop.permute.xlu0 %1213  ;;  %v1026_v24 = vpop.permute.xlu1 %1025  ;;  %2698 = vrot.lane.b32.xlu0 %v4591_v26, %s3866_s16  ;;  %v2418_v39 = vld [vmem:[#allocation3 + $0x8] sm:$0xff]  ;;  %v3032_v56 = vrot.slane %v4603_v46, 7  ;;  %v3034_v62 = vrot.slane %v4627_v38, 7  ;;  %v3035_v8 = vrot.slane %v4636_v59, 7  ;;  %v2890_v63 = vshll.u32 %v4594_v27, 16 }
 0x1c1   :  { %1048 = vst.msk [vmem:[#allocation3 + $0x10] sm:$0xff] %vm1045_vm15, %v1026_v24  ;;  %3672 = vmatmul.mubr.msk.bf16.vlgmr.msra.gmra.mrb[0].mxu1 %vm2468_vm12, %v2418_v39  ;;  %v3036_v5 = vrot.slane %v4654_v19, 7  ;;  %v3037_v32 = vrot.slane %v4662_v41, 7  ;;  %v4678_v20 = vcombine.high %v4660_v58, %v4660_v58  ;;  %v2895_v21 = vshll.u32 %v4599_v15, 16 }
 0x1c2   :  { %1236 = vst.msk [vmem:[#allocation3 + $0x10] sm:$0xff] %vm1233_vm0, %v1214_v36  ;;  %2704 = vrot.lane.b32.xlu1 %v4609_v48, %s3866_s16  ;;  %v2900_v44 = vshll.u32 %v4609_v48, 16  ;;  %v3038_v28 = vrot.slane %v4669_v60, 7  ;;  %v3580_v31 = vrot.slane %v2885_v50, 9  ;;  %v3581_v10 = vrot.slane %v2890_v63, 9 }
 0x1c3   :  { %1325 = vst.msk [vmem:[#allocation3 + $0x10] sm:$0xff] %vm1322_vm1, %v4492_v35  ;;  %v3033_v35 = vrot.slane %v4613_v54, 7  ;;  %v3039_v42 = vrot.slane %v4678_v20, 7  ;;  %v3582_v6 = vrot.slane %v2895_v21, 9  ;;  %v3152_v37 = vshll.u32 %v4613_v54, 16 }
 0x1c4   :  { %v4619_v34 = vpop.permute.xlu0 %2390  ;;  %2702 = vrot.lane.b32.xlu0 %v4599_v15, %s3866_s16  ;;  %v4629_v57 = vpop.permute.xlu1 %1308  ;;  %v3583_v45 = vrot.slane %v2900_v44, 9  ;;  %v2905_v51 = vshll.u32 %v2676_v53, 16  ;;  %v2910_v26 = vshll.u32 %v2683_v13, 16  ;;  %v3158_v24 = vshll.u32 %v4636_v59, 16 }
 0x1c6   :  { %3042 = vrot.lane.b32.xlu1 %v3033_v35, %s3866_s16  ;;  %v3717_v36 = vpack.i.bf16 %v3583_v45, %v3582_v6  ;;  %v3585_v48 = vrot.slane %v2910_v26, 9 }
 0x1c8   :  { %3040 = vrot.lane.b32.xlu0 %v3032_v56, %s3866_s16  ;;  %v3164_v56 = vshll.u32 %v4662_v41, 16 }
 0x1c9   :  { %v4638_v61 = vpop.permute.xlu0 %1800 }
 0x1ca   :  { %3046 = vrot.lane.b32.xlu1 %v3035_v8, %s3866_s16 }
 0x1cc   :  { %v1618_v11 = vpop.permute.xlu1 %1617  ;;  %3044 = vrot.lane.b32.xlu0 %v3034_v62, %s3866_s16 }
 0x1cd   :  { %v4644_v12 = vpop.permute.xlu0 %2388 }
 0x1ce   :  { %2708 = vrot.lane.b32.xlu1 %v2683_v13, %s3866_s16 }
 0x1d0   :  { %v2206_v30 = vpop.permute.xlu1 %2205  ;;  %2706 = vrot.lane.b32.xlu0 %v2676_v53, %s3866_s16 }
 0x1d1   :  { %v4656_v43 = vpop.permute.xlu0 %1306 }
 0x1d2   :  { %2712 = vrot.lane.b32.xlu1 %v4660_v58, %s3866_s16 }
 0x1d4   :  { %2710 = vrot.lane.b32.xlu0 %v4652_v49, %s3866_s16 }
 0x1d5   :  { %v4683_v18 = vpop.permute.xlu0 %1894 }
 0x1d6   :  { %3050 = vrot.lane.b32.xlu1 %v3037_v32, %s3866_s16 }
 0x1d7   :  { %v1028_v3 = vpop.permute.xlu1 %1027 }
 0x1d8   :  { %1049 = vst.msk [vmem:[#allocation3 + $0x18] sm:$0xff] %vm1045_vm15, %v1028_v3  ;;  %3048 = vrot.lane.b32.xlu0 %v3036_v5, %s3866_s16 }
 0x1d9   :  { %1237 = vst.msk [vmem:[#allocation3 + $0x18] sm:$0xff] %vm1233_vm0, %v4537_v40  ;;  %v3149_v40 = vshll.u32 %v4603_v46, 16  ;;  %v3584_v46 = vrot.slane %v2905_v51, 9 }
 0x1da   :  { %1326 = vst.msk [vmem:[#allocation3 + $0x18] sm:$0xff] %vm1322_vm1, %v4488_v16  ;;  %v3712_v16 = vpack.i.bf16 %v3581_v10, %v3580_v31  ;;  %3054 = vrot.lane.b32.xlu1 %v3039_v42, %s3866_s16  ;;  %v2920_v31 = vshll.u32 %v4660_v58, 16 }
 0x1db   :  { %1639 = vst.msk [vmem:[#allocation3 + $0x18] sm:$0xff] %vm1635_vm5, %v1618_v11  ;;  %v1807_v22 = vpop.permute.xlu1 %1806  ;;  %v3722_v15 = vpack.i.bf16 %v3152_v37, %v3149_v40  ;;  %v3167_v40 = vshll.u32 %v4669_v60, 16 }
 0x1dc   :  { %1824 = vst.msk [vmem:[#allocation3 + $0x18] sm:$0xff] %vm1820_vm7, %v4525_v0  ;;  %3052 = vrot.lane.b32.xlu0 %v3038_v28, %s3866_s16  ;;  %v3155_v0 = vshll.u32 %v4627_v38, 16  ;;  %v2915_v28 = vshll.u32 %v4652_v49, 16  ;;  %v3587_v42 = vrot.slane %v2920_v31, 9 }
 0x1dd   :  { %1914 = vst.msk [vmem:[#allocation3 + $0x18] sm:$0xff] %vm1910_vm8, %v4501_v47 }
 0x1de   :  { %2227 = vst.msk [vmem:[#allocation3 + $0x18] sm:$0xff] %vm2223_vm10, %v2206_v30  ;;  %v1616_v27 = vpop.permute.xlu0 %1615  ;;  %3718 = vrot.lane.b32.xlu1 %v3717_v36, %s3866_s16  ;;  %v3727_v2 = vpack.i.bf16 %v3158_v24, %v3155_v0  ;;  %v3586_v10 = vrot.slane %v2915_v28, 9 }
 0x1df   :  { %2412 = vst.msk [vmem:[#allocation3 + $0x18] sm:$0xff] %vm2408_vm11, %v4619_v34  ;;  %v1220_v47 = vpop.permute.xlu1 %1219  ;;  %v3732_v34 = vpack.i.bf16 %v3585_v48, %v3584_v46  ;;  %v2613_v48 = vld [vmem:[#allocation4 + $0x2] sm:$0x1] }
 0x1e0   :  { %1638 = vst.msk [vmem:[#allocation3 + $0x10] sm:$0xff] %vm1635_vm5, %v1616_v27  ;;  %3713 = vrot.lane.b32.xlu0 %v3712_v16, %s3866_s16  ;;  %v3170_v16 = vshll.u32 %v4678_v20, 16  ;;  %v4779_v27 = vld [vmem:[%s5049_s4] ss:$0 sm:$0xff] }
 0x1e1   :  { %1823 = vst.msk [vmem:[#allocation3 + $0x10] sm:$0xff] %vm1820_vm7, %v4638_v61 }
 0x1e2   :  { %1913 = vst.msk [vmem:[#allocation3 + $0x10] sm:$0xff] %vm1910_vm8, %v4505_v14  ;;  %v2204_v54 = vpop.permute.xlu0 %2203  ;;  %v3161_v14 = vshll.u32 %v4654_v19, 16  ;;  %3728 = vrot.lane.b32.xlu1 %v3727_v2, %s3866_s16  ;;  %v3747_v37 = vpack.i.bf16 %v3170_v16, %v3167_v40  ;;  %v3783_v16 = vld [vmem:[%s5050_s5 + $0x8] ss:$0 sps:$4 sm:$0xff]  }
 0x1e3   :  { %v1897_v39 = vpop.permute.xlu1 %1896  ;;  %2226 = vst.msk [vmem:[#allocation3 + $0x10] sm:$0xff] %vm2223_vm10, %v2204_v54 }
 0x1e4   :  { %2411 = vst.msk [vmem:[#allocation3 + $0x10] sm:$0xff] %vm2408_vm11, %v4644_v12  ;;  %3723 = vrot.lane.b32.xlu0 %v3722_v15, %s3866_s16  ;;  %v3742_v59 = vpack.i.bf16 %v3164_v56, %v3161_v14 }
 0x1e6   :  { %v1218_v38 = vpop.permute.xlu0 %1217  ;;  %v2420_v1 = vld [vmem:[#allocation3 + $0x18] sm:$0xff] }
 0x1e7   :  { %v1030_v35 = vpop.permute.xlu1 %1029 }
 0x1e8   :  { %1050 = vst.msk [vmem:[#allocation3 + $0x20] sm:$0xff] %vm1045_vm15, %v1030_v35  ;;  %3733 = vrot.lane.b32.xlu0 %v3732_v34, %s3866_s16 }
 0x1e9   :  { %1238 = vst.msk [vmem:[#allocation3 + $0x20] sm:$0xff] %vm1233_vm0, %v1218_v38 }
 0x1ea   :  { %1327 = vst.msk [vmem:[#allocation3 + $0x20] sm:$0xff] %vm1322_vm1, %v4656_v43  ;;  %v1805_v61 = vpop.permute.xlu0 %1804 }
 0x1eb   :  { %v1313_v62 = vpop.permute.xlu1 %1312  ;;  %v2419_v7 = vld [vmem:[#allocation3 + $0x10] sm:$0xff] }
 0x1ec   :  { %3675 = vmatprep.mubr.msk.bf16.mxu1 %vm2468_vm12, %v2419_v7  ;;  %3743 = vrot.lane.b32.xlu0 %v3742_v59, %s3866_s16 }
 0x1ed   :  { %3676 = vmatmul.mubr.msk.bf16.gmra.mrb[4].mxu1 %vm2468_vm12, %v2420_v1  ;;  %v3003_v1 = vld [vmem:[#allocation4 + $0x2] sm:$0x2] }
 0x1ee   :  { %v2393_v8 = vpop.permute.xlu0 %2392 }
 0x1ef   :  { %v1901_v9 = vpop.permute.xlu1 %1900 }
 0x1f2   :  { %v1311_v4 = vpop.permute.xlu0 %1310 }
 0x1f3   :  { %v1622_v11 = vpop.permute.xlu1 %1621 }
 0x1f6   :  { %v1899_v53 = vpop.permute.xlu0 %1898 }
 0x1f7   :  { %v1032_v12 = vpop.permute.xlu1 %1031 }
 0x1f8   :  { %1051 = vst.msk [vmem:[#allocation3 + $0x28] sm:$0xff] %vm1045_vm15, %v1032_v12 }
 0x1f9   :  { %1239 = vst.msk [vmem:[#allocation3 + $0x28] sm:$0xff] %vm1233_vm0, %v1220_v47 }
 0x1fa   :  { %1328 = vst.msk [vmem:[#allocation3 + $0x28] sm:$0xff] %vm1322_vm1, %v4629_v57 }
 0x1fb   :  { %1641 = vst.msk [vmem:[#allocation3 + $0x28] sm:$0xff] %vm1635_vm5, %v1622_v11  ;;  %v1811_v55 = vpop.permute.xlu1 %1810 }
 0x1fc   :  { %1826 = vst.msk [vmem:[#allocation3 + $0x28] sm:$0xff] %vm1820_vm7, %v1807_v22  ;;  %v3737_v22 = vpack.i.bf16 %v3587_v42, %v3586_v10 }
 0x1fd   :  { %1916 = vst.msk [vmem:[#allocation3 + $0x28] sm:$0xff] %vm1910_vm8, %v1897_v39  ;;  %v1620_v33 = vpop.permute.xlu0 %1619  ;;  %v2610_v39 = vld [vmem:[#allocation4] sm:$0x1] }
 0x1fe   :  { %1640 = vst.msk [vmem:[#allocation3 + $0x20] sm:$0xff] %vm1635_vm5, %v1620_v33  ;;  %3738 = vrot.lane.b32.xlu1 %v3737_v22, %s3866_s16 }
 0x1ff   :  { %1825 = vst.msk [vmem:[#allocation3 + $0x20] sm:$0xff] %vm1820_vm7, %v1805_v61  ;;  %v1224_v13 = vpop.permute.xlu1 %1223 }
 0x200   :  { %1915 = vst.msk [vmem:[#allocation3 + $0x20] sm:$0xff] %vm1910_vm8, %v4683_v18 }
 0x202   :  { %3748 = vrot.lane.b32.xlu1 %v3747_v37, %s3866_s16 }
 0x204   :  { %v2208_v23 = vpop.permute.xlu0 %2207 }
 0x205   :  { %2228 = vst.msk [vmem:[#allocation3 + $0x20] sm:$0xff] %vm2223_vm10, %v2208_v23 }
 0x206   :  { %2413 = vst.msk [vmem:[#allocation3 + $0x20] sm:$0xff] %vm2408_vm11, %v2393_v8 }
 0x208   :  { %v2210_v57 = vpop.permute.xlu1 %2209  ;;  %v2395_v52 = vpop.permute.xlu0 %2394 }
 0x209   :  { %2229 = vst.msk [vmem:[#allocation3 + $0x28] sm:$0xff] %vm2223_vm10, %v2210_v57 }
 0x20a   :  { %2414 = vst.msk [vmem:[#allocation3 + $0x28] sm:$0xff] %vm2408_vm11, %v2395_v52 }
 0x20c   :  { %v1222_v19 = vpop.permute.xlu0 %1221 }
 0x20d   :  { %v2421_v30 = vld [vmem:[#allocation3 + $0x20] sm:$0xff] }
 0x20e   :  { %3679 = vmatprep.mubr.msk.bf16.mxu1 %vm2468_vm12, %v2421_v30 }
 0x20f   :  { %v1034_v43 = vpop.permute.xlu1 %1033 }
 0x210   :  { %1052 = vst.msk [vmem:[#allocation3 + $0x30] sm:$0xff] %vm1045_vm15, %v1034_v43 }
 0x211   :  { %1240 = vst.msk [vmem:[#allocation3 + $0x30] sm:$0xff] %vm1233_vm0, %v1222_v19  ;;  %v2422_v41 = vld [vmem:[#allocation3 + $0x28] sm:$0xff] }
 0x212   :  { %1329 = vst.msk [vmem:[#allocation3 + $0x30] sm:$0xff] %vm1322_vm1, %v1311_v4  ;;  %3680 = vmatmul.mubr.msk.bf16.gmra.mrb[8].mxu1 %vm2468_vm12, %v2422_v41  ;;  %v3000_v4 = vld [vmem:[#allocation4] sm:$0x2] }
 0x213   :  { %v1809_v50 = vpop.permute.xlu0 %1808 }
 0x214   :  { %v1626_v5 = vpop.permute.xlu1 %1625 }
 0x21b   :  { %v1036_v63 = vpop.permute.xlu1 %1035 }
 0x21c   :  { %1053 = vst.msk [vmem:[#allocation3 + $0x38] sm:$0xff] %vm1045_vm15, %v1036_v63  ;;  %vm4795_vm15 = vmand %vm2997_vm13, %vm2998_vm14 }
 0x21d   :  { %1241 = vst.msk [vmem:[#allocation3 + $0x38] sm:$0xff] %vm1233_vm0, %v1224_v13  ;;  %vm2722_vm0 = vcmask 188480  }
 0x21e   :  { %1330 = vst.msk [vmem:[#allocation3 + $0x38] sm:$0xff] %vm1322_vm1, %v1313_v62  ;;  %vm4803_vm1 = vmand %vm2722_vm0, %vm242_vm2 }
 0x21f   :  { %1643 = vst.msk [vmem:[#allocation3 + $0x38] sm:$0xff] %vm1635_vm5, %v1626_v5  ;;  %v1624_v32 = vpop.permute.xlu0 %1623 }
 0x220   :  { %1642 = vst.msk [vmem:[#allocation3 + $0x30] sm:$0xff] %vm1635_vm5, %v1624_v32  ;;  %vm3064_vm5 = vcmask 189505  }
 0x221   :  { %1828 = vst.msk [vmem:[#allocation3 + $0x38] sm:$0xff] %vm1820_vm7, %v1811_v55  ;;  %1827 = vst.msk [vmem:[#allocation3 + $0x30] sm:$0xff] %vm1820_vm7, %v1809_v50  ;;  %v3782_v50 = vld [vmem:[%s5050_s5] sm:$0xff]   ;;  %vm3122_vm7 = vsmask.f32 7942 }
 0x222   :  { %1918 = vst.msk [vmem:[#allocation3 + $0x38] sm:$0xff] %vm1910_vm8, %v1901_v9  ;;  %1917 = vst.msk [vmem:[#allocation3 + $0x30] sm:$0xff] %vm1910_vm8, %v1899_v53  ;;  %3687 = vmatprep.subr.bf16.mxu0 %v3782_v50 }
 0x223   :  { %vm4819_vm2 = vmand %vm3064_vm5, %vm2998_vm14  ;;  %3688 = vmatpush3.bf16.msra.mxu0 %v3782_v50 }
 0x224   :  { %vm4839_vm8 = vmand %vm2997_vm13, %vm3122_vm7  ;;  %3696 = vmatprep.subr.msk.bf16.mxu0 %vm2493_vm9, %v3783_v16 }
 0x227   :  { %v2214_v21 = vpop.permute.xlu1 %2213 }
 0x228   :  { %2231 = vst.msk [vmem:[#allocation3 + $0x38] sm:$0xff] %vm2223_vm10, %v2214_v21 }
 0x22a   :  { %v2212_v44 = vpop.permute.xlu0 %2211 }
 0x22b   :  { %2230 = vst.msk [vmem:[#allocation3 + $0x30] sm:$0xff] %vm2223_vm10, %v2212_v44  ;;  %v2399_v3 = vpop.permute.xlu1 %2398  ;;  %vm4850_vm10 = vmand %vm2722_vm0, %vm304_vm3 }
 0x22c   :  { %2416 = vst.msk [vmem:[#allocation3 + $0x38] sm:$0xff] %vm2408_vm11, %v2399_v3  ;;  %vm4864_vm3 = vmand %vm3064_vm5, %vm3122_vm7 }
 0x22e   :  { %v2397_v18 = vpop.permute.xlu0 %2396 }
 0x22f   :  { %2415 = vst.msk [vmem:[#allocation3 + $0x30] sm:$0xff] %vm2408_vm11, %v2397_v18 }
 0x230   :  { %v2701_v38 = vpop.permute.xlu1 %2700 }
 0x232   :  { %v2699_v49 = vpop.permute.xlu0 %2698 }
 0x233   :  { %v2424_v45 = vld [vmem:[#allocation3 + $0x38] sm:$0xff] }
 0x234   :  { %v4807_v55 = vpop.permute.xlu1 %2704 }
 0x236   :  { %v2423_v6 = vld [vmem:[#allocation3 + $0x30] sm:$0xff]  ;;  %v4770_v58 = vpop.permute.xlu0 %2702 }
 0x237   :  { %3683 = vmatprep.mubr.msk.bf16.mxu1 %vm2468_vm12, %v2423_v6 }
 0x238   :  { %3684 = vmatmul.mubr.msk.bf16.gmra.mrb[12].mxu1 %vm2468_vm12, %v2424_v45  ;;  %v3043_v41 = vpop.permute.xlu1 %3042 }
 0x23a   :  { %v4772_v51 = vpop.permute.xlu0 %3040 }
 0x23e   :  { %v4774_v26 = vpop.permute.xlu0 %3044 }
 0x242   :  { %v4783_v46 = vpop.permute.xlu0 %2706 }
 0x246   :  { %v4791_v62 = vpop.permute.xlu0 %2710 }
 0x24a   :  { %v4811_v23 = vpop.permute.xlu0 %3048 }
 0x24e   :  { %v4826_v32 = vpop.permute.xlu0 %3052 }
 0x252   :  { %v3714_v45 = vpop.permute.xlu0 %3713 }
 0x294   :  { %v3673_v36 = vpop.f32.mrb[0].mxu1 }
 0x295   :  { %v2539_v60 = vadd.f32 %v3673_v36, %v4779_v27  ;;  %v2531_v0 = vpop.f32.mrb[1].mxu1 }
 0x296   :  { %v2532_v20 = vadd.f32 %v4779_v27, %v2531_v0  ;;  %v3674_v24 = vpop.f32.mrb[2].mxu1 }
 0x297   :  { %v2587_v47 = vmax.f32 %v2539_v60, 0.0  ;;  %v2534_v15 = vpop.f32.mrb[3].mxu1  ;;  %v3298_v24 = vsel %vm2493_vm9, %v3783_v16, 0  ;;  %vm3290_vm9 = vcmask 195584  }
 0x298   :  { %v2586_v54 = vmax.f32 %v2532_v20, 0.0  ;;  %v3715_v20 = vunpack.i.l.bf16 %v3714_v45  ;;  %3690 = vmatpush3.bf16.msra.mxu0 %v3298_v24 }
 0x299   :  { %v2595_v2 = vpack.c.bf16 %v2587_v47, %v2587_v47 }
 0x29a   :  { %v2594_v34 = vpack.c.bf16 %v2586_v54, %v2586_v54 }
 0x29b   :  { %v2614_v14 = vsel %vm3952_vm4, %v2595_v2, %v2613_v48  ;;  %v2769_v56 = vrot.slane %v2595_v2, %v4588_v17  ;;  %v3724_v48 = vpop.permute.xlu0 %3723 }
 0x29c   :  { %2615 = vst [vmem:[#allocation4 + $0x2] sm:$0x1] %v2614_v14  ;;  %v2611_v35 = vsel %vm3952_vm4, %v2594_v34, %v2610_v39  ;;  %v2762_v59 = vrot.slane %v2594_v34, %v4588_v17  ;;  %v3726_v34 = vunpack.i.h.bf16 %v3724_v48  ;;  %v3588_v14 = vld [vmem:[%s5051_s6] ss:$0 sm:$0xff]  ;;  %s3877_s6 = smov [#allocation8]  }
 0x29d   :  { %v2974_v61 = vcombine.high %v2769_v56, %v2769_v56  ;;  %2612 = vst [vmem:[#allocation4] sm:$0x1] %v2611_v35  ;;  %v2818_v19 = vshll.u32 %v2769_v56, 16  ;;  %v3725_v56 = vunpack.i.l.bf16 %v3724_v48  ;;  %s3384_s21 = sshll.u32 %s3877_s6, 4  ;;  %s3385_s21 = int_to_ptr.vmem [resolvable:$true] %s3384_s21 }
 0x29e   :  { %v2973_v8 = vcombine.high %v2762_v59, %v2762_v59  ;;  %v2813_v5 = vshll.u32 %v2762_v59, 16 }
 0x29f   :  { %v2982_v9 = vrot.slane %v2974_v61, 7  ;;  %v3573_v3 = vrot.slane %v2818_v19, 9  ;;  %v3094_v40 = vshll.u32 %v2974_v61, 16 }
 0x2a0   :  { %v2981_v11 = vrot.slane %v2973_v8, 7  ;;  %v3572_v28 = vrot.slane %v2813_v5, 9  ;;  %v3091_v37 = vshll.u32 %v2973_v8, 16 }
 0x2a1   :  { %v3004_v12 = vsel %vm4795_vm15, %v2982_v9, %v3003_v1 }
 0x2a2   :  { %3005 = vst [vmem:[#allocation4 + $0x2] sm:$0x2] %v3004_v12  ;;  %v3001_v33 = vsel %vm4795_vm15, %v2981_v11, %v3000_v4 }
 0x2a3   :  { %3002 = vst [vmem:[#allocation4] sm:$0x2] %v3001_v33  ;;  %v2727_v13 = vld [vmem:[#allocation4 + $0x2] sm:$0x1] }
 0x2a4   :  { %v2724_v57 = vld [vmem:[#allocation4] sm:$0x1]  ;;  %v2728_v52 = vsel %vm4803_vm1, %v2701_v38, %v2727_v13  ;;  %v3047_v38 = vpop.permute.xlu1 %3046 }
 0x2a5   :  { %v2725_v30 = vsel %vm4803_vm1, %v2699_v49, %v2724_v57  ;;  %2729 = vst [vmem:[#allocation4 + $0x2] sm:$0x1] %v2728_v52  ;;  %v2619_v52 = vld [vmem:[#allocation4 + $0x6] sm:$0x1] }
 0x2a6   :  { %2726 = vst [vmem:[#allocation4] sm:$0x1] %v2725_v30 }
 0x2a8   :  { %v4874_v57 = vpop.permute.xlu1 %2708 }
 0x2a9   :  { %v3069_v63 = vld [vmem:[#allocation4 + $0x2] sm:$0x2] }
 0x2aa   :  { %v3066_v21 = vld [vmem:[#allocation4] sm:$0x2]  ;;  %v3070_v44 = vsel %vm4819_vm2, %v3043_v41, %v3069_v63  ;;  %v2616_v41 = vld [vmem:[#allocation4 + $0x4] sm:$0x1] }
 0x2ab   :  { %v3067_v18 = vsel %vm4819_vm2, %v4772_v51, %v3066_v21  ;;  %3071 = vst [vmem:[#allocation4 + $0x2] sm:$0x2] %v3070_v44  ;;  %v3716_v51 = vunpack.i.h.bf16 %v3714_v45 }
 0x2ac   :  { %3068 = vst [vmem:[#allocation4] sm:$0x2] %v3067_v18  ;;  %v2863_v31 = vld [vmem:[#allocation4 + $0x2] sm:$0x1]  ;;  %v4882_v18 = vpop.permute.xlu1 %2712 }
 0x2ad   :  { %v2860_v10 = vld [vmem:[#allocation4] sm:$0x1]  ;;  %v2864_v42 = vsel %vm3960_vm6, %v3573_v3, %v2863_v31 }
 0x2ae   :  { %v2861_v6 = vsel %vm3960_vm6, %v3572_v28, %v2860_v10  ;;  %2865 = vst [vmem:[#allocation4 + $0x2] sm:$0x1] %v2864_v42  ;;  %v3009_v28 = vld [vmem:[#allocation4 + $0x6] sm:$0x2]  ;;  %v3006_v42 = vld [vmem:[#allocation4 + $0x4] sm:$0x2] }
 0x2af   :  { %2862 = vst [vmem:[#allocation4] sm:$0x1] %v2861_v6 }
 0x2b2   :  { %v3127_v49 = vld [vmem:[#allocation4 + $0x2] sm:$0x2] }
 0x2b3   :  { %v3124_v36 = vld [vmem:[#allocation4] sm:$0x2]  ;;  %v3128_v60 = vsel %vm4839_vm8, %v3094_v40, %v3127_v49 }
 0x2b4   :  { %v3125_v47 = vsel %vm4839_vm8, %v3091_v37, %v3124_v36  ;;  %3129 = vst [vmem:[#allocation4 + $0x2] sm:$0x2] %v3128_v60  ;;  %v4888_v37 = vpop.permute.xlu1 %3050 }
 0x2b5   :  { %3126 = vst [vmem:[#allocation4] sm:$0x2] %v3125_v47  ;;  %v2952_v15 = vld [vmem:[#allocation4 + $0x2] sm:$0x1] }
 0x2b6   :  { %v2949_v54 = vld [vmem:[#allocation4] sm:$0x1]  ;;  %v2953_v2 = vsel %vm4850_vm10, %v3716_v51, %v2952_v15 }
 0x2b7   :  { %v2950_v39 = vsel %vm4850_vm10, %v3715_v20, %v2949_v54  ;;  %2954 = vst [vmem:[#allocation4 + $0x2] sm:$0x1] %v2953_v2 }
 0x2b8   :  { %2951 = vst [vmem:[#allocation4] sm:$0x1] %v2950_v39  ;;  %v4896_v47 = vpop.permute.xlu1 %3054 }
 0x2bb   :  { %v3200_v35 = vld [vmem:[#allocation4 + $0x2] sm:$0x2] }
 0x2bc   :  { %v3197_v61 = vld [vmem:[#allocation4] sm:$0x2]  ;;  %v3201_v1 = vsel %vm4864_vm3, %v3726_v34, %v3200_v35  ;;  %v3719_v35 = vpop.permute.xlu1 %3718 }
 0x2bd   :  { %v3198_v4 = vsel %vm4864_vm3, %v3725_v56, %v3197_v61  ;;  %3202 = vst [vmem:[#allocation4 + $0x2] sm:$0x2] %v3201_v1  ;;  %v3721_v1 = vunpack.i.h.bf16 %v3719_v35 }
 0x2be   :  { %3199 = vst [vmem:[#allocation4] sm:$0x2] %v3198_v4 }
 0x2c0   :  { %v3677_v59 = vpop.f32.mrb[4].mxu1 }
 0x2c1   :  { %v2553_v8 = vadd.f32 %v3677_v59, %v4779_v27  ;;  %v2545_v9 = vpop.f32.mrb[5].mxu1 }
 0x2c2   :  { %v2546_v11 = vadd.f32 %v4779_v27, %v2545_v9  ;;  %v3678_v12 = vpop.f32.mrb[6].mxu1  ;;  %v3720_v9 = vunpack.i.l.bf16 %v3719_v35 }
 0x2c3   :  { %v2589_v33 = vmax.f32 %v2553_v8, 0.0  ;;  %v2548_v13 = vpop.f32.mrb[7].mxu1  ;;  %v3729_v12 = vpop.permute.xlu1 %3728 }
 0x2c4   :  { %v2588_v30 = vmax.f32 %v2546_v11, 0.0 }
 0x2c5   :  { %v2597_v19 = vpack.c.bf16 %v2589_v33, %v2589_v33 }
 0x2c6   :  { %v2596_v5 = vpack.c.bf16 %v2588_v30, %v2588_v30  ;;  %v3731_v30 = vunpack.i.h.bf16 %v3729_v12 }
 0x2c7   :  { %v2620_v50 = vsel %vm3952_vm4, %v2597_v19, %v2619_v52  ;;  %v2783_v63 = vrot.slane %v2597_v19, %v4588_v17 }
 0x2c8   :  { %2621 = vst [vmem:[#allocation4 + $0x6] sm:$0x1] %v2620_v50  ;;  %v2617_v21 = vsel %vm3952_vm4, %v2596_v5, %v2616_v41  ;;  %v2776_v44 = vrot.slane %v2596_v5, %v4588_v17  ;;  %v3730_v41 = vunpack.i.l.bf16 %v3729_v12 }
 0x2c9   :  { %v2976_v3 = vcombine.high %v2783_v63, %v2783_v63  ;;  %2618 = vst [vmem:[#allocation4 + $0x4] sm:$0x1] %v2617_v21  ;;  %v2828_v60 = vshll.u32 %v2783_v63, 16 }
 0x2ca   :  { %v2975_v31 = vcombine.high %v2776_v44, %v2776_v44  ;;  %v2823_v20 = vshll.u32 %v2776_v44, 16 }
 0x2cb   :  { %v2984_v10 = vrot.slane %v2976_v3, 7  ;;  %v3575_v54 = vrot.slane %v2828_v60, 9 }
 0x2cc   :  { %v2983_v6 = vrot.slane %v2975_v31, 7  ;;  %v3574_v39 = vrot.slane %v2823_v20, 9  ;;  %v3097_v59 = vshll.u32 %v2975_v31, 16 }
 0x2cd   :  { %v3010_v45 = vsel %vm4795_vm15, %v2984_v10, %v3009_v28 }
 0x2ce   :  { %3011 = vst [vmem:[#allocation4 + $0x6] sm:$0x2] %v3010_v45  ;;  %v3007_v40 = vsel %vm4795_vm15, %v2983_v6, %v3006_v42  ;;  %v2625_v42 = vld [vmem:[#allocation4 + $0xa] sm:$0x1] }
 0x2cf   :  { %v2733_v16 = vld [vmem:[#allocation4 + $0x6] sm:$0x1]  ;;  %3008 = vst [vmem:[#allocation4 + $0x4] sm:$0x2] %v3007_v40 }
 0x2d0   :  { %v2734_v49 = vsel %vm4803_vm1, %v4807_v55, %v2733_v16  ;;  %v2730_v51 = vld [vmem:[#allocation4 + $0x4] sm:$0x1]  ;;  %v2622_v16 = vld [vmem:[#allocation4 + $0x8] sm:$0x1] }
 0x2d1   :  { %2735 = vst [vmem:[#allocation4 + $0x6] sm:$0x1] %v2734_v49  ;;  %v2731_v36 = vsel %vm4803_vm1, %v4770_v58, %v2730_v51 }
 0x2d2   :  { %2732 = vst [vmem:[#allocation4 + $0x4] sm:$0x1] %v2731_v36 }
 0x2d5   :  { %v3075_v24 = vld [vmem:[#allocation4 + $0x6] sm:$0x2] }
 0x2d6   :  { %v3072_v15 = vld [vmem:[#allocation4 + $0x4] sm:$0x2]  ;;  %v3076_v48 = vsel %vm4819_vm2, %v3047_v38, %v3075_v24  ;;  %v3100_v38 = vshll.u32 %v2976_v3, 16  ;;  %v3221_v24 = vld [vmem:[#allocation4] sm:$0x3] }
 0x2d7   :  { %v3073_v55 = vsel %vm4819_vm2, %v4774_v26, %v3072_v15  ;;  %3077 = vst [vmem:[#allocation4 + $0x6] sm:$0x2] %v3076_v48  ;;  %v3222_v15 = vld [vmem:[#allocation4 + $0x2] sm:$0x3] }
 0x2d8   :  { %v2869_v2 = vld [vmem:[#allocation4 + $0x6] sm:$0x1]  ;;  %3074 = vst [vmem:[#allocation4 + $0x4] sm:$0x2] %v3073_v55 }
 0x2d9   :  { %v2870_v58 = vsel %vm3960_vm6, %v3575_v54, %v2869_v2  ;;  %v2866_v34 = vld [vmem:[#allocation4 + $0x4] sm:$0x1]  ;;  %v3015_v54 = vld [vmem:[#allocation4 + $0xa] sm:$0x2] }
 0x2da   :  { %2871 = vst [vmem:[#allocation4 + $0x6] sm:$0x1] %v2870_v58  ;;  %v2867_v56 = vsel %vm3960_vm6, %v3574_v39, %v2866_v34  ;;  %v3012_v39 = vld [vmem:[#allocation4 + $0x8] sm:$0x2]  ;;  %v3247_v34 = vcombine.low %v3221_v24, %v3222_v15 }
 0x2db   :  { %2868 = vst [vmem:[#allocation4 + $0x4] sm:$0x1] %v2867_v56 }
 0x2de   :  { %v3133_v61 = vld [vmem:[#allocation4 + $0x6] sm:$0x2] }
 0x2df   :  { %v3130_v8 = vld [vmem:[#allocation4 + $0x4] sm:$0x2]  ;;  %v3134_v26 = vsel %vm4839_vm8, %v3100_v38, %v3133_v61 }
 0x2e0   :  { %v3131_v4 = vsel %vm4839_vm8, %v3097_v59, %v3130_v8  ;;  %3135 = vst [vmem:[#allocation4 + $0x6] sm:$0x2] %v3134_v26  ;;  %v3255_v8 = vrot.slane %v3247_v34, %v4588_v17 }
 0x2e1   :  { %3132 = vst [vmem:[#allocation4 + $0x4] sm:$0x2] %v3131_v4  ;;  %v2958_v11 = vld [vmem:[#allocation4 + $0x6] sm:$0x1] }
 0x2e2   :  { %v2955_v33 = vld [vmem:[#allocation4 + $0x4] sm:$0x1]  ;;  %v2959_v13 = vsel %vm4850_vm10, %v3721_v1, %v2958_v11 }
 0x2e3   :  { %v2956_v52 = vsel %vm4850_vm10, %v3720_v9, %v2955_v33  ;;  %2960 = vst [vmem:[#allocation4 + $0x6] sm:$0x1] %v2959_v13 }
 0x2e4   :  { %2957 = vst [vmem:[#allocation4 + $0x4] sm:$0x1] %v2956_v52 }
 0x2e5   :  { %v3681_v19 = vpop.f32.mrb[8].mxu1 }
 0x2e6   :  { %v2567_v5 = vadd.f32 %v3681_v19, %v4779_v27  ;;  %v2559_v50 = vpop.f32.mrb[9].mxu1 }
 0x2e7   :  { %v2560_v63 = vadd.f32 %v4779_v27, %v2559_v50  ;;  %v3682_v21 = vpop.f32.mrb[10].mxu1  ;;  %v3206_v44 = vld [vmem:[#allocation4 + $0x6] sm:$0x2] }
 0x2e8   :  { %v2591_v3 = vmax.f32 %v2567_v5, 0.0  ;;  %v2562_v28 = vpop.f32.mrb[11].mxu1  ;;  %v3203_v31 = vld [vmem:[#allocation4 + $0x4] sm:$0x2]  ;;  %v3207_v10 = vsel %vm4864_vm3, %v3731_v30, %v3206_v44 }
 0x2e9   :  { %v2590_v6 = vmax.f32 %v2560_v63, 0.0  ;;  %v3204_v45 = vsel %vm4864_vm3, %v3730_v41, %v3203_v31  ;;  %3208 = vst [vmem:[#allocation4 + $0x6] sm:$0x2] %v3207_v10 }
 0x2ea   :  { %v2599_v40 = vpack.c.bf16 %v2591_v3, %v2591_v3  ;;  %3205 = vst [vmem:[#allocation4 + $0x4] sm:$0x2] %v3204_v45 }
 0x2eb   :  { %v2598_v49 = vpack.c.bf16 %v2590_v6, %v2590_v6 }
 0x2ec   :  { %v2626_v51 = vsel %vm3952_vm4, %v2599_v40, %v2625_v42  ;;  %v2797_v36 = vrot.slane %v2599_v40, %v4588_v17 }
 0x2ed   :  { %2627 = vst [vmem:[#allocation4 + $0xa] sm:$0x1] %v2626_v51  ;;  %v2623_v60 = vsel %vm3952_vm4, %v2598_v49, %v2622_v16  ;;  %v2790_v20 = vrot.slane %v2598_v49, %v4588_v17 }
 0x2ee   :  { %v2978_v48 = vcombine.high %v2797_v36, %v2797_v36  ;;  %2624 = vst [vmem:[#allocation4 + $0x8] sm:$0x1] %v2623_v60  ;;  %v2838_v33 = vshll.u32 %v2797_v36, 16 }
 0x2ef   :  { %v2977_v55 = vcombine.high %v2790_v20, %v2790_v20  ;;  %v2833_v13 = vshll.u32 %v2790_v20, 16 }
 0x2f0   :  { %v2986_v2 = vrot.slane %v2978_v48, 7  ;;  %v3224_v58 = vld [vmem:[#allocation4 + $0x6] sm:$0x3]  ;;  %v3106_v44 = vshll.u32 %v2978_v48, 16 }
 0x2f1   :  { %v2985_v56 = vrot.slane %v2977_v55, 7  ;;  %v3223_v35 = vld [vmem:[#allocation4 + $0x4] sm:$0x3]  ;;  %v3103_v28 = vshll.u32 %v2977_v55, 16 }
 0x2f2   :  { %v3016_v38 = vsel %vm4795_vm15, %v2986_v2, %v3015_v54  ;;  %v3248_v59 = vcombine.low %v3223_v35, %v3224_v58  ;;  %v2631_v35 = vld [vmem:[#allocation4 + $0xe] sm:$0x1] }
 0x2f3   :  { %3017 = vst [vmem:[#allocation4 + $0xa] sm:$0x2] %v3016_v38  ;;  %v3013_v61 = vsel %vm4795_vm15, %v2985_v56, %v3012_v39 }
 0x2f4   :  { %v2739_v1 = vld [vmem:[#allocation4 + $0xa] sm:$0x1]  ;;  %3014 = vst [vmem:[#allocation4 + $0x8] sm:$0x2] %v3013_v61  ;;  %v3262_v26 = vrot.slane %v3248_v59, %v4588_v17  ;;  %v2628_v61 = vld [vmem:[#allocation4 + $0xc] sm:$0x1] }
 0x2f5   :  { %v2740_v9 = vsel %vm4803_vm1, %v4874_v57, %v2739_v1  ;;  %v2736_v4 = vld [vmem:[#allocation4 + $0x8] sm:$0x1]  ;;  %v3577_v57 = vrot.slane %v2838_v33, 9 }
 0x2f6   :  { %2741 = vst [vmem:[#allocation4 + $0xa] sm:$0x1] %v2740_v9  ;;  %v2737_v11 = vsel %vm4803_vm1, %v4783_v46, %v2736_v4  ;;  %v3263_v12 = vcombine.low %v3255_v8, %v3262_v26  ;;  %v3576_v46 = vrot.slane %v2833_v13, 9  ;;  %v3018_v13 = vld [vmem:[#allocation4 + $0xc] sm:$0x2] }
 0x2f7   :  { %2738 = vst [vmem:[#allocation4 + $0x8] sm:$0x1] %v2737_v11  ;;  %v3021_v11 = vld [vmem:[#allocation4 + $0xe] sm:$0x2] }
 0x2f8   :  { %3691 = vmatprep.mubr.msk.bf16.mxu0 %vm3290_vm9, %v3263_v12 }
 0x2fa   :  { %v3081_v52 = vld [vmem:[#allocation4 + $0xa] sm:$0x2] }
 0x2fb   :  { %v3082_v30 = vsel %vm4819_vm2, %v4888_v37, %v3081_v52  ;;  %v3078_v19 = vld [vmem:[#allocation4 + $0x8] sm:$0x2]  ;;  %v3734_v37 = vpop.permute.xlu0 %3733 }
 0x2fc   :  { %3083 = vst [vmem:[#allocation4 + $0xa] sm:$0x2] %v3082_v30  ;;  %v3079_v41 = vsel %vm4819_vm2, %v4811_v23, %v3078_v19  ;;  %v3736_v31 = vunpack.i.h.bf16 %v3734_v37  ;;  %v3735_v42 = vunpack.i.l.bf16 %v3734_v37 }
 0x2fd   :  { %v2875_v5 = vld [vmem:[#allocation4 + $0xa] sm:$0x1]  ;;  %3080 = vst [vmem:[#allocation4 + $0x8] sm:$0x2] %v3079_v41 }
 0x2fe   :  { %v2876_v50 = vsel %vm3960_vm6, %v3577_v57, %v2875_v5  ;;  %v2872_v63 = vld [vmem:[#allocation4 + $0x8] sm:$0x1] }
 0x2ff   :  { %2877 = vst [vmem:[#allocation4 + $0xa] sm:$0x1] %v2876_v50  ;;  %v2873_v21 = vsel %vm3960_vm6, %v3576_v46, %v2872_v63  ;;  %v3744_v40 = vpop.permute.xlu0 %3743 }
 0x300   :  { %2874 = vst [vmem:[#allocation4 + $0x8] sm:$0x1] %v2873_v21  ;;  %v3746_v36 = vunpack.i.h.bf16 %v3744_v40  ;;  %v3745_v60 = vunpack.i.l.bf16 %v3744_v40 }
 0x303   :  { %v3139_v3 = vld [vmem:[#allocation4 + $0xa] sm:$0x2] }
 0x304   :  { %v3140_v23 = vsel %vm4839_vm8, %v3106_v44, %v3139_v3  ;;  %v3136_v10 = vld [vmem:[#allocation4 + $0x8] sm:$0x2] }
 0x305   :  { %3141 = vst [vmem:[#allocation4 + $0xa] sm:$0x2] %v3140_v23  ;;  %v3137_v6 = vsel %vm4839_vm8, %v3103_v28, %v3136_v10 }
 0x306   :  { %3138 = vst [vmem:[#allocation4 + $0x8] sm:$0x2] %v3137_v6  ;;  %v2964_v45 = vld [vmem:[#allocation4 + $0xa] sm:$0x1] }
 0x307   :  { %v2961_v16 = vld [vmem:[#allocation4 + $0x8] sm:$0x1]  ;;  %v2965_v49 = vsel %vm4850_vm10, %v3736_v31, %v2964_v45 }
 0x308   :  { %v2962_v51 = vsel %vm4850_vm10, %v3735_v42, %v2961_v16  ;;  %2966 = vst [vmem:[#allocation4 + $0xa] sm:$0x1] %v2965_v49 }
 0x309   :  { %2963 = vst [vmem:[#allocation4 + $0x8] sm:$0x1] %v2962_v51 }
 0x30b   :  { %v3685_v20 = vpop.f32.mrb[12].mxu1 }
 0x30c   :  { %v2581_v24 = vadd.f32 %v3685_v20, %v4779_v27  ;;  %v2573_v15 = vpop.f32.mrb[13].mxu1  ;;  %v3212_v48 = vld [vmem:[#allocation4 + $0xa] sm:$0x2] }
 0x30d   :  { %v2574_v54 = vadd.f32 %v4779_v27, %v2573_v15  ;;  %v3686_v55 = vpop.f32.mrb[14].mxu1  ;;  %v3209_v2 = vld [vmem:[#allocation4 + $0x8] sm:$0x2]  ;;  %v3213_v39 = vsel %vm4864_vm3, %v3746_v36, %v3212_v48 }
 0x30e   :  { %v2593_v58 = vmax.f32 %v2581_v24, 0.0  ;;  %v2576_v34 = vpop.f32.mrb[15].mxu1  ;;  %v3210_v56 = vsel %vm4864_vm3, %v3745_v60, %v3209_v2  ;;  %3214 = vst [vmem:[#allocation4 + $0xa] sm:$0x2] %v3213_v39 }
 0x30f   :  { %v2592_v38 = vmax.f32 %v2574_v54, 0.0  ;;  %3211 = vst [vmem:[#allocation4 + $0x8] sm:$0x2] %v3210_v56 }
 0x310   :  { %v2601_v59 = vpack.c.bf16 %v2593_v58, %v2593_v58 }
 0x311   :  { %v2600_v1 = vpack.c.bf16 %v2592_v38, %v2592_v38 }
 0x312   :  { %v2632_v27 = vsel %vm3952_vm4, %v2601_v59, %v2631_v35  ;;  %v2811_v8 = vrot.slane %v2601_v59, %v4588_v17 }
 0x313   :  { %2633 = vst [vmem:[#allocation4 + $0xe] sm:$0x1] %v2632_v27  ;;  %v2629_v26 = vsel %vm3952_vm4, %v2600_v1, %v2628_v61  ;;  %v2804_v9 = vrot.slane %v2600_v1, %v4588_v17  ;;  %vm3374_vm4 = vcmask 261120  }
 0x314   :  { %v2980_v4 = vcombine.high %v2811_v8, %v2811_v8  ;;  %2630 = vst [vmem:[#allocation4 + $0xc] sm:$0x1] %v2629_v26  ;;  %v2848_v46 = vshll.u32 %v2811_v8, 16 }
 0x315   :  { %v2979_v12 = vcombine.high %v2804_v9, %v2804_v9  ;;  %v2843_v50 = vshll.u32 %v2804_v9, 16  ;;  %v3226_v54 = vld [vmem:[#allocation4 + $0xa] sm:$0x3] }
 0x316   :  { %v2988_v33 = vrot.slane %v2980_v4, 7  ;;  %v3579_v37 = vrot.slane %v2848_v46, 9  ;;  %v3112_v31 = vshll.u32 %v2980_v4, 16  ;;  %v3225_v48 = vld [vmem:[#allocation4 + $0x8] sm:$0x3] }
 0x317   :  { %v2987_v52 = vrot.slane %v2979_v12, 7  ;;  %v3578_v3 = vrot.slane %v2843_v50, 9  ;;  %v3109_v10 = vshll.u32 %v2979_v12, 16  ;;  %v3264_v2 = vcombine.low %v3225_v48, %v3226_v54 }
 0x318   :  { %v3022_v30 = vsel %vm4795_vm15, %v2988_v33, %v3021_v11 }
 0x319   :  { %3023 = vst [vmem:[#allocation4 + $0xe] sm:$0x2] %v3022_v30  ;;  %v3019_v19 = vsel %vm4795_vm15, %v2987_v52, %v3018_v13  ;;  %v3272_v58 = vrot.slane %v3264_v2, %v4588_v17 }
 0x31a   :  { %v2745_v57 = vld [vmem:[#allocation4 + $0xe] sm:$0x1]  ;;  %3020 = vst [vmem:[#allocation4 + $0xc] sm:$0x2] %v3019_v19 }
 0x31b   :  { %v2746_v25 = vsel %vm4803_vm1, %v4882_v18, %v2745_v57  ;;  %v2742_v41 = vld [vmem:[#allocation4 + $0xc] sm:$0x1] }
 0x31c   :  { %2747 = vst [vmem:[#allocation4 + $0xe] sm:$0x1] %v2746_v25  ;;  %v2743_v5 = vsel %vm4803_vm1, %v4791_v62, %v2742_v41 }
 0x31d   :  { %2744 = vst [vmem:[#allocation4 + $0xc] sm:$0x1] %v2743_v5 }
 0x320   :  { %v3087_v63 = vld [vmem:[#allocation4 + $0xe] sm:$0x2] }
 0x321   :  { %v3088_v7 = vsel %vm4819_vm2, %v4896_v47, %v3087_v63  ;;  %v3084_v21 = vld [vmem:[#allocation4 + $0xc] sm:$0x2]  ;;  %v3739_v47 = vpop.permute.xlu1 %3738 }
 0x322   :  { %3089 = vst [vmem:[#allocation4 + $0xe] sm:$0x2] %v3088_v7  ;;  %v3085_v18 = vsel %vm4819_vm2, %v4826_v32, %v3084_v21  ;;  %v3741_v42 = vunpack.i.h.bf16 %v3739_v47  ;;  %v3740_v6 = vunpack.i.l.bf16 %v3739_v47 }
 0x323   :  { %v2881_v44 = vld [vmem:[#allocation4 + $0xe] sm:$0x1]  ;;  %3086 = vst [vmem:[#allocation4 + $0xc] sm:$0x2] %v3085_v18 }
 0x324   :  { %v2882_v62 = vsel %vm3960_vm6, %v3579_v37, %v2881_v44  ;;  %v2878_v53 = vld [vmem:[#allocation4 + $0xc] sm:$0x1] }
 0x325   :  { %2883 = vst [vmem:[#allocation4 + $0xe] sm:$0x1] %v2882_v62  ;;  %v2879_v28 = vsel %vm3960_vm6, %v3578_v3, %v2878_v53  ;;  %v3749_v16 = vpop.permute.xlu1 %3748  ;;  %vm3369_vm6 = vcmask 257024  }
 0x326   :  { %2880 = vst [vmem:[#allocation4 + $0xc] sm:$0x1] %v2879_v28  ;;  %v3751_v36 = vunpack.i.h.bf16 %v3749_v16  ;;  %v3750_v60 = vunpack.i.l.bf16 %v3749_v16 }
 0x329   :  { %v3145_v23 = vld [vmem:[#allocation4 + $0xe] sm:$0x2] }
 0x32a   :  { %v3146_v43 = vsel %vm4839_vm8, %v3112_v31, %v3145_v23  ;;  %v3142_v32 = vld [vmem:[#allocation4 + $0xc] sm:$0x2] }
 0x32b   :  { %3147 = vst [vmem:[#allocation4 + $0xe] sm:$0x2] %v3146_v43  ;;  %v3143_v45 = vsel %vm4839_vm8, %v3109_v10, %v3142_v32 }
 0x32c   :  { %3144 = vst [vmem:[#allocation4 + $0xc] sm:$0x2] %v3143_v45  ;;  %v2970_v40 = vld [vmem:[#allocation4 + $0xe] sm:$0x1] }
 0x32d   :  { %v2967_v29 = vld [vmem:[#allocation4 + $0xc] sm:$0x1]  ;;  %v2971_v49 = vsel %vm4850_vm10, %v3741_v42, %v2970_v40 }
 0x32e   :  { %v2968_v51 = vsel %vm4850_vm10, %v3740_v6, %v2967_v29  ;;  %2972 = vst [vmem:[#allocation4 + $0xe] sm:$0x1] %v2971_v49 }
 0x32f   :  { %2969 = vst [vmem:[#allocation4 + $0xc] sm:$0x1] %v2968_v51 }
 0x332   :  { %v3218_v20 = vld [vmem:[#allocation4 + $0xe] sm:$0x2] }
 0x333   :  { %v3215_v24 = vld [vmem:[#allocation4 + $0xc] sm:$0x2]  ;;  %v3219_v22 = vsel %vm4864_vm3, %v3751_v36, %v3218_v20 }
 0x334   :  { %v3216_v15 = vsel %vm4864_vm3, %v3750_v60, %v3215_v24  ;;  %3220 = vst [vmem:[#allocation4 + $0xe] sm:$0x2] %v3219_v22 }
 0x335   :  { %3217 = vst [vmem:[#allocation4 + $0xc] sm:$0x2] %v3216_v15 }
 0x33b   :  { %v3228_v55 = vld [vmem:[#allocation4 + $0xe] sm:$0x3] }
 0x33c   :  { %v3227_v0 = vld [vmem:[#allocation4 + $0xc] sm:$0x3] }
 0x33d   :  { %v3265_v39 = vcombine.low %v3227_v0, %v3228_v55 }
 0x33f   :  { %v3279_v34 = vrot.slane %v3265_v39, %v4588_v17 }
 0x341   :  { %v3280_v56 = vcombine.low %v3272_v58, %v3279_v34 }
 0x343   :  { %3692 = vmatmul.mubr.msk.bf16.vlgmr.msra.gmra.mrb[16].mxu0 %vm3290_vm9, %v3280_v56 }
 0x416   :  { %v3693_v35 = vpop.f32.mrb[16].mxu0 }
 0x417   :  { %v3343_v38 = vadd.f32 %v3693_v35, %v3588_v14  ;;  %v3334_v59 = vpop.f32.mrb[17].mxu0 }
 0x418   :  { %v3335_v61 = vadd.f32 %v3588_v14, %v3334_v59  ;;  %v3694_v1 = vpop.f32.mrb[18].mxu0 }
 0x419   :  { %v3351_v27 = vmax.f32 %v3343_v38, 0.0  ;;  %3377 = vst.msk [vmem:[#allocation9 + $0x10] sm:$0xff] %vm3374_vm4, %v3343_v38  ;;  %v3346_v8 = vadd.f32 %v3694_v1, %v3588_v14  ;;  %v3337_v17 = vpop.f32.mrb[19].mxu0 }
 0x41a   :  { %v3349_v26 = vmax.f32 %v3335_v61, 0.0  ;;  %3375 = vst.msk [vmem:[#allocation9] sm:$0xff] %vm3374_vm4, %v3335_v61  ;;  %v3338_v9 = vadd.f32 %v3588_v14, %v3337_v17 }
 0x41b   :  { %v3615_v4 = vpack.c.bf16 %v3351_v27, %v3351_v27  ;;  %v3352_v11 = vmax.f32 %v3346_v8, 0.0  ;;  %3378 = vst.msk [vmem:[#allocation9 + $0x18] sm:$0xff] %vm3374_vm4, %v3346_v8 }
 0x41c   :  { %v3613_v12 = vpack.c.bf16 %v3349_v26, %v3349_v26  ;;  %v3350_v33 = vmax.f32 %v3338_v9, 0.0  ;;  %3376 = vst.msk [vmem:[#allocation9 + $0x8] sm:$0xff] %vm3374_vm4, %v3338_v9 }
 0x41d   :  { %3372 = vst.msk [vmem:[#allocation8 + $0x8] sm:$0xf] %vm3369_vm6, %v3615_v4  ;;  %v3616_v13 = vpack.c.bf16 %v3352_v11, %v3352_v11 }
 0x41e   :  { %3825 = shalt.err (!%p3822_p12)
}
 0x41f   :  { %s3826_s26 = scalar_lea.hbm %s5053_s8, 512 }
 0x420   :  { %p3827_p13 = scmp.ne.s32.totalorder %s5053_s8, %s3826_s26  ;;  %p3830_p0 = scmp.lt.u32.totalorder %s3826_s26, %s5053_s8 }
 0x422   :  { %p3832_p1 = pnand %p3830_p0, %p3827_p13 }
 0x424   :  { %3835 = shalt.err (!%p3832_p1)
}
 0x425   :  { %3402 = dma.vmem_to_hbm [thread:$0]  %s3397_s2, 512, %s5053_s8, [#allocation10], %s3865_s15, %s3865_s15, %s3866_s16   ;;  %3370 = vst.msk [vmem:[#allocation8] sm:$0xf] %vm3369_vm6, %v3613_v12  ;;  %v3614_v52 = vpack.c.bf16 %v3350_v33, %v3350_v33  ;;  %3373 = vst.msk [vmem:[#allocation8 + $0xc] sm:$0xf] %vm3369_vm6, %v3616_v13 }
 0x426   :  { %s3836_s11 = scalar_lea.vmem %s3385_s21, 256  ;;  %p3841_p3 = scmp.lt.s32.totalorder %s3385_s21, %s3385_s21 }
 0x427   :  { %3371 = vst.msk [vmem:[#allocation8 + $0x4] sm:$0xf] %vm3369_vm6, %v3614_v52  ;;  %p3837_p2 = scmp.ne.s32.totalorder %s3385_s21, %s3836_s11  ;;  %p3842_p4 = scmp.lt.s32.totalorder %s3836_s11, %s3836_s11 }
 0x429   :  { %p3843_p5 = por %p3842_p4, %p3841_p3 }
 0x42b   :  { %p3844_p6 = pnand %p3843_p5, %p3837_p2 }
 0x42d   :  { %3847 = shalt.err (!%p3844_p6)
}
 0x42e   :  { %s3848_s14 = scalar_lea.hbm %s5052_s7, 256 }
 0x42f   :  { %p3849_p7 = scmp.ne.s32.totalorder %s5052_s7, %s3848_s14  ;;  %p3852_p8 = scmp.lt.u32.totalorder %s3848_s14, %s5052_s7 }
 0x431   :  { %p3854_p9 = pnand %p3852_p8, %p3849_p7 }
 0x433   :  { %3857 = shalt.err (!%p3854_p9)
}
 0x434   :  { %s3878_s17 = smov 4  }
 0x435   :  { %3390 = dma.vmem_to_hbm [thread:$0]  %s3385_s21, 256, %s5052_s7, [#allocation7], %s3872_s24, %s3872_s24, %s3878_s17  }
 0x436   :  { %3860 = dma.done.wait [#allocation7], 256  }
 0x437   :  { %3861 = vsyncadd [#allocation7], 4294967040 }
 0x438   :  { %3862 = dma.done.wait [#allocation10], 512  }
 0x439   :  { %3863 = vsyncadd [#allocation10], 4294966784 }
 0x43a   :  { %3409 = vsyncpa [#allocation6], 1 }
 0x43b   :  { %3410 = vsyncpa [#allocation7], 1 }
 0x43c   :  { %3411 = vsyncpa [#allocation10], 1 }

</bundles_post_ra>
